<compile_context>
chip_gen: v5e
topology: v5e:2x2
jax: 0.10.0
libtpu: 0.0.40
codegen_flags: <defaults>
</compile_context>

<pallas_src>
import functools
import math

import jax
import jax.numpy as jnp
from jax.experimental import pallas as pl
from jax.experimental.pallas import tpu as pltpu


# ---------------------------------------------------------------------------
# Pallas kernels
# ---------------------------------------------------------------------------

def _proj_kernel(x_ref, w_ref, o_ref):
    """Row-tiled linear projection: Z = X @ W (bf16 in, f32 accumulate)."""
    o_ref[...] = jnp.dot(x_ref[...], w_ref[...],
                         preferred_element_type=jnp.float32).astype(o_ref.dtype)


def _attend(edge, zd, zs, scale):
    """Masked dot-product attention for one head.

    edge: (TM, Np) bool incoming-edge mask, zd: (TM, D) dst feats,
    zs: (Np, D) src feats.  Returns f32 (TM, D) aggregation.
    """
    logits = jax.lax.dot_general(
        zd, zs, (((1,), (1,)), ((), ())),          # zd @ zs.T without transpose
        preferred_element_type=jnp.float32) * scale
    logits = jnp.where(edge, logits, jnp.float32(-1e30))
    m = jnp.max(logits, axis=-1, keepdims=True)
    p = jnp.where(edge, jnp.exp(logits - m), 0.0)
    denom = jnp.sum(p, axis=-1, keepdims=True)
    # TODO(synk): DGL raises on zero-in-degree nodes; here they just produce 0.
    alpha = p * pl.reciprocal(jnp.maximum(denom, jnp.float32(1e-20)), approx=True)
    return jnp.dot(alpha.astype(zs.dtype), zs, preferred_element_type=jnp.float32)


def _dotgat_layer1_kernel(mask_ref, z_ref, zdst_ref, w2_ref, o_ref, *,
                          num_heads, head_dim, scale):
    """Layer-1 attention + ELU + head-flatten + layer-2 fc, fused per dst tile."""
    edge = mask_ref[...] > 0
    acc = jnp.zeros(o_ref.shape, jnp.float32)
    for h in range(num_heads):                      # static unroll, H is small
        lo = h * head_dim
        zs = z_ref[:, lo:lo + head_dim]             # (Np, Dh)  all source nodes
        zd = zdst_ref[:, lo:lo + head_dim]          # (TM, Dh)  dst rows
        agg = _attend(edge, zd, zs, scale)          # (TM, Dh) f32
        act = jnp.where(agg > 0, agg, jnp.exp(jnp.minimum(agg, 0.0)) - 1.0)  # ELU
        acc += jnp.dot(act.astype(w2_ref.dtype), w2_ref[lo:lo + head_dim, :],
                       preferred_element_type=jnp.float32)
    o_ref[...] = acc.astype(o_ref.dtype)            # Z2 tile (already fc2-projected)


def _dotgat_layer2_kernel(mask_ref, z_ref, zdst_ref, o_ref, *, scale):
    """Layer-2 attention (single head); mean over 1 head is the identity."""
    edge = mask_ref[...] > 0
    agg = _attend(edge, zdst_ref[...], z_ref[...], scale)
    o_ref[...] = agg.astype(o_ref.dtype)


# ---------------------------------------------------------------------------
# Wrapper glue (padding, dtype casts, BlockSpecs)
# ---------------------------------------------------------------------------

def _round_up(x, m):
    return ((x + m - 1) // m) * m


def _pick_tile(np_):
    """Largest dst-row tile whose double-buffered bf16 adjacency stream fits ~24MiB."""
    for tm in (1024, 512, 256, 128):
        if np_ % tm == 0 and 2 * tm * np_ * 2 <= (24 << 20):
            return tm
    return 128


def _cparams(blocks):
    """CompilerParams with an explicit VMEM budget from the actual block sizes."""
    tile = sum(math.prod(s) * jnp.dtype(d).itemsize for s, d in blocks)
    limit = int(min(max(2 * tile + (2 << 20), 16 << 20), 64 << 20))
    return pltpu.CompilerParams(dimension_semantics=("parallel",),
                                vmem_limit_bytes=limit)


@functools.partial(jax.jit, static_argnames=("num_heads",))
def dotgat_forward(adj, x, params, *, num_heads):
    n, in_dim = x.shape
    w1, w2 = params["w1"], params["w2"]
    f1 = w1.shape[1]                    # num_heads * hidden_dim (flattened width)
    head_dim = f1 // num_heads
    out_dim = w2.shape[1]

    np_ = _round_up(max(n, 128), 128)   # lane-dense node axis
    do_p = _round_up(max(out_dim, 128), 128)
    tm = _pick_tile(np_)
    grid = (np_ // tm,)

    # Single adjacency stream: incoming-edge mask (adj.T), zero-padded, bf16.
    mask = jnp.pad(adj.T.astype(jnp.bfloat16), ((0, np_ - n), (0, np_ - n)))
    xp = jnp.pad(x.astype(jnp.bfloat16), ((0, np_ - n), (0, 0)))
    w1b = w1.astype(jnp.bfloat16)
    w2p = jnp.pad(w2.astype(jnp.bfloat16), ((0, 0), (0, do_p - out_dim)))

    # ---- kernel 1: Z1 = X @ W1 (row-tiled) --------------------------------
    z1 = pl.pallas_call(
        _proj_kernel,
        out_shape=jax.ShapeDtypeStruct((np_, f1), jnp.bfloat16),
        grid=grid,
        in_specs=[pl.BlockSpec((tm, in_dim), lambda i: (i, 0)),
                  pl.BlockSpec((in_dim, f1), lambda i: (0, 0))],
        out_specs=pl.BlockSpec((tm, f1), lambda i: (i, 0)),
        compiler_params=_cparams([((tm, in_dim), jnp.bfloat16),
                                  ((in_dim, f1), jnp.bfloat16),
                                  ((tm, f1), jnp.bfloat16)]),
    )(xp, w1b)

    # ---- kernel 2: layer-1 attention + ELU + flatten + fc2 (fused) --------
    scale1 = 1.0 / math.sqrt(head_dim)
    z2 = pl.pallas_call(
        functools.partial(_dotgat_layer1_kernel, num_heads=num_heads,
                          head_dim=head_dim, scale=scale1),
        out_shape=jax.ShapeDtypeStruct((np_, do_p), jnp.bfloat16),
        grid=grid,
        in_specs=[pl.BlockSpec((tm, np_), lambda i: (i, 0)),   # mask rows (dst tile)
                  pl.BlockSpec((np_, f1), lambda i: (0, 0)),   # Z1, all sources
                  pl.BlockSpec((tm, f1), lambda i: (i, 0)),    # Z1, dst rows
                  pl.BlockSpec((f1, do_p), lambda i: (0, 0))], # fc2 weight
        out_specs=pl.BlockSpec((tm, do_p), lambda i: (i, 0)),
        compiler_params=_cparams([((tm, np_), jnp.bfloat16),
                                  ((np_, f1), jnp.bfloat16),
                                  ((tm, f1), jnp.bfloat16),
                                  ((f1, do_p), jnp.bfloat16),
                                  ((tm, do_p), jnp.bfloat16)]),
    )(mask, z1, z1, w2p)
    # NOTE: dropout between the layers is the identity in eval mode.

    # ---- kernel 3: layer-2 attention (1 head) + head-mean -----------------
    scale2 = 1.0 / math.sqrt(out_dim)
    out = pl.pallas_call(
        functools.partial(_dotgat_layer2_kernel, scale=scale2),
        out_shape=jax.ShapeDtypeStruct((np_, do_p), jnp.float32),
        grid=grid,
        in_specs=[pl.BlockSpec((tm, np_), lambda i: (i, 0)),
                  pl.BlockSpec((np_, do_p), lambda i: (0, 0)),
                  pl.BlockSpec((tm, do_p), lambda i: (i, 0))],
        out_specs=pl.BlockSpec((tm, do_p), lambda i: (i, 0)),
        compiler_params=_cparams([((tm, np_), jnp.bfloat16),
                                  ((np_, do_p), jnp.bfloat16),
                                  ((tm, do_p), jnp.bfloat16),
                                  ((tm, do_p), jnp.float32)]),
    )(mask, z2, z2)

    return out[:n, :out_dim]


def init_params(key, in_dim, hidden_dim, out_dim, num_heads):
    k1, k2 = jax.random.split(key)

    def glorot(rng, shape):
        fan_in, fan_out = shape
        s = math.sqrt(6.0 / (fan_in + fan_out))
        return jax.random.uniform(rng, shape, jnp.float32, -s, s)

    return {"w1": glorot(k1, (in_dim, num_heads * hidden_dim)),
            "w2": glorot(k2, (num_heads * hidden_dim, out_dim))}


# ---------------------------------------------------------------------------
# Demo
# ---------------------------------------------------------------------------

if __name__ == "__main__":
    N, IN_DIM, HIDDEN_DIM, OUT_DIM, NUM_HEADS = 16, 8, 32, 16, 4

    root = jax.random.PRNGKey(0)
    k_adj, k_feat, k_params = jax.random.split(root, 3)

    # Deterministic random undirected graph with self-loops (no zero in-degree,
    # matching the usual DGL add_self_loop preprocessing for GAT models).
    upper = (jax.random.uniform(k_adj, (N, N)) < 0.35).astype(jnp.float32)
    adj = jnp.triu(upper, 1)
    adj = adj + adj.T
    adj = jnp.maximum(adj, jnp.eye(N, dtype=jnp.float32))

    h = jax.random.normal(k_feat, (N, IN_DIM), jnp.float32)
    params = init_params(k_params, IN_DIM, HIDDEN_DIM, OUT_DIM, NUM_HEADS)

    out = dotgat_forward(adj, h, params, num_heads=NUM_HEADS)
    jax.block_until_ready(out)

    assert out.shape == (N, OUT_DIM), out.shape
    assert out.dtype == jnp.float32
    assert bool(jnp.all(jnp.isfinite(out)))
    print("KERNEL_OK")
</pallas_src>

<mosaic_0001>
module attributes {stable_mosaic.version = 11 : i64} {
  func.func @_proj_kernel(%arg0: i32, %arg1: memref<128x8xbf16, #tpu.memory_space<vmem>>, %arg2: memref<8x128xbf16, #tpu.memory_space<vmem>>, %arg3: memref<128x128xbf16, #tpu.memory_space<vmem>>) attributes {dimension_semantics = [#tpu.dimension_semantics<parallel>], iteration_bounds = array<i64: 1>, scalar_prefetch = 0 : i64, scratch_operands = 0 : i64, tpu.core_type = #tpu.core_type<tc>, window_params = [{transform_indices = @transform_0, window_bounds = array<i64: 128, 8>}, {pipeline_mode = #tpu.pipeline_mode<synchronous>, transform_indices = @transform_1, window_bounds = array<i64: 8, 128>}, {transform_indices = @transform_2, window_bounds = array<i64: 128, 128>}]} {
    %c0 = arith.constant 0 : index
    %c0_0 = arith.constant 0 : index
    %0 = vector.load %arg1[%c0, %c0_0] : memref<128x8xbf16, #tpu.memory_space<vmem>>, vector<128x8xbf16>
    %c0_1 = arith.constant 0 : index
    %c0_2 = arith.constant 0 : index
    %1 = vector.load %arg2[%c0_1, %c0_2] : memref<8x128xbf16, #tpu.memory_space<vmem>>, vector<8x128xbf16>
    %cst = arith.constant dense<0.000000e+00> : vector<128x128xf32>
    %2 = tpu.matmul %0, %1, %cst {dimension_numbers = #tpu.dot_dimension_numbers<[1], [0], [0], [1], [0, 0, 1, 1], [], []>} : vector<128x8xbf16>, vector<8x128xbf16>, vector<128x128xf32> -> vector<128x128xf32>
    %3 = arith.truncf %2 : vector<128x128xf32> to vector<128x128xbf16>
    %c0_3 = arith.constant 0 : index
    %c0_4 = arith.constant 0 : index
    %4 = vector.load %arg3[%c0_3, %c0_4] : memref<128x128xbf16, #tpu.memory_space<vmem>>, vector<128x128xbf16>
    tpu.vector_store %arg3[%c0_3, %c0_4], %3 {strides = array<i32>} : memref<128x128xbf16, #tpu.memory_space<vmem>>, vector<128x128xbf16>,
    return
  }
  func.func @transform_0(%arg0: i32) -> (i32, i32) {
    %c0_i32 = arith.constant 0 : i32
    %c0_i32_0 = arith.constant 0 : i32
    return %arg0, %c0_i32 : i32, i32
  }
  func.func @transform_1(%arg0: i32) -> (i32, i32) {
    %c0_i32 = arith.constant 0 : i32
    %c0_i32_0 = arith.constant 0 : i32
    %c0_i32_1 = arith.constant 0 : i32
    return %c0_i32, %c0_i32_0 : i32, i32
  }
  func.func @transform_2(%arg0: i32) -> (i32, i32) {
    %c0_i32 = arith.constant 0 : i32
    %c0_i32_0 = arith.constant 0 : i32
    return %arg0, %c0_i32 : i32, i32
  }
}

module attributes {stable_mosaic.version = 11 : i64} {
  func.func @_dotgat_layer1_kernel(%arg0: i32, %arg1: memref<128x128xbf16, #tpu.memory_space<vmem>>, %arg2: memref<128x128xbf16, #tpu.memory_space<vmem>>, %arg3: memref<128x128xbf16, #tpu.memory_space<vmem>>, %arg4: memref<128x128xbf16, #tpu.memory_space<vmem>>, %arg5: memref<128x128xbf16, #tpu.memory_space<vmem>>) attributes {dimension_semantics = [#tpu.dimension_semantics<parallel>], iteration_bounds = array<i64: 1>, scalar_prefetch = 0 : i64, scratch_operands = 0 : i64, tpu.core_type = #tpu.core_type<tc>, window_params = [{transform_indices = @transform_0, window_bounds = array<i64: 128, 128>}, {pipeline_mode = #tpu.pipeline_mode<synchronous>, transform_indices = @transform_1, window_bounds = array<i64: 128, 128>}, {transform_indices = @transform_2, window_bounds = array<i64: 128, 128>}, {pipeline_mode = #tpu.pipeline_mode<synchronous>, transform_indices = @transform_3, window_bounds = array<i64: 128, 128>}, {transform_indices = @transform_4, window_bounds = array<i64: 128, 128>}]} {
    %c0 = arith.constant 0 : index
    %c0_0 = arith.constant 0 : index
    %0 = vector.load %arg1[%c0, %c0_0] : memref<128x128xbf16, #tpu.memory_space<vmem>>, vector<128x128xbf16>
    %cst = arith.constant 0.000000e+00 : bf16
    %1 = vector.broadcast %cst : bf16 to vector<128x128xbf16>
    %2 = arith.cmpf ogt, %0, %1 : vector<128x128xbf16>
    %cst_1 = arith.constant 0.000000e+00 : f32
    %3 = vector.broadcast %cst_1 : f32 to vector<128x128xf32>
    %c0_2 = arith.constant 0 : index
    %c0_3 = arith.constant 0 : index
    %4 = vector.load %arg2[%c0_2, %c0_3] : memref<128x128xbf16, #tpu.memory_space<vmem>>, vector<128x32xbf16>
    %c0_4 = arith.constant 0 : index
    %c0_5 = arith.constant 0 : index
    %5 = vector.load %arg3[%c0_4, %c0_5] : memref<128x128xbf16, #tpu.memory_space<vmem>>, vector<128x32xbf16>
    %cst_6 = arith.constant dense<0.000000e+00> : vector<128x128xf32>
    %6 = tpu.matmul %5, %4, %cst_6 {dimension_numbers = #tpu.dot_dimension_numbers<[1], [1], [0], [0], [0, 0, 1, 0], [], []>} : vector<128x32xbf16>, vector<128x32xbf16>, vector<128x128xf32> -> vector<128x128xf32>
    %cst_7 = arith.constant 0.176776692 : f32
    %7 = vector.broadcast %cst_7 : f32 to vector<128x128xf32>
    %8 = arith.mulf %6, %7 : vector<128x128xf32>
    %cst_8 = arith.constant -1.000000e+30 : f32
    %9 = vector.broadcast %cst_8 : f32 to vector<128x128xf32>
    %10 = arith.select %2, %8, %9 : vector<128x128xi1>, vector<128x128xf32>
    %cst_9 = arith.constant dense<0xFF800000> : vector<128xf32>
    %11 = vector.multi_reduction <maximumf>, %10, %cst_9 [1] : vector<128x128xf32> to vector<128xf32>
    %12 = vector.shape_cast %11 : vector<128xf32> to vector<128x1xf32>
    %13 = vector.broadcast %12 : vector<128x1xf32> to vector<128x128xf32>
    %14 = arith.subf %10, %13 : vector<128x128xf32>
    %15 = math.exp %14 : vector<128x128xf32>
    %cst_10 = arith.constant 0.000000e+00 : f32
    %16 = vector.broadcast %cst_10 : f32 to vector<128x128xf32>
    %17 = arith.select %2, %15, %16 : vector<128x128xi1>, vector<128x128xf32>
    %cst_11 = arith.constant dense<0.000000e+00> : vector<128xf32>
    %18 = vector.multi_reduction <add>, %17, %cst_11 [1] : vector<128x128xf32> to vector<128xf32>
    %19 = vector.shape_cast %18 : vector<128xf32> to vector<128x1xf32>
    %cst_12 = arith.constant 9.99999968E-21 : f32
    %20 = vector.broadcast %cst_12 : f32 to vector<128x1xf32>
    %21 = arith.maximumf %19, %20 : vector<128x1xf32>
    %22 = tpu.reciprocal %21 {approx = true} : vector<128x1xf32> -> vector<128x1xf32>
    %23 = vector.broadcast %22 : vector<128x1xf32> to vector<128x128xf32>
    %24 = arith.mulf %17, %23 : vector<128x128xf32>
    %25 = arith.truncf %24 : vector<128x128xf32> to vector<128x128xbf16>
    %cst_13 = arith.constant dense<0.000000e+00> : vector<128x32xf32>
    %26 = tpu.matmul %25, %4, %cst_13 {dimension_numbers = #tpu.dot_dimension_numbers<[1], [0], [0], [1], [0, 0, 1, 1], [], []>} : vector<128x128xbf16>, vector<128x32xbf16>, vector<128x32xf32> -> vector<128x32xf32>
    %cst_14 = arith.constant 0.000000e+00 : f32
    %27 = vector.broadcast %cst_14 : f32 to vector<128x32xf32>
    %28 = arith.cmpf ogt, %26, %27 : vector<128x32xf32>
    %cst_15 = arith.constant 0.000000e+00 : f32
    %29 = vector.broadcast %cst_15 : f32 to vector<128x32xf32>
    %30 = arith.minimumf %26, %29 : vector<128x32xf32>
    %31 = math.exp %30 : vector<128x32xf32>
    %cst_16 = arith.constant 1.000000e+00 : f32
    %32 = vector.broadcast %cst_16 : f32 to vector<128x32xf32>
    %33 = arith.subf %31, %32 : vector<128x32xf32>
    %34 = arith.select %28, %26, %33 : vector<128x32xi1>, vector<128x32xf32>
    %35 = arith.truncf %34 : vector<128x32xf32> to vector<128x32xbf16>
    %c0_17 = arith.constant 0 : index
    %c0_18 = arith.constant 0 : index
    %36 = vector.load %arg4[%c0_17, %c0_18] : memref<128x128xbf16, #tpu.memory_space<vmem>>, vector<32x128xbf16>
    %cst_19 = arith.constant dense<0.000000e+00> : vector<128x128xf32>
    %37 = tpu.matmul %35, %36, %cst_19 {dimension_numbers = #tpu.dot_dimension_numbers<[1], [0], [0], [1], [0, 0, 1, 1], [], []>} : vector<128x32xbf16>, vector<32x128xbf16>, vector<128x128xf32> -> vector<128x128xf32>
    %38 = arith.addf %3, %37 : vector<128x128xf32>
    %c0_20 = arith.constant 0 : index
    %c32 = arith.constant 32 : index
    %39 = vector.load %arg2[%c0_20, %c32] : memref<128x128xbf16, #tpu.memory_space<vmem>>, vector<128x32xbf16>
    %c0_21 = arith.constant 0 : index
    %c32_22 = arith.constant 32 : index
    %40 = vector.load %arg3[%c0_21, %c32_22] : memref<128x128xbf16, #tpu.memory_space<vmem>>, vector<128x32xbf16>
    %cst_23 = arith.constant dense<0.000000e+00> : vector<128x128xf32>
    %41 = tpu.matmul %40, %39, %cst_23 {dimension_numbers = #tpu.dot_dimension_numbers<[1], [1], [0], [0], [0, 0, 1, 0], [], []>} : vector<128x32xbf16>, vector<128x32xbf16>, vector<128x128xf32> -> vector<128x128xf32>
    %cst_24 = arith.constant 0.176776692 : f32
    %42 = vector.broadcast %cst_24 : f32 to vector<128x128xf32>
    %43 = arith.mulf %41, %42 : vector<128x128xf32>
    %cst_25 = arith.constant -1.000000e+30 : f32
    %44 = vector.broadcast %cst_25 : f32 to vector<128x128xf32>
    %45 = arith.select %2, %43, %44 : vector<128x128xi1>, vector<128x128xf32>
    %cst_26 = arith.constant dense<0xFF800000> : vector<128xf32>
    %46 = vector.multi_reduction <maximumf>, %45, %cst_26 [1] : vector<128x128xf32> to vector<128xf32>
    %47 = vector.shape_cast %46 : vector<128xf32> to vector<128x1xf32>
    %48 = vector.broadcast %47 : vector<128x1xf32> to vector<128x128xf32>
    %49 = arith.subf %45, %48 : vector<128x128xf32>
    %50 = math.exp %49 : vector<128x128xf32>
    %cst_27 = arith.constant 0.000000e+00 : f32
    %51 = vector.broadcast %cst_27 : f32 to vector<128x128xf32>
    %52 = arith.select %2, %50, %51 : vector<128x128xi1>, vector<128x128xf32>
    %cst_28 = arith.constant dense<0.000000e+00> : vector<128xf32>
    %53 = vector.multi_reduction <add>, %52, %cst_28 [1] : vector<128x128xf32> to vector<128xf32>
    %54 = vector.shape_cast %53 : vector<128xf32> to vector<128x1xf32>
    %cst_29 = arith.constant 9.99999968E-21 : f32
    %55 = vector.broadcast %cst_29 : f32 to vector<128x1xf32>
    %56 = arith.maximumf %54, %55 : vector<128x1xf32>
    %57 = tpu.reciprocal %56 {approx = true} : vector<128x1xf32> -> vector<128x1xf32>
    %58 = vector.broadcast %57 : vector<128x1xf32> to vector<128x128xf32>
    %59 = arith.mulf %52, %58 : vector<128x128xf32>
    %60 = arith.truncf %59 : vector<128x128xf32> to vector<128x128xbf16>
    %cst_30 = arith.constant dense<0.000000e+00> : vector<128x32xf32>
    %61 = tpu.matmul %60, %39, %cst_30 {dimension_numbers = #tpu.dot_dimension_numbers<[1], [0], [0], [1], [0, 0, 1, 1], [], []>} : vector<128x128xbf16>, vector<128x32xbf16>, vector<128x32xf32> -> vector<128x32xf32>
    %cst_31 = arith.constant 0.000000e+00 : f32
    %62 = vector.broadcast %cst_31 : f32 to vector<128x32xf32>
    %63 = arith.cmpf ogt, %61, %62 : vector<128x32xf32>
    %cst_32 = arith.constant 0.000000e+00 : f32
    %64 = vector.broadcast %cst_32 : f32 to vector<128x32xf32>
    %65 = arith.minimumf %61, %64 : vector<128x32xf32>
    %66 = math.exp %65 : vector<128x32xf32>
    %cst_33 = arith.constant 1.000000e+00 : f32
    %67 = vector.broadcast %cst_33 : f32 to vector<128x32xf32>
    %68 = arith.subf %66, %67 : vector<128x32xf32>
    %69 = arith.select %63, %61, %68 : vector<128x32xi1>, vector<128x32xf32>
    %70 = arith.truncf %69 : vector<128x32xf32> to vector<128x32xbf16>
    %c32_34 = arith.constant 32 : index
    %c0_35 = arith.constant 0 : index
    %71 = vector.load %arg4[%c32_34, %c0_35] : memref<128x128xbf16, #tpu.memory_space<vmem>>, vector<32x128xbf16>
    %cst_36 = arith.constant dense<0.000000e+00> : vector<128x128xf32>
    %72 = tpu.matmul %70, %71, %cst_36 {dimension_numbers = #tpu.dot_dimension_numbers<[1], [0], [0], [1], [0, 0, 1, 1], [], []>} : vector<128x32xbf16>, vector<32x128xbf16>, vector<128x128xf32> -> vector<128x128xf32>
    %73 = arith.addf %38, %72 : vector<128x128xf32>
    %c0_37 = arith.constant 0 : index
    %c64 = arith.constant 64 : index
    %74 = vector.load %arg2[%c0_37, %c64] : memref<128x128xbf16, #tpu.memory_space<vmem>>, vector<128x32xbf16>
    %c0_38 = arith.constant 0 : index
    %c64_39 = arith.constant 64 : index
    %75 = vector.load %arg3[%c0_38, %c64_39] : memref<128x128xbf16, #tpu.memory_space<vmem>>, vector<128x32xbf16>
    %cst_40 = arith.constant dense<0.000000e+00> : vector<128x128xf32>
    %76 = tpu.matmul %75, %74, %cst_40 {dimension_numbers = #tpu.dot_dimension_numbers<[1], [1], [0], [0], [0, 0, 1, 0], [], []>} : vector<128x32xbf16>, vector<128x32xbf16>, vector<128x128xf32> -> vector<128x128xf32>
    %cst_41 = arith.constant 0.176776692 : f32
    %77 = vector.broadcast %cst_41 : f32 to vector<128x128xf32>
    %78 = arith.mulf %76, %77 : vector<128x128xf32>
    %cst_42 = arith.constant -1.000000e+30 : f32
    %79 = vector.broadcast %cst_42 : f32 to vector<128x128xf32>
    %80 = arith.select %2, %78, %79 : vector<128x128xi1>, vector<128x128xf32>
    %cst_43 = arith.constant dense<0xFF800000> : vector<128xf32>
    %81 = vector.multi_reduction <maximumf>, %80, %cst_43 [1] : vector<128x128xf32> to vector<128xf32>
    %82 = vector.shape_cast %81 : vector<128xf32> to vector<128x1xf32>
    %83 = vector.broadcast %82 : vector<128x1xf32> to vector<128x128xf32>
    %84 = arith.subf %80, %83 : vector<128x128xf32>
    %85 = math.exp %84 : vector<128x128xf32>
    %cst_44 = arith.constant 0.000000e+00 : f32
    %86 = vector.broadcast %cst_44 : f32 to vector<128x128xf32>
    %87 = arith.select %2, %85, %86 : vector<128x128xi1>, vector<128x128xf32>
    %cst_45 = arith.constant dense<0.000000e+00> : vector<128xf32>
    %88 = vector.multi_reduction <add>, %87, %cst_45 [1] : vector<128x128xf32> to vector<128xf32>
    %89 = vector.shape_cast %88 : vector<128xf32> to vector<128x1xf32>
    %cst_46 = arith.constant 9.99999968E-21 : f32
    %90 = vector.broadcast %cst_46 : f32 to vector<128x1xf32>
    %91 = arith.maximumf %89, %90 : vector<128x1xf32>
    %92 = tpu.reciprocal %91 {approx = true} : vector<128x1xf32> -> vector<128x1xf32>
    %93 = vector.broadcast %92 : vector<128x1xf32> to vector<128x128xf32>
    %94 = arith.mulf %87, %93 : vector<128x128xf32>
    %95 = arith.truncf %94 : vector<128x128xf32> to vector<128x128xbf16>
    %cst_47 = arith.constant dense<0.000000e+00> : vector<128x32xf32>
    %96 = tpu.matmul %95, %74, %cst_47 {dimension_numbers = #tpu.dot_dimension_numbers<[1], [0], [0], [1], [0, 0, 1, 1], [], []>} : vector<128x128xbf16>, vector<128x32xbf16>, vector<128x32xf32> -> vector<128x32xf32>
    %cst_48 = arith.constant 0.000000e+00 : f32
    %97 = vector.broadcast %cst_48 : f32 to vector<128x32xf32>
    %98 = arith.cmpf ogt, %96, %97 : vector<128x32xf32>
    %cst_49 = arith.constant 0.000000e+00 : f32
    %99 = vector.broadcast %cst_49 : f32 to vector<128x32xf32>
    %100 = arith.minimumf %96, %99 : vector<128x32xf32>
    %101 = math.exp %100 : vector<128x32xf32>
    %cst_50 = arith.constant 1.000000e+00 : f32
    %102 = vector.broadcast %cst_50 : f32 to vector<128x32xf32>
    %103 = arith.subf %101, %102 : vector<128x32xf32>
    %104 = arith.select %98, %96, %103 : vector<128x32xi1>, vector<128x32xf32>
    %105 = arith.truncf %104 : vector<128x32xf32> to vector<128x32xbf16>
    %c64_51 = arith.constant 64 : index
    %c0_52 = arith.constant 0 : index
    %106 = vector.load %arg4[%c64_51, %c0_52] : memref<128x128xbf16, #tpu.memory_space<vmem>>, vector<32x128xbf16>
    %cst_53 = arith.constant dense<0.000000e+00> : vector<128x128xf32>
    %107 = tpu.matmul %105, %106, %cst_53 {dimension_numbers = #tpu.dot_dimension_numbers<[1], [0], [0], [1], [0, 0, 1, 1], [], []>} : vector<128x32xbf16>, vector<32x128xbf16>, vector<128x128xf32> -> vector<128x128xf32>
    %108 = arith.addf %73, %107 : vector<128x128xf32>
    %c0_54 = arith.constant 0 : index
    %c96 = arith.constant 96 : index
    %109 = vector.load %arg2[%c0_54, %c96] : memref<128x128xbf16, #tpu.memory_space<vmem>>, vector<128x32xbf16>
    %c0_55 = arith.constant 0 : index
    %c96_56 = arith.constant 96 : index
    %110 = vector.load %arg3[%c0_55, %c96_56] : memref<128x128xbf16, #tpu.memory_space<vmem>>, vector<128x32xbf16>
    %cst_57 = arith.constant dense<0.000000e+00> : vector<128x128xf32>
    %111 = tpu.matmul %110, %109, %cst_57 {dimension_numbers = #tpu.dot_dimension_numbers<[1], [1], [0], [0], [0, 0, 1, 0], [], []>} : vector<128x32xbf16>, vector<128x32xbf16>, vector<128x128xf32> -> vector<128x128xf32>
    %cst_58 = arith.constant 0.176776692 : f32
    %112 = vector.broadcast %cst_58 : f32 to vector<128x128xf32>
    %113 = arith.mulf %111, %112 : vector<128x128xf32>
    %cst_59 = arith.constant -1.000000e+30 : f32
    %114 = vector.broadcast %cst_59 : f32 to vector<128x128xf32>
    %115 = arith.select %2, %113, %114 : vector<128x128xi1>, vector<128x128xf32>
    %cst_60 = arith.constant dense<0xFF800000> : vector<128xf32>
    %116 = vector.multi_reduction <maximumf>, %115, %cst_60 [1] : vector<128x128xf32> to vector<128xf32>
    %117 = vector.shape_cast %116 : vector<128xf32> to vector<128x1xf32>
    %118 = vector.broadcast %117 : vector<128x1xf32> to vector<128x128xf32>
    %119 = arith.subf %115, %118 : vector<128x128xf32>
    %120 = math.exp %119 : vector<128x128xf32>
    %cst_61 = arith.constant 0.000000e+00 : f32
    %121 = vector.broadcast %cst_61 : f32 to vector<128x128xf32>
    %122 = arith.select %2, %120, %121 : vector<128x128xi1>, vector<128x128xf32>
    %cst_62 = arith.constant dense<0.000000e+00> : vector<128xf32>
    %123 = vector.multi_reduction <add>, %122, %cst_62 [1] : vector<128x128xf32> to vector<128xf32>
    %124 = vector.shape_cast %123 : vector<128xf32> to vector<128x1xf32>
    %cst_63 = arith.constant 9.99999968E-21 : f32
    %125 = vector.broadcast %cst_63 : f32 to vector<128x1xf32>
    %126 = arith.maximumf %124, %125 : vector<128x1xf32>
    %127 = tpu.reciprocal %126 {approx = true} : vector<128x1xf32> -> vector<128x1xf32>
    %128 = vector.broadcast %127 : vector<128x1xf32> to vector<128x128xf32>
    %129 = arith.mulf %122, %128 : vector<128x128xf32>
    %130 = arith.truncf %129 : vector<128x128xf32> to vector<128x128xbf16>
    %cst_64 = arith.constant dense<0.000000e+00> : vector<128x32xf32>
    %131 = tpu.matmul %130, %109, %cst_64 {dimension_numbers = #tpu.dot_dimension_numbers<[1], [0], [0], [1], [0, 0, 1, 1], [], []>} : vector<128x128xbf16>, vector<128x32xbf16>, vector<128x32xf32> -> vector<128x32xf32>
    %cst_65 = arith.constant 0.000000e+00 : f32
    %132 = vector.broadcast %cst_65 : f32 to vector<128x32xf32>
    %133 = arith.cmpf ogt, %131, %132 : vector<128x32xf32>
    %cst_66 = arith.constant 0.000000e+00 : f32
    %134 = vector.broadcast %cst_66 : f32 to vector<128x32xf32>
    %135 = arith.minimumf %131, %134 : vector<128x32xf32>
    %136 = math.exp %135 : vector<128x32xf32>
    %cst_67 = arith.constant 1.000000e+00 : f32
    %137 = vector.broadcast %cst_67 : f32 to vector<128x32xf32>
    %138 = arith.subf %136, %137 : vector<128x32xf32>
    %139 = arith.select %133, %131, %138 : vector<128x32xi1>, vector<128x32xf32>
    %140 = arith.truncf %139 : vector<128x32xf32> to vector<128x32xbf16>
    %c96_68 = arith.constant 96 : index
    %c0_69 = arith.constant 0 : index
    %141 = vector.load %arg4[%c96_68, %c0_69] : memref<128x128xbf16, #tpu.memory_space<vmem>>, vector<32x128xbf16>
    %cst_70 = arith.constant dense<0.000000e+00> : vector<128x128xf32>
    %142 = tpu.matmul %140, %141, %cst_70 {dimension_numbers = #tpu.dot_dimension_numbers<[1], [0], [0], [1], [0, 0, 1, 1], [], []>} : vector<128x32xbf16>, vector<32x128xbf16>, vector<128x128xf32> -> vector<128x128xf32>
    %143 = arith.addf %108, %142 : vector<128x128xf32>
    %144 = arith.truncf %143 : vector<128x128xf32> to vector<128x128xbf16>
    %c0_71 = arith.constant 0 : index
    %c0_72 = arith.constant 0 : index
    %145 = vector.load %arg5[%c0_71, %c0_72] : memref<128x128xbf16, #tpu.memory_space<vmem>>, vector<128x128xbf16>
    tpu.vector_store %arg5[%c0_71, %c0_72], %144 {strides = array<i32>} : memref<128x128xbf16, #tpu.memory_space<vmem>>, vector<128x128xbf16>,
    return
  }
  func.func @transform_0(%arg0: i32) -> (i32, i32) {
    %c0_i32 = arith.constant 0 : i32
    %c0_i32_0 = arith.constant 0 : i32
    return %arg0, %c0_i32 : i32, i32
  }
  func.func @transform_1(%arg0: i32) -> (i32, i32) {
    %c0_i32 = arith.constant 0 : i32
    %c0_i32_0 = arith.constant 0 : i32
    %c0_i32_1 = arith.constant 0 : i32
    return %c0_i32, %c0_i32_0 : i32, i32
  }
  func.func @transform_2(%arg0: i32) -> (i32, i32) {
    %c0_i32 = arith.constant 0 : i32
    %c0_i32_0 = arith.constant 0 : i32
    return %arg0, %c0_i32 : i32, i32
  }
  func.func @transform_3(%arg0: i32) -> (i32, i32) {
    %c0_i32 = arith.constant 0 : i32
    %c0_i32_0 = arith.constant 0 : i32
    %c0_i32_1 = arith.constant 0 : i32
    return %c0_i32, %c0_i32_0 : i32, i32
  }
  func.func @transform_4(%arg0: i32) -> (i32, i32) {
    %c0_i32 = arith.constant 0 : i32
    %c0_i32_0 = arith.constant 0 : i32
    return %arg0, %c0_i32 : i32, i32
  }
}

module attributes {stable_mosaic.version = 11 : i64} {
  func.func @_dotgat_layer2_kernel(%arg0: i32, %arg1: memref<128x128xbf16, #tpu.memory_space<vmem>>, %arg2: memref<128x128xbf16, #tpu.memory_space<vmem>>, %arg3: memref<128x128xbf16, #tpu.memory_space<vmem>>, %arg4: memref<128x128xf32, #tpu.memory_space<vmem>>) attributes {dimension_semantics = [#tpu.dimension_semantics<parallel>], iteration_bounds = array<i64: 1>, scalar_prefetch = 0 : i64, scratch_operands = 0 : i64, tpu.core_type = #tpu.core_type<tc>, window_params = [{transform_indices = @transform_0, window_bounds = array<i64: 128, 128>}, {pipeline_mode = #tpu.pipeline_mode<synchronous>, transform_indices = @transform_1, window_bounds = array<i64: 128, 128>}, {transform_indices = @transform_2, window_bounds = array<i64: 128, 128>}, {transform_indices = @transform_3, window_bounds = array<i64: 128, 128>}]} {
    %c0 = arith.constant 0 : index
    %c0_0 = arith.constant 0 : index
    %0 = vector.load %arg1[%c0, %c0_0] : memref<128x128xbf16, #tpu.memory_space<vmem>>, vector<128x128xbf16>
    %cst = arith.constant 0.000000e+00 : bf16
    %1 = vector.broadcast %cst : bf16 to vector<128x128xbf16>
    %2 = arith.cmpf ogt, %0, %1 : vector<128x128xbf16>
    %c0_1 = arith.constant 0 : index
    %c0_2 = arith.constant 0 : index
    %3 = vector.load %arg3[%c0_1, %c0_2] : memref<128x128xbf16, #tpu.memory_space<vmem>>, vector<128x128xbf16>
    %c0_3 = arith.constant 0 : index
    %c0_4 = arith.constant 0 : index
    %4 = vector.load %arg2[%c0_3, %c0_4] : memref<128x128xbf16, #tpu.memory_space<vmem>>, vector<128x128xbf16>
    %cst_5 = arith.constant dense<0.000000e+00> : vector<128x128xf32>
    %5 = tpu.matmul %3, %4, %cst_5 {dimension_numbers = #tpu.dot_dimension_numbers<[1], [1], [0], [0], [0, 0, 1, 0], [], []>} : vector<128x128xbf16>, vector<128x128xbf16>, vector<128x128xf32> -> vector<128x128xf32>
    %cst_6 = arith.constant 2.500000e-01 : f32
    %6 = vector.broadcast %cst_6 : f32 to vector<128x128xf32>
    %7 = arith.mulf %5, %6 : vector<128x128xf32>
    %cst_7 = arith.constant -1.000000e+30 : f32
    %8 = vector.broadcast %cst_7 : f32 to vector<128x128xf32>
    %9 = arith.select %2, %7, %8 : vector<128x128xi1>, vector<128x128xf32>
    %cst_8 = arith.constant dense<0xFF800000> : vector<128xf32>
    %10 = vector.multi_reduction <maximumf>, %9, %cst_8 [1] : vector<128x128xf32> to vector<128xf32>
    %11 = vector.shape_cast %10 : vector<128xf32> to vector<128x1xf32>
    %12 = vector.broadcast %11 : vector<128x1xf32> to vector<128x128xf32>
    %13 = arith.subf %9, %12 : vector<128x128xf32>
    %14 = math.exp %13 : vector<128x128xf32>
    %cst_9 = arith.constant 0.000000e+00 : f32
    %15 = vector.broadcast %cst_9 : f32 to vector<128x128xf32>
    %16 = arith.select %2, %14, %15 : vector<128x128xi1>, vector<128x128xf32>
    %cst_10 = arith.constant dense<0.000000e+00> : vector<128xf32>
    %17 = vector.multi_reduction <add>, %16, %cst_10 [1] : vector<128x128xf32> to vector<128xf32>
    %18 = vector.shape_cast %17 : vector<128xf32> to vector<128x1xf32>
    %cst_11 = arith.constant 9.99999968E-21 : f32
    %19 = vector.broadcast %cst_11 : f32 to vector<128x1xf32>
    %20 = arith.maximumf %18, %19 : vector<128x1xf32>
    %21 = tpu.reciprocal %20 {approx = true} : vector<128x1xf32> -> vector<128x1xf32>
    %22 = vector.broadcast %21 : vector<128x1xf32> to vector<128x128xf32>
    %23 = arith.mulf %16, %22 : vector<128x128xf32>
    %24 = arith.truncf %23 : vector<128x128xf32> to vector<128x128xbf16>
    %cst_12 = arith.constant dense<0.000000e+00> : vector<128x128xf32>
    %25 = tpu.matmul %24, %4, %cst_12 {dimension_numbers = #tpu.dot_dimension_numbers<[1], [0], [0], [1], [0, 0, 1, 1], [], []>} : vector<128x128xbf16>, vector<128x128xbf16>, vector<128x128xf32> -> vector<128x128xf32>
    %c0_13 = arith.constant 0 : index
    %c0_14 = arith.constant 0 : index
    %26 = vector.load %arg4[%c0_13, %c0_14] : memref<128x128xf32, #tpu.memory_space<vmem>>, vector<128x128xf32>
    tpu.vector_store %arg4[%c0_13, %c0_14], %25 {strides = array<i32>} : memref<128x128xf32, #tpu.memory_space<vmem>>, vector<128x128xf32>,
    return
  }
  func.func @transform_0(%arg0: i32) -> (i32, i32) {
    %c0_i32 = arith.constant 0 : i32
    %c0_i32_0 = arith.constant 0 : i32
    return %arg0, %c0_i32 : i32, i32
  }
  func.func @transform_1(%arg0: i32) -> (i32, i32) {
    %c0_i32 = arith.constant 0 : i32
    %c0_i32_0 = arith.constant 0 : i32
    %c0_i32_1 = arith.constant 0 : i32
    return %c0_i32, %c0_i32_0 : i32, i32
  }
  func.func @transform_2(%arg0: i32) -> (i32, i32) {
    %c0_i32 = arith.constant 0 : i32
    %c0_i32_0 = arith.constant 0 : i32
    return %arg0, %c0_i32 : i32, i32
  }
  func.func @transform_3(%arg0: i32) -> (i32, i32) {
    %c0_i32 = arith.constant 0 : i32
    %c0_i32_0 = arith.constant 0 : i32
    return %arg0, %c0_i32 : i32, i32
  }
}

</mosaic_0001>

<bundles_post_ra>
// kernel: dotgat_forward.3
= control target key start
LH: loop header
LB: loop body
LE: loop exit
PB: predicated region body
PF: predicated region fallthrough
CT: control target
= control target key end

     0   :  { %vm94_vm0 = vcmask 1043456   ;;  %vm69_vm1 = vcmask 64512   ;;  %s355_s1 = inlined_call_operand.vmem [shape: bf16[8,128], index: 1, kind: input, shape index: {}]   ;;  %s356_s0 = inlined_call_operand.vmem [shape: bf16[128,8], index: 0, kind: input, shape index: {}]   ;;  %s357_s2 = inlined_call_operand.vmem [shape: bf16[128,128], index: 2, kind: output, shape index: {}]  }
   0x1   :  { %v28_v0 = vld [vmem:[%s355_s1] sm:$0xf]  ;;  %v225_v3 = vld [vmem:[%s356_s0 + $0x10] sm:$0xff]  ;;  %v224_v6 = vld [vmem:[%s356_s0 + $0x8] sm:$0xff] }
   0x2   :  { %v96_v1 = vsel %vm94_vm0, %v28_v0, 0  ;;  %v223_v2 = vld [vmem:[%s356_s0] sm:$0xff]  ;;  %v229_v5 = vld [vmem:[%s356_s0 + $0x30] sm:$0xff]  ;;  %v226_v7 = vld [vmem:[%s356_s0 + $0x18] sm:$0xff] }
   0x3   :  { %105 = vmatpush.bf16.msra.mxu0 %v96_v1  ;;  %278 = vmatpush.bf16.msra.mxu1 %v96_v1  ;;  %v227_v4 = vld [vmem:[%s356_s0 + $0x20] sm:$0xff]  ;;  %v228_v8 = vld [vmem:[%s356_s0 + $0x28] sm:$0xff]  ;;  %v230_v9 = vld [vmem:[%s356_s0 + $0x38] sm:$0xff] }
   0x4   :  { %279 = vmatpush.bf16.msra.mxu2 %v96_v1  ;;  %280 = vmatpush.bf16.msra.mxu3 %v96_v1 }
   0x6   :  { %215 = vmatmul.msk.bf16.vlgmr.msra.gmra.mxu0 %vm69_vm1, %v223_v2  ;;  %217 = vmatmul.msk.bf16.vlgmr.msra.gmra.mxu1 %vm69_vm1, %v225_v3 }
   0x7   :  { %219 = vmatmul.msk.bf16.vlgmr.msra.gmra.mxu2 %vm69_vm1, %v227_v4  ;;  %221 = vmatmul.msk.bf16.vlgmr.msra.gmra.mxu3 %vm69_vm1, %v229_v5 }
  0x16   :  { %216 = vmatmul.msk.bf16.gmra.mxu0 %vm69_vm1, %v224_v6  ;;  %218 = vmatmul.msk.bf16.gmra.mxu1 %vm69_vm1, %v226_v7 }
  0x17   :  { %220 = vmatmul.msk.bf16.gmra.mxu2 %vm69_vm1, %v228_v8  ;;  %222 = vmatmul.msk.bf16.gmra.mxu3 %vm69_vm1, %v230_v9 }
  0x83   :  { %v107_v10 = vpop.f32.mrf.mxu0  ;;  %v117_v11 = vpop.f32.mrf.mxu1 }
  0x8a   :  { %v127_v12 = vpop.f32.mrf.mxu2  ;;  %v137_v13 = vpop.f32.mrf.mxu3 }
  0x8b   :  { %v109_v14 = vpop.f32.mrf.mxu0  ;;  %v119_v15 = vpop.f32.mrf.mxu1 }
  0x8c   :  { %v234_v16 = vpack.c.bf16 %v109_v14, %v107_v10  ;;  %v244_v17 = vpack.c.bf16 %v119_v15, %v117_v11 }
  0x8e   :  { %235 = vst [vmem:[%s357_s2] sm:$0xff] %v234_v16  }
  0x8f   :  { %272 = vst [vmem:[%s357_s2 + $0x10] sm:$0xff] %v244_v17  }
  0x92   :  { %v129_v18 = vpop.f32.mrf.mxu2  ;;  %v139_v19 = vpop.f32.mrf.mxu3 }
  0x93   :  { %v254_v20 = vpack.c.bf16 %v129_v18, %v127_v12  ;;  %v264_v21 = vpack.c.bf16 %v139_v19, %v137_v13  ;;  %v112_v22 = vpop.f32.mrf.mxu0  ;;  %v122_v23 = vpop.f32.mrf.mxu1 }
  0x95   :  { %274 = vst [vmem:[%s357_s2 + $0x20] sm:$0xff] %v254_v20  }
  0x96   :  { %276 = vst [vmem:[%s357_s2 + $0x30] sm:$0xff] %v264_v21  }
  0x9a   :  { %v132_v24 = vpop.f32.mrf.mxu2  ;;  %v142_v25 = vpop.f32.mrf.mxu3 }
  0x9b   :  { %v114_v26 = vpop.f32.mrf.mxu0  ;;  %v124_v27 = vpop.f32.mrf.mxu1 }
  0x9c   :  { %v239_v28 = vpack.c.bf16 %v114_v26, %v112_v22  ;;  %v249_v29 = vpack.c.bf16 %v124_v27, %v122_v23 }
  0x9e   :  { %271 = vst [vmem:[%s357_s2 + $0x8] sm:$0xff] %v239_v28  }
  0x9f   :  { %273 = vst [vmem:[%s357_s2 + $0x18] sm:$0xff] %v249_v29  }
  0xa2   :  { %v134_v30 = vpop.f32.mrf.mxu2  ;;  %v144_v31 = vpop.f32.mrf.mxu3 }
  0xa3   :  { %v259_v32 = vpack.c.bf16 %v134_v30, %v132_v24  ;;  %v269_v33 = vpack.c.bf16 %v144_v31, %v142_v25 }
  0xa5   :  { %275 = vst [vmem:[%s357_s2 + $0x28] sm:$0xff] %v259_v32  }
  0xa6   :  { %277 = vst [vmem:[%s357_s2 + $0x38] sm:$0xff] %v269_v33  }

// kernel: dotgat_forward.5
= control target key start
LH: loop header
LB: loop body
LE: loop exit
PB: predicated region body
PF: predicated region fallthrough
CT: control target
= control target key end

     0   :  { %s1122_s1 = inlined_call_operand.vmem [shape: bf16[128,128], index: 1, kind: input, shape index: {}, may-alias: {1,2}]   ;;  %s1123_s2 = inlined_call_operand.vmem [shape: bf16[128,128], index: 2, kind: input, shape index: {}, may-alias: {1,2}]   ;;  %s1124_s0 = inlined_call_operand.vmem [shape: bf16[128,128], index: 0, kind: input, shape index: {}]   ;;  %s1125_s3 = inlined_call_operand.vmem [shape: f32[128,128], index: 3, kind: output, shape index: {}]  }
   0x1   :  { %v603_v0 = vld [vmem:[%s1122_s1 + $0x38] sm:$0xff]  ;;  %v602_v1 = vld [vmem:[%s1122_s1 + $0x30] sm:$0xff]  ;;  %v601_v2 = vld [vmem:[%s1122_s1 + $0x28] sm:$0xff] }
   0x2   :  { %190 = vmatpush.bf16.xpose.msra.mxu0 %v603_v0  ;;  %643 = vmatpush.bf16.xpose.msra.mxu2 %v603_v0  ;;  %v600_v3 = vld [vmem:[%s1122_s1 + $0x20] sm:$0xff]  ;;  %v599_v4 = vld [vmem:[%s1122_s1 + $0x18] sm:$0xff]  ;;  %v598_v5 = vld [vmem:[%s1122_s1 + $0x10] sm:$0xff] }
   0x3   :  { %455 = vmatpush.bf16.msra.mxu1 %v603_v0  ;;  %651 = vmatpush.bf16.msra.mxu3 %v603_v0  ;;  %v597_v6 = vld [vmem:[%s1122_s1 + $0x8] sm:$0xff]  ;;  %v596_v7 = vld [vmem:[%s1122_s1] sm:$0xff]  ;;  %v591_v9 = vld [vmem:[%s1123_s2 + $0x18] sm:$0xff] }
   0x4   :  { %v588_v8 = vld [vmem:[%s1123_s2] sm:$0xff]  ;;  %v589_v10 = vld [vmem:[%s1123_s2 + $0x8] sm:$0xff]  ;;  %v590_v12 = vld [vmem:[%s1123_s2 + $0x10] sm:$0xff] }
   0x5   :  { %v592_v11 = vld [vmem:[%s1123_s2 + $0x20] sm:$0xff]  ;;  %v593_v13 = vld [vmem:[%s1123_s2 + $0x28] sm:$0xff]  ;;  %v594_v14 = vld [vmem:[%s1123_s2 + $0x30] sm:$0xff] }
   0x6   :  { %v595_v15 = vld [vmem:[%s1123_s2 + $0x38] sm:$0xff]  ;;  %v605_v16 = vld [vmem:[%s1124_s0] sm:$0xff]   ;;  %v636_v27 = vld [vmem:[%s1124_s0 + $0x8] sm:$0xff]  }
   0x7   :  { %456 = vmatpush.bf16.msra.mxu1 %v602_v1  ;;  %652 = vmatpush.bf16.msra.mxu3 %v602_v1  ;;  %v606_v17 = vunpack.c.l.bf16 %v605_v16  ;;  %v607_v22 = vunpack.c.h.bf16 %v605_v16  ;;  %v610_v29 = vunpack.c.l.bf16 %v636_v27  ;;  %v611_v35 = vunpack.c.h.bf16 %v636_v27  ;;  %v637_v40 = vld [vmem:[%s1124_s0 + $0x10] sm:$0xff]   ;;  %v640_v44 = vld [vmem:[%s1124_s0 + $0x28] sm:$0xff]   ;;  %v638_v54 = vld [vmem:[%s1124_s0 + $0x18] sm:$0xff]  }
   0x8   :  { %v614_v42 = vunpack.c.l.bf16 %v637_v40  ;;  %v626_v48 = vunpack.c.l.bf16 %v640_v44  ;;  %v615_v50 = vunpack.c.h.bf16 %v637_v40  ;;  %v627_v59 = vunpack.c.h.bf16 %v640_v44 }
   0x9   :  { %vm794_vm0 = vcmp.gt.f32.partialorder %v606_v17, 0.0  ;;  %vm803_vm1 = vcmp.gt.f32.partialorder %v607_v22, 0.0  ;;  %vm815_vm2 = vcmp.gt.f32.partialorder %v610_v29, 0.0  ;;  %vm826_vm3 = vcmp.gt.f32.partialorder %v611_v35, 0.0 }
   0xa   :  { %191 = vmatpush.bf16.xpose.msra.mxu0 %v602_v1  ;;  %644 = vmatpush.bf16.xpose.msra.mxu2 %v602_v1  ;;  %vm841_vm4 = vcmp.gt.f32.partialorder %v614_v42, 0.0  ;;  %vm850_vm5 = vcmp.gt.f32.partialorder %v626_v48, 0.0  ;;  %vm857_vm6 = vcmp.gt.f32.partialorder %v615_v50, 0.0  ;;  %v618_v60 = vunpack.c.l.bf16 %v638_v54 }
   0xb   :  { %457 = vmatpush.bf16.msra.mxu1 %v601_v2  ;;  %653 = vmatpush.bf16.msra.mxu3 %v601_v2  ;;  %vm871_vm7 = vcmp.gt.f32.partialorder %v627_v59, 0.0 }
   0xc   :  { %vm875_vm8 = vcmp.gt.f32.partialorder %v618_v60, 0.0 }
   0xf   :  { %458 = vmatpush.bf16.msra.mxu1 %v600_v3  ;;  %654 = vmatpush.bf16.msra.mxu3 %v600_v3 }
  0x12   :  { %192 = vmatpush.bf16.xpose.msra.mxu0 %v601_v2  ;;  %645 = vmatpush.bf16.xpose.msra.mxu2 %v601_v2 }
  0x13   :  { %459 = vmatpush.bf16.msra.mxu1 %v599_v4  ;;  %655 = vmatpush.bf16.msra.mxu3 %v599_v4 }
  0x17   :  { %460 = vmatpush.bf16.msra.mxu1 %v598_v5  ;;  %656 = vmatpush.bf16.msra.mxu3 %v598_v5 }
  0x1a   :  { %193 = vmatpush.bf16.xpose.msra.mxu0 %v600_v3  ;;  %646 = vmatpush.bf16.xpose.msra.mxu2 %v600_v3  ;;  %v641_v3 = vld [vmem:[%s1124_s0 + $0x30] sm:$0xff]  }
  0x1b   :  { %461 = vmatpush.bf16.msra.mxu1 %v597_v6  ;;  %657 = vmatpush.bf16.msra.mxu3 %v597_v6 }
  0x1f   :  { %462 = vmatpush.bf16.msra.mxu1 %v596_v7  ;;  %658 = vmatpush.bf16.msra.mxu3 %v596_v7 }
  0x22   :  { %194 = vmatpush.bf16.xpose.msra.mxu0 %v599_v4  ;;  %647 = vmatpush.bf16.xpose.msra.mxu2 %v599_v4 }
  0x2a   :  { %195 = vmatpush.bf16.xpose.msra.mxu0 %v598_v5  ;;  %648 = vmatpush.bf16.xpose.msra.mxu2 %v598_v5 }
  0x32   :  { %196 = vmatpush.bf16.xpose.msra.mxu0 %v597_v6  ;;  %649 = vmatpush.bf16.xpose.msra.mxu2 %v597_v6  ;;  %v630_v6 = vunpack.c.l.bf16 %v641_v3 }
  0x34   :  { %vm892_vm9 = vcmp.gt.f32.partialorder %v630_v6, 0.0 }
  0x3a   :  { %197 = vmatpush.bf16.xpose.msra.mxu0 %v596_v7  ;;  %650 = vmatpush.bf16.xpose.msra.mxu2 %v596_v7 }
  0x41   :  { %198 = vmatmul.bf16.vlgmr.msra.gmra.mxu0 %v588_v8  ;;  %213 = vmatmul.bf16.vlgmr.msra.gmra.mxu2 %v591_v9 }
  0x51   :  { %203 = vmatmul.bf16.gmra.mxu0 %v589_v10  ;;  %218 = vmatmul.bf16.gmra.mxu2 %v592_v11  ;;  %v619_v10 = vunpack.c.h.bf16 %v638_v54 }
  0x53   :  { %vm901_vm10 = vcmp.gt.f32.partialorder %v619_v10, 0.0 }
  0x61   :  { %208 = vmatmul.bf16.gmra.mxu0 %v590_v12  ;;  %223 = vmatmul.bf16.gmra.mxu2 %v593_v13  ;;  %v631_v12 = vunpack.c.h.bf16 %v641_v3 }
  0x63   :  { %vm905_vm11 = vcmp.gt.f32.partialorder %v631_v12, 0.0 }
  0x71   :  { %228 = vmatmul.bf16.gmra.mxu2 %v594_v14 }
  0x81   :  { %233 = vmatmul.bf16.gmra.mxu2 %v595_v15 }
  0xbe   :  { %v199_v18 = vpop.f32.mrf.mxu0 }
  0xbf   :  { %v239_v20 = vmul.f32 0.25, %v199_v18 }
  0xc1   :  { %v800_v21 = vsel %vm794_vm0, %v239_v20, -1e+30  ;;  %v642_v20 = vld [vmem:[%s1124_s0 + $0x38] sm:$0xff]  }
  0xc2   :  { %271 = vmax.xlane.f32.xlu0 %v800_v21 }
  0xc4   :  { %v214_v23 = vpop.f32.mrf.mxu2 }
  0xc5   :  { %v245_v62 = vmul.f32 0.25, %v214_v23  ;;  %v634_v23 = vunpack.c.l.bf16 %v642_v20 }
  0xc6   :  { %v201_v24 = vpop.f32.mrf.mxu0 }
  0xc7   :  { %v240_v26 = vmul.f32 0.25, %v201_v24  ;;  %v888_v5 = vsel %vm875_vm8, %v245_v62, -1e+30  ;;  %v639_v24 = vld [vmem:[%s1124_s0 + $0x20] sm:$0xff]   ;;  %vm925_vm12 = vcmp.gt.f32.partialorder %v634_v23, 0.0 }
  0xc9   :  { %v812_v28 = vsel %vm803_vm1, %v240_v26, -1e+30 }
  0xca   :  { %273 = vmax.xlane.f32.xlu0 %v812_v28 }
  0xcc   :  { %v216_v30 = vpop.f32.mrf.mxu2 }
  0xcd   :  { %v246_v13 = vmul.f32 0.25, %v216_v30  ;;  %v623_v30 = vunpack.c.h.bf16 %v639_v24 }
  0xce   :  { %v204_v31 = vpop.f32.mrf.mxu0 }
  0xcf   :  { %v241_v33 = vmul.f32 0.25, %v204_v31  ;;  %v911_v18 = vsel %vm901_vm10, %v246_v13, -1e+30  ;;  %vm934_vm13 = vcmp.gt.f32.partialorder %v623_v30, 0.0 }
  0xd1   :  { %v821_v34 = vsel %vm815_vm2, %v241_v33, -1e+30 }
  0xd2   :  { %275 = vmax.xlane.f32.xlu1 %v821_v34 }
  0xd4   :  { %v824_v36 = vpop.f32.mrf.mxu2 }
  0xd5   :  { %v247_v60 = vmul.f32 0.25, %v824_v36 }
  0xd6   :  { %v206_v37 = vpop.f32.mrf.mxu0 }
  0xd7   :  { %v242_v39 = vmul.f32 0.25, %v206_v37 }
  0xd9   :  { %v835_v41 = vsel %vm826_vm3, %v242_v39, -1e+30 }
  0xda   :  { %277 = vmax.xlane.f32.xlu1 %v835_v41 }
  0xdc   :  { %v221_v43 = vpop.f32.mrf.mxu2 }
  0xdd   :  { %v248_v33 = vmul.f32 0.25, %v221_v43 }
  0xde   :  { %v209_v45 = vpop.f32.mrf.mxu0 }
  0xdf   :  { %v243_v47 = vmul.f32 0.25, %v209_v45  ;;  %v940_v37 = vsel %vm934_vm13, %v248_v33, -1e+30 }
  0xe1   :  { %v847_v49 = vsel %vm841_vm4, %v243_v47, -1e+30 }
  0xe2   :  { %279 = vmax.xlane.f32.xlu0 %v847_v49 }
  0xe4   :  { %v224_v51 = vpop.f32.mrf.mxu2 }
  0xe5   :  { %v249_v53 = vmul.f32 0.25, %v224_v51  ;;  %v635_v51 = vunpack.c.h.bf16 %v642_v20 }
  0xe6   :  { %v211_v55 = vpop.f32.mrf.mxu0 }
  0xe7   :  { %v244_v57 = vmul.f32 0.25, %v211_v55  ;;  %v863_v58 = vsel %vm850_vm5, %v249_v53, -1e+30  ;;  %vm951_vm14 = vcmp.gt.f32.partialorder %v635_v51, 0.0 }
  0xe8   :  { %291 = vmax.xlane.f32.xlu2 %v863_v58 }
  0xe9   :  { %v868_v61 = vsel %vm857_vm6, %v244_v57, -1e+30 }
  0xea   :  { %281 = vmax.xlane.f32.xlu1 %v868_v61 }
  0xec   :  { %v226_v63 = vpop.f32.mrf.mxu2 }
  0xed   :  { %v250_v2 = vmul.f32 0.25, %v226_v63 }
  0xef   :  { %v884_v4 = vsel %vm871_vm7, %v250_v2, -1e+30 }
  0xf0   :  { %293 = vmax.xlane.f32.xlu2 %v884_v4 }
  0xf2   :  { %283 = vmax.xlane.f32.xlu1 %v888_v5 }
  0xf4   :  { %v229_v7 = vpop.f32.mrf.mxu2 }
  0xf5   :  { %v251_v9 = vmul.f32 0.25, %v229_v7 }
  0xf7   :  { %v898_v11 = vsel %vm892_vm9, %v251_v9, -1e+30 }
  0xf8   :  { %295 = vmax.xlane.f32.xlu2 %v898_v11 }
  0xfc   :  { %v231_v15 = vpop.f32.mrf.mxu2 }
  0xfd   :  { %v252_v17 = vmul.f32 0.25, %v231_v15 }
  0xff   :  { %v918_v22 = vsel %vm905_vm11, %v252_v17, -1e+30 }
 0x100   :  { %285 = vmax.xlane.f32.xlu2 %v911_v18  ;;  %297 = vmax.xlane.f32.xlu0 %v918_v22 }
 0x104   :  { %v234_v26 = vpop.f32.mrf.mxu2 }
 0x105   :  { %v253_v29 = vmul.f32 0.25, %v234_v26 }
 0x107   :  { %v931_v31 = vsel %vm925_vm12, %v253_v29, -1e+30 }
 0x108   :  { %299 = vmax.xlane.f32.xlu2 %v931_v31 }
 0x10c   :  { %v236_v50 = vpop.f32.mrf.mxu2 }
 0x10d   :  { %v254_v53 = vmul.f32 0.25, %v236_v50 }
 0x10f   :  { %v957_v19 = vsel %vm951_vm14, %v254_v53, -1e+30 }
 0x110   :  { %289 = vmax.xlane.f32.xlu2 %v940_v37 }
 0x135   :  { %v272_v39 = vpop.xlane.xlu0 %271 }
 0x136   :  { %v303_v40 = vsub.f32 %v800_v21, %v272_v39 }
 0x138   :  { %v319_v42 = vmul.f32 1.442695, %v303_v40 }
 0x13a   :  { %659 = vpow2.f32 %v319_v42 }
 0x13d   :  { %v274_v44 = vpop.xlane.xlu0 %273 }
 0x13e   :  { %v304_v45 = vsub.f32 %v812_v28, %v274_v44 }
 0x140   :  { %v660_v47 = vpop.eup %659  ;;  %v321_v43 = vmul.f32 1.442695, %v304_v45 }
 0x141   :  { %v947_v48 = vsel %vm794_vm0, %v660_v47, 0.0 }
 0x142   :  { %661 = vpow2.f32 %v321_v43  ;;  %367 = vadd.xlane.f32.xlu0 %v947_v48 }
 0x145   :  { %v276_v54 = vpop.xlane.xlu1 %275 }
 0x146   :  { %v305_v21 = vsub.f32 %v821_v34, %v276_v54  ;;  %v622_v34 = vunpack.c.l.bf16 %v639_v24 }
 0x148   :  { %v662_v28 = vpop.eup %661  ;;  %v323_v57 = vmul.f32 1.442695, %v305_v21  ;;  %vm967_vm15 = vcmp.gt.f32.partialorder %v622_v34, 0.0 }
 0x149   :  { %v961_v59 = vsel %vm803_vm1, %v662_v28, 0.0  ;;  %v977_v7 = vsel %vm967_vm15, %v247_v60, -1e+30 }
 0x14a   :  { %663 = vpow2.f32 %v323_v57  ;;  %301 = vmax.xlane.f32.xlu0 %v957_v19  ;;  %369 = vadd.xlane.f32.xlu1 %v961_v59 }
 0x14d   :  { %v278_v62 = vpop.xlane.xlu1 %277 }
 0x14e   :  { %v306_v63 = vsub.f32 %v835_v41, %v278_v62 }
 0x150   :  { %v664_v3 = vpop.eup %663  ;;  %v325_v6 = vmul.f32 1.442695, %v306_v63 }
 0x151   :  { %v973_v25 = vsel %vm815_vm2, %v664_v3, 0.0 }
 0x152   :  { %665 = vpow2.f32 %v325_v6  ;;  %371 = vadd.xlane.f32.xlu0 %v973_v25  ;;  %287 = vmax.xlane.f32.xlu1 %v977_v7 }
 0x155   :  { %v280_v36 = vpop.xlane.xlu0 %279 }
 0x156   :  { %v307_v41 = vsub.f32 %v847_v49, %v280_v36 }
 0x158   :  { %v666_v9 = vpop.eup %665  ;;  %v327_v10 = vmul.f32 1.442695, %v307_v41 }
 0x159   :  { %v984_v12 = vsel %vm826_vm3, %v666_v9, 0.0 }
 0x15a   :  { %667 = vpow2.f32 %v327_v10  ;;  %373 = vadd.xlane.f32.xlu1 %v984_v12 }
 0x15b   :  { %v292_v32 = vpop.xlane.xlu2 %291 }
 0x15c   :  { %v313_v13 = vsub.f32 %v863_v58, %v292_v32 }
 0x15d   :  { %v282_v15 = vpop.xlane.xlu1 %281 }
 0x15e   :  { %v339_v17 = vmul.f32 1.442695, %v313_v13  ;;  %v308_v20 = vsub.f32 %v868_v61, %v282_v15 }
 0x160   :  { %v668_v23 = vpop.eup %667  ;;  %669 = vpow2.f32 %v339_v17  ;;  %v329_v24 = vmul.f32 1.442695, %v308_v20 }
 0x161   :  { %v991_v49 = vsel %vm841_vm4, %v668_v23, 0.0 }
 0x162   :  { %375 = vadd.xlane.f32.xlu1 %v991_v49  ;;  %671 = vpow2.f32 %v329_v24 }
 0x163   :  { %v294_v38 = vpop.xlane.xlu2 %293 }
 0x164   :  { %v314_v26 = vsub.f32 %v884_v4, %v294_v38 }
 0x165   :  { %v284_v29 = vpop.xlane.xlu1 %283 }
 0x166   :  { %v670_v30 = vpop.eup %669  ;;  %v341_v58 = vmul.f32 1.442695, %v314_v26  ;;  %v309_v33 = vsub.f32 %v888_v5, %v284_v29 }
 0x167   :  { %v998_v61 = vsel %vm850_vm5, %v670_v30, 0.0 }
 0x168   :  { %673 = vpow2.f32 %v341_v58  ;;  %387 = vadd.xlane.f32.xlu2 %v998_v61  ;;  %v331_v46 = vmul.f32 1.442695, %v309_v33  ;;  %v672_v40 = vpop.eup %671 }
 0x169   :  { %v1004_v45 = vsel %vm857_vm6, %v672_v40, 0.0 }
 0x16a   :  { %675 = vpow2.f32 %v331_v46 }
 0x16b   :  { %v296_v39 = vpop.xlane.xlu2 %295 }
 0x16c   :  { %v315_v42 = vsub.f32 %v898_v11, %v296_v39 }
 0x16e   :  { %v674_v44 = vpop.eup %673  ;;  %v343_v4 = vmul.f32 1.442695, %v315_v42 }
 0x16f   :  { %v1008_v52 = vsel %vm871_vm7, %v674_v44, 0.0 }
 0x170   :  { %677 = vpow2.f32 %v343_v4  ;;  %377 = vadd.xlane.f32.xlu2 %v1004_v45  ;;  %389 = vadd.xlane.f32.xlu0 %v1008_v52  ;;  %v676_v43 = vpop.eup %675 }
 0x171   :  { %v1016_v0 = vsel %vm875_vm8, %v676_v43, 0.0 }
 0x173   :  { %v286_v5 = vpop.xlane.xlu2 %285  ;;  %v298_v47 = vpop.xlane.xlu0 %297 }
 0x174   :  { %v310_v11 = vsub.f32 %v911_v18, %v286_v5  ;;  %v316_v50 = vsub.f32 %v918_v22, %v298_v47 }
 0x176   :  { %v678_v51 = vpop.eup %677  ;;  %v333_v56 = vmul.f32 1.442695, %v310_v11  ;;  %v345_v53 = vmul.f32 1.442695, %v316_v50 }
 0x177   :  { %v1020_v54 = vsel %vm892_vm9, %v678_v51, 0.0 }
 0x178   :  { %679 = vpow2.f32 %v333_v56  ;;  %379 = vadd.xlane.f32.xlu2 %v1016_v0  ;;  %391 = vadd.xlane.f32.xlu0 %v1020_v54 }
 0x179   :  { %681 = vpow2.f32 %v345_v53 }
 0x17b   :  { %v300_v18 = vpop.xlane.xlu2 %299 }
 0x17c   :  { %v317_v22 = vsub.f32 %v931_v31, %v300_v18 }
 0x17e   :  { %v680_v21 = vpop.eup %679  ;;  %v347_v28 = vmul.f32 1.442695, %v317_v22 }
 0x17f   :  { %v682_v57 = vpop.eup %681  ;;  %v1027_v1 = vsel %vm901_vm10, %v680_v21, 0.0 }
 0x180   :  { %683 = vpow2.f32 %v347_v28  ;;  %381 = vadd.xlane.f32.xlu0 %v1027_v1  ;;  %v1032_v8 = vsel %vm905_vm11, %v682_v57, 0.0 }
 0x181   :  { %393 = vadd.xlane.f32.xlu1 %v1032_v8 }
 0x183   :  { %v290_v34 = vpop.xlane.xlu2 %289 }
 0x184   :  { %v312_v60 = vsub.f32 %v940_v37, %v290_v34 }
 0x186   :  { %v684_v31 = vpop.eup %683  ;;  %v337_v62 = vmul.f32 1.442695, %v312_v60 }
 0x187   :  { %v1038_v63 = vsel %vm925_vm12, %v684_v31, 0.0 }
 0x188   :  { %685 = vpow2.f32 %v337_v62 }
 0x189   :  { %395 = vadd.xlane.f32.xlu1 %v1038_v63 }
 0x18e   :  { %v686_v14 = vpop.eup %685 }
 0x18f   :  { %v1043_v16 = vsel %vm934_vm13, %v686_v14, 0.0 }
 0x191   :  { %385 = vadd.xlane.f32.xlu1 %v1043_v16 }
 0x1b5   :  { %v368_v3 = vpop.xlane.xlu0 %367 }
 0x1b6   :  { %v399_v6 = vmax.f32 %v368_v3, 1e-20 }
 0x1b8   :  { %687 = vrcp.f32 %v399_v6 }
 0x1bd   :  { %v370_v36 = vpop.xlane.xlu1 %369  ;;  %v302_v37 = vpop.xlane.xlu0 %301 }
 0x1be   :  { %v400_v41 = vmax.f32 %v370_v36, 1e-20  ;;  %v318_v27 = vsub.f32 %v957_v19, %v302_v37  ;;  %v688_v10 = vpop.eup %687 }
 0x1bf   :  { %v431_v17 = vmul.f32 %v688_v10, %v947_v48 }
 0x1c0   :  { %689 = vrcp.f32 %v400_v41  ;;  %v349_v9 = vmul.f32 1.442695, %v318_v27 }
 0x1c2   :  { %691 = vpow2.f32 %v349_v9 }
 0x1c5   :  { %v288_v32 = vpop.xlane.xlu1 %287  ;;  %v372_v15 = vpop.xlane.xlu0 %371 }
 0x1c6   :  { %v690_v13 = vpop.eup %689  ;;  %v311_v35 = vsub.f32 %v977_v7, %v288_v32  ;;  %v401_v26 = vmax.f32 %v372_v15, 1e-20 }
 0x1c7   :  { %v432_v20 = vmul.f32 %v690_v13, %v961_v59 }
 0x1c8   :  { %v692_v23 = vpop.eup %691  ;;  %v335_v24 = vmul.f32 1.442695, %v311_v35 }
 0x1c9   :  { %v1052_v38 = vsel %vm951_vm14, %v692_v23, 0.0  ;;  %v447_v19 = vpack.c.bf16 %v432_v20, %v431_v17 }
 0x1ca   :  { %693 = vpow2.f32 %v335_v24  ;;  %397 = vadd.xlane.f32.xlu2 %v1052_v38 }
 0x1cb   :  { %463 = vmatmul.bf16.vlgmr.msra.gmra.mxu1 %v447_v19  ;;  %695 = vrcp.f32 %v401_v26 }
 0x1cd   :  { %v374_v29 = vpop.xlane.xlu1 %373 }
 0x1ce   :  { %v402_v7 = vmax.f32 %v374_v29, 1e-20 }
 0x1d0   :  { %v694_v30 = vpop.eup %693  ;;  %697 = vrcp.f32 %v402_v7 }
 0x1d1   :  { %v1057_v48 = vsel %vm967_vm15, %v694_v30, 0.0  ;;  %v696_v55 = vpop.eup %695 }
 0x1d2   :  { %383 = vadd.xlane.f32.xlu0 %v1057_v48  ;;  %v433_v58 = vmul.f32 %v696_v55, %v973_v25 }
 0x1d5   :  { %v376_v40 = vpop.xlane.xlu1 %375 }
 0x1d6   :  { %v698_v59 = vpop.eup %697  ;;  %v403_v42 = vmax.f32 %v376_v40, 1e-20 }
 0x1d7   :  { %v434_v33 = vmul.f32 %v698_v59, %v984_v12 }
 0x1d8   :  { %699 = vrcp.f32 %v403_v42 }
 0x1d9   :  { %v448_v46 = vpack.c.bf16 %v434_v33, %v433_v58 }
 0x1db   :  { %v388_v39 = vpop.xlane.xlu2 %387  ;;  %468 = vmatmul.bf16.gmra.mxu1 %v448_v46 }
 0x1dc   :  { %v409_v44 = vmax.f32 %v388_v39, 1e-20 }
 0x1de   :  { %701 = vrcp.f32 %v409_v44  ;;  %v700_v43 = vpop.eup %699 }
 0x1df   :  { %v435_v56 = vmul.f32 %v700_v43, %v991_v49 }
 0x1e3   :  { %v378_v4 = vpop.xlane.xlu2 %377  ;;  %v390_v5 = vpop.xlane.xlu0 %389 }
 0x1e4   :  { %v404_v2 = vmax.f32 %v378_v4, 1e-20  ;;  %v410_v47 = vmax.f32 %v390_v5, 1e-20  ;;  %v702_v11 = vpop.eup %701 }
 0x1e5   :  { %v441_v18 = vmul.f32 %v702_v11, %v998_v61 }
 0x1e6   :  { %703 = vrcp.f32 %v404_v2 }
 0x1e7   :  { %705 = vrcp.f32 %v410_v47 }
 0x1eb   :  { %v392_v50 = vpop.xlane.xlu0 %391  ;;  %v380_v12 = vpop.xlane.xlu2 %379 }
 0x1ec   :  { %v704_v25 = vpop.eup %703  ;;  %v405_v28 = vmax.f32 %v380_v12, 1e-20  ;;  %v411_v34 = vmax.f32 %v392_v50, 1e-20 }
 0x1ed   :  { %v706_v51 = vpop.eup %705  ;;  %v436_v53 = vmul.f32 %v704_v25, %v1004_v45 }
 0x1ee   :  { %v442_v22 = vmul.f32 %v706_v51, %v1008_v52  ;;  %707 = vrcp.f32 %v405_v28 }
 0x1ef   :  { %v449_v21 = vpack.c.bf16 %v436_v53, %v435_v56  ;;  %709 = vrcp.f32 %v411_v34 }
 0x1f0   :  { %v452_v57 = vpack.c.bf16 %v442_v22, %v441_v18 }
 0x1f1   :  { %473 = vmatmul.bf16.gmra.mxu1 %v449_v21 }
 0x1f2   :  { %488 = vmatmul.bf16.vlgmr.msra.gmra.mxu3 %v452_v57 }
 0x1f3   :  { %v382_v60 = vpop.xlane.xlu0 %381 }
 0x1f4   :  { %v394_v31 = vpop.xlane.xlu1 %393  ;;  %v406_v62 = vmax.f32 %v382_v60, 1e-20  ;;  %v708_v49 = vpop.eup %707 }
 0x1f5   :  { %v412_v14 = vmax.f32 %v394_v31, 1e-20  ;;  %v710_v45 = vpop.eup %709  ;;  %v437_v52 = vmul.f32 %v708_v49, %v1016_v0 }
 0x1f6   :  { %711 = vrcp.f32 %v406_v62  ;;  %v443_v36 = vmul.f32 %v710_v45, %v1020_v54 }
 0x1f7   :  { %713 = vrcp.f32 %v412_v14 }
 0x1fc   :  { %v712_v3 = vpop.eup %711  ;;  %v396_v9 = vpop.xlane.xlu1 %395 }
 0x1fd   :  { %v714_v61 = vpop.eup %713  ;;  %v438_v6 = vmul.f32 %v712_v3, %v1027_v1  ;;  %v413_v10 = vmax.f32 %v396_v9, 1e-20 }
 0x1fe   :  { %v444_v37 = vmul.f32 %v714_v61, %v1032_v8 }
 0x1ff   :  { %v450_v41 = vpack.c.bf16 %v438_v6, %v437_v52  ;;  %715 = vrcp.f32 %v413_v10 }
 0x200   :  { %v453_v27 = vpack.c.bf16 %v444_v37, %v443_v36 }
 0x201   :  { %478 = vmatmul.bf16.gmra.mxu1 %v450_v41 }
 0x202   :  { %493 = vmatmul.bf16.gmra.mxu3 %v453_v27 }
 0x204   :  { %v386_v35 = vpop.xlane.xlu1 %385 }
 0x205   :  { %v408_v15 = vmax.f32 %v386_v35, 1e-20  ;;  %v716_v17 = vpop.eup %715 }
 0x206   :  { %v445_v54 = vmul.f32 %v716_v17, %v1038_v63 }
 0x23d   :  { %v398_v32 = vpop.xlane.xlu2 %397 }
 0x23e   :  { %v414_v13 = vmax.f32 %v398_v32, 1e-20 }
 0x240   :  { %717 = vrcp.f32 %v414_v13 }
 0x241   :  { %719 = vrcp.f32 %v408_v15 }
 0x245   :  { %v384_v0 = vpop.xlane.xlu0 %383 }
 0x246   :  { %v718_v20 = vpop.eup %717  ;;  %v407_v1 = vmax.f32 %v384_v0, 1e-20 }
 0x247   :  { %v446_v8 = vmul.f32 %v718_v20, %v1052_v38  ;;  %v720_v19 = vpop.eup %719 }
 0x248   :  { %721 = vrcp.f32 %v407_v1  ;;  %v464_v23 = vpop.f32.mrf.mxu1  ;;  %v440_v7 = vmul.f32 %v720_v19, %v1043_v16 }
 0x249   :  { %504 = vst [vmem:[%s1125_s3] sm:$0xff] %v464_v23  ;;  %v454_v24 = vpack.c.bf16 %v446_v8, %v445_v54 }
 0x24b   :  { %498 = vmatmul.bf16.gmra.mxu3 %v454_v24 }
 0x24e   :  { %v722_v26 = vpop.eup %721 }
 0x24f   :  { %v439_v29 = vmul.f32 %v722_v26, %v1057_v48 }
 0x250   :  { %v466_v30 = vpop.f32.mrf.mxu1 }
 0x251   :  { %505 = vst [vmem:[%s1125_s3 + $0x8] sm:$0xff] %v466_v30  ;;  %v451_v63 = vpack.c.bf16 %v440_v7, %v439_v29 }
 0x253   :  { %483 = vmatmul.bf16.gmra.mxu1 %v451_v63 }
 0x258   :  { %v469_v38 = vpop.f32.mrf.mxu1 }
 0x259   :  { %506 = vst [vmem:[%s1125_s3 + $0x10] sm:$0xff] %v469_v38 }
 0x260   :  { %v471_v55 = vpop.f32.mrf.mxu1 }
 0x261   :  { %507 = vst [vmem:[%s1125_s3 + $0x18] sm:$0xff] %v471_v55 }
 0x26e   :  { %v474_v48 = vpop.f32.mrf.mxu1 }
 0x26f   :  { %508 = vst [vmem:[%s1125_s3 + $0x20] sm:$0xff] %v474_v48 }
 0x275   :  { %v489_v16 = vpop.f32.mrf.mxu3 }
 0x276   :  { %514 = vst [vmem:[%s1125_s3 + $0x50] sm:$0xff] %v489_v16  ;;  %v476_v59 = vpop.f32.mrf.mxu1 }
 0x277   :  { %509 = vst [vmem:[%s1125_s3 + $0x28] sm:$0xff] %v476_v59 }
 0x27d   :  { %v491_v58 = vpop.f32.mrf.mxu3 }
 0x27e   :  { %515 = vst [vmem:[%s1125_s3 + $0x58] sm:$0xff] %v491_v58  ;;  %v479_v33 = vpop.f32.mrf.mxu1 }
 0x27f   :  { %510 = vst [vmem:[%s1125_s3 + $0x30] sm:$0xff] %v479_v33 }
 0x285   :  { %v494_v46 = vpop.f32.mrf.mxu3 }
 0x286   :  { %516 = vst [vmem:[%s1125_s3 + $0x60] sm:$0xff] %v494_v46  ;;  %v481_v39 = vpop.f32.mrf.mxu1 }
 0x287   :  { %511 = vst [vmem:[%s1125_s3 + $0x38] sm:$0xff] %v481_v39 }
 0x28d   :  { %v496_v40 = vpop.f32.mrf.mxu3 }
 0x28e   :  { %517 = vst [vmem:[%s1125_s3 + $0x68] sm:$0xff] %v496_v40 }
 0x2ce   :  { %v499_v42 = vpop.f32.mrf.mxu3 }
 0x2cf   :  { %518 = vst [vmem:[%s1125_s3 + $0x70] sm:$0xff] %v499_v42 }
 0x2d0   :  { %v484_v44 = vpop.f32.mrf.mxu1 }
 0x2d1   :  { %512 = vst [vmem:[%s1125_s3 + $0x40] sm:$0xff] %v484_v44 }
 0x2d6   :  { %v501_v4 = vpop.f32.mrf.mxu3 }
 0x2d7   :  { %519 = vst [vmem:[%s1125_s3 + $0x78] sm:$0xff] %v501_v4 }
 0x2d8   :  { %v486_v5 = vpop.f32.mrf.mxu1 }
 0x2d9   :  { %513 = vst [vmem:[%s1125_s3 + $0x48] sm:$0xff] %v486_v5 }

// kernel: dotgat_forward.4
= control target key start
LH: loop header
LB: loop body
LE: loop exit
PB: predicated region body
PF: predicated region fallthrough
CT: control target
= control target key end

     0   :  { %vm4775_vm0 = vcmask 261120   ;;  %s3342_s21 = smov 96   ;;  %s3343_s13 = smov 32   ;;  %s4770_s1 = inlined_call_operand.vmem [shape: bf16[128,128], index: 1, kind: input, shape index: {}, may-alias: {1,2}]   ;;  %s4771_s2 = inlined_call_operand.vmem [shape: bf16[128,128], index: 2, kind: input, shape index: {}, may-alias: {1,2}]   ;;  %s4772_s0 = inlined_call_operand.vmem [shape: bf16[128,128], index: 0, kind: input, shape index: {}]   ;;  %s4773_s3 = inlined_call_operand.vmem [shape: bf16[128,128], index: 3, kind: input, shape index: {}]   ;;  %s4774_s4 = inlined_call_operand.vmem [shape: bf16[128,128], index: 4, kind: output, shape index: {}]  }
   0x1   :  { %v2826_v0 = vld [vmem:[%s4770_s1 + $0x38] sm:$0xff]  ;;  %v2824_v1 = vld [vmem:[%s4770_s1 + $0x28] sm:$0xff]  ;;  %v2825_v4 = vld [vmem:[%s4770_s1 + $0x30] sm:$0xff]  ;;  %s3344_s14 = smov 64  }
   0x2   :  { %v2822_v2 = vld [vmem:[%s4770_s1 + $0x18] sm:$0xff]  ;;  %687 = vrot.lane.b32.xlu0 %v2826_v0, %s3342_s21  ;;  %v225_v3 = vsel %vm4775_vm0, %v2826_v0, 0  ;;  %683 = vrot.lane.b32.xlu1 %v2824_v1, %s3342_s21  ;;  %v2823_v5 = vld [vmem:[%s4770_s1 + $0x20] sm:$0xff]  ;;  %v222_v6 = vsel %vm4775_vm0, %v2825_v4, 0  ;;  %v219_v9 = vsel %vm4775_vm0, %v2824_v1, 0 }
   0x3   :  { %227 = vmatpush.bf16.xpose.msra.mxu0 %v225_v3  ;;  %679 = vrot.lane.b32.xlu2 %v2822_v2, %s3342_s21  ;;  %v2821_v7 = vld [vmem:[%s4770_s1 + $0x10] sm:$0xff]  ;;  %v2820_v8 = vld [vmem:[%s4770_s1 + $0x8] sm:$0xff]  ;;  %v2819_v10 = vld [vmem:[%s4770_s1] sm:$0xff]  ;;  %v216_v11 = vsel %vm4775_vm0, %v2823_v5, 0  ;;  %v213_v13 = vsel %vm4775_vm0, %v2822_v2, 0 }
   0x4   :  { %500 = vmatpush.bf16.msra.mxu1 %v2826_v0  ;;  %v2827_v12 = vld [vmem:[%s4771_s2] sm:$0xff]  ;;  %v2828_v14 = vld [vmem:[%s4771_s2 + $0x8] sm:$0xff]  ;;  %v210_v15 = vsel %vm4775_vm0, %v2821_v7, 0  ;;  %v207_v16 = vsel %vm4775_vm0, %v2820_v8, 0  ;;  %v2829_v17 = vld [vmem:[%s4771_s2 + $0x10] sm:$0xff]  ;;  %v204_v18 = vsel %vm4775_vm0, %v2819_v10, 0 }
   0x5   :  { %v2830_v19 = vld [vmem:[%s4771_s2 + $0x18] sm:$0xff]  ;;  %v2831_v20 = vld [vmem:[%s4771_s2 + $0x20] sm:$0xff]  ;;  %v2832_v21 = vld [vmem:[%s4771_s2 + $0x28] sm:$0xff] }
   0x6   :  { %v2833_v27 = vld [vmem:[%s4771_s2 + $0x30] sm:$0xff]  ;;  %v2834_v31 = vld [vmem:[%s4771_s2 + $0x38] sm:$0xff]  ;;  %v2844_v41 = vld [vmem:[%s4772_s0] sm:$0xff]  }
   0x7   :  { %v2845_v42 = vunpack.c.l.bf16 %v2844_v41  ;;  %v2846_v48 = vunpack.c.h.bf16 %v2844_v41  ;;  %v2915_v52 = vld [vmem:[%s4772_s0 + $0x8] sm:$0xff]   ;;  %v2916_v0 = vld [vmem:[%s4772_s0 + $0x10] sm:$0xff]  }
   0x8   :  { %501 = vmatpush.bf16.msra.mxu1 %v2825_v4  ;;  %v2849_v54 = vunpack.c.l.bf16 %v2915_v52  ;;  %v2850_v60 = vunpack.c.h.bf16 %v2915_v52 }
   0x9   :  { %vm3462_vm1 = vcmp.gt.f32.partialorder %v2845_v42, 0.0  ;;  %vm3469_vm2 = vcmp.gt.f32.partialorder %v2846_v48, 0.0 }
   0xa   :  { %685 = vrot.lane.b32.xlu0 %v2825_v4, %s3342_s21  ;;  %681 = vrot.lane.b32.xlu1 %v2823_v5, %s3342_s21  ;;  %vm3481_vm3 = vcmp.gt.f32.partialorder %v2849_v54, 0.0  ;;  %vm3491_vm4 = vcmp.gt.f32.partialorder %v2850_v60, 0.0 }
   0xb   :  { %228 = vmatpush.bf16.xpose.msra.mxu0 %v222_v6  ;;  %677 = vrot.lane.b32.xlu2 %v2821_v7, %s3342_s21 }
   0xc   :  { %502 = vmatpush.bf16.msra.mxu1 %v2824_v1 }
  0x10   :  { %503 = vmatpush.bf16.msra.mxu1 %v2823_v5 }
  0x12   :  { %675 = vrot.lane.b32.xlu0 %v2820_v8, %s3342_s21  ;;  %673 = vrot.lane.b32.xlu1 %v2819_v10, %s3342_s21 }
  0x13   :  { %229 = vmatpush.bf16.xpose.msra.mxu0 %v219_v9  ;;  %657 = vrot.lane.b32.xlu2 %v2827_v12, %s3342_s21 }
  0x14   :  { %504 = vmatpush.bf16.msra.mxu1 %v2822_v2  ;;  %v2853_v2 = vunpack.c.l.bf16 %v2916_v0 }
  0x16   :  { %vm3503_vm5 = vcmp.gt.f32.partialorder %v2853_v2, 0.0 }
  0x18   :  { %505 = vmatpush.bf16.msra.mxu1 %v2821_v7 }
  0x1a   :  { %659 = vrot.lane.b32.xlu0 %v2828_v14, %s3342_s21  ;;  %661 = vrot.lane.b32.xlu1 %v2829_v17, %s3342_s21 }
  0x1b   :  { %230 = vmatpush.bf16.xpose.msra.mxu0 %v216_v11  ;;  %663 = vrot.lane.b32.xlu2 %v2830_v19, %s3342_s21 }
  0x1c   :  { %506 = vmatpush.bf16.msra.mxu1 %v2820_v8  ;;  %v2854_v8 = vunpack.c.h.bf16 %v2916_v0 }
  0x1e   :  { %vm3513_vm6 = vcmp.gt.f32.partialorder %v2854_v8, 0.0 }
  0x20   :  { %507 = vmatpush.bf16.msra.mxu1 %v2819_v10 }
  0x22   :  { %665 = vrot.lane.b32.xlu0 %v2831_v20, %s3342_s21  ;;  %667 = vrot.lane.b32.xlu1 %v2832_v21, %s3342_s21 }
  0x23   :  { %231 = vmatpush.bf16.xpose.msra.mxu0 %v213_v13  ;;  %669 = vrot.lane.b32.xlu2 %v2833_v27, %s3342_s21 }
  0x2a   :  { %671 = vrot.lane.b32.xlu0 %v2834_v31, %s3342_s21 }
  0x2b   :  { %232 = vmatpush.bf16.xpose.msra.mxu0 %v210_v15 }
  0x33   :  { %233 = vmatpush.bf16.xpose.msra.mxu0 %v207_v16 }
  0x3b   :  { %234 = vmatpush.bf16.xpose.msra.mxu0 %v204_v18 }
  0x42   :  { %2659 = vmatmul.msk.bf16.vlgmr.msra.gmra.mxu0 %vm4775_vm0, %v2827_v12 }
  0x52   :  { %2660 = vmatmul.msk.bf16.gmra.mxu0 %vm4775_vm0, %v2828_v14  ;;  %v2917_v14 = vld [vmem:[%s4772_s0 + $0x18] sm:$0xff]  }
  0x53   :  { %v2858_v16 = vunpack.c.h.bf16 %v2917_v14 }
  0x55   :  { %vm3526_vm7 = vcmp.gt.f32.partialorder %v2858_v16, 0.0 }
  0x5d   :  { %v680_v28 = vpop.permute.xlu2 %679 }
  0x5e   :  { %v723_v35 = vsel %vm4775_vm0, %v680_v28, 0 }
  0x62   :  { %2661 = vmatmul.msk.bf16.gmra.mxu0 %vm4775_vm0, %v2829_v17 }
  0x65   :  { %v678_v33 = vpop.permute.xlu2 %677 }
  0x66   :  { %v720_v37 = vsel %vm4775_vm0, %v678_v33, 0 }
  0x6d   :  { %v658_v40 = vpop.permute.xlu2 %657 }
  0x72   :  { %2662 = vmatmul.msk.bf16.gmra.mxu0 %vm4775_vm0, %v2830_v19 }
  0x74   :  { %v688_v22 = vpop.permute.xlu0 %687  ;;  %v684_v24 = vpop.permute.xlu1 %683 }
  0x75   :  { %v735_v23 = vsel %vm4775_vm0, %v688_v22, 0  ;;  %1010 = vmatpush.bf16.msra.mxu3 %v688_v22  ;;  %v729_v29 = vsel %vm4775_vm0, %v684_v24, 0  ;;  %v664_v7 = vpop.permute.xlu2 %663 }
  0x76   :  { %737 = vmatpush.bf16.xpose.msra.mxu2 %v735_v23 }
  0x7c   :  { %v686_v25 = vpop.permute.xlu0 %685  ;;  %v682_v30 = vpop.permute.xlu1 %681 }
  0x7d   :  { %v732_v26 = vsel %vm4775_vm0, %v686_v25, 0  ;;  %1011 = vmatpush.bf16.msra.mxu3 %v686_v25  ;;  %v726_v32 = vsel %vm4775_vm0, %v682_v30, 0  ;;  %v670_v22 = vpop.permute.xlu2 %669 }
  0x7e   :  { %738 = vmatpush.bf16.xpose.msra.mxu2 %v732_v26 }
  0x81   :  { %1012 = vmatpush.bf16.msra.mxu3 %v684_v24 }
  0x82   :  { %2663 = vmatmul.msk.bf16.gmra.mxu0 %vm4775_vm0, %v2831_v20 }
  0x84   :  { %v676_v34 = vpop.permute.xlu0 %675  ;;  %v674_v36 = vpop.permute.xlu1 %673 }
  0x85   :  { %1013 = vmatpush.bf16.msra.mxu3 %v682_v30  ;;  %v717_v38 = vsel %vm4775_vm0, %v676_v34, 0  ;;  %v714_v39 = vsel %vm4775_vm0, %v674_v36, 0 }
  0x86   :  { %739 = vmatpush.bf16.xpose.msra.mxu2 %v729_v29 }
  0x89   :  { %1014 = vmatpush.bf16.msra.mxu3 %v680_v28 }
  0x8c   :  { %v660_v47 = vpop.permute.xlu0 %659  ;;  %v662_v59 = vpop.permute.xlu1 %661 }
  0x8d   :  { %1015 = vmatpush.bf16.msra.mxu3 %v678_v33 }
  0x8e   :  { %740 = vmatpush.bf16.xpose.msra.mxu2 %v726_v32 }
  0x91   :  { %1016 = vmatpush.bf16.msra.mxu3 %v676_v34 }
  0x92   :  { %2664 = vmatmul.msk.bf16.gmra.mxu0 %vm4775_vm0, %v2832_v21 }
  0x94   :  { %v666_v15 = vpop.permute.xlu0 %665  ;;  %v668_v21 = vpop.permute.xlu1 %667 }
  0x95   :  { %1017 = vmatpush.bf16.msra.mxu3 %v674_v36 }
  0x96   :  { %741 = vmatpush.bf16.xpose.msra.mxu2 %v723_v35  ;;  %v2918_v35 = vld [vmem:[%s4772_s0 + $0x20] sm:$0xff]  }
  0x97   :  { %v2862_v42 = vunpack.c.h.bf16 %v2918_v35 }
  0x99   :  { %vm3566_vm9 = vcmp.gt.f32.partialorder %v2862_v42, 0.0 }
  0x9c   :  { %v672_v23 = vpop.permute.xlu0 %671 }
  0x9e   :  { %742 = vmatpush.bf16.xpose.msra.mxu2 %v720_v37 }
  0xa2   :  { %2665 = vmatmul.msk.bf16.gmra.mxu0 %vm4775_vm0, %v2833_v27 }
  0xa6   :  { %743 = vmatpush.bf16.xpose.msra.mxu2 %v717_v38 }
  0xae   :  { %744 = vmatpush.bf16.xpose.msra.mxu2 %v714_v39 }
  0xb2   :  { %2666 = vmatmul.msk.bf16.gmra.mxu0 %vm4775_vm0, %v2834_v31  ;;  %v2857_v31 = vunpack.c.l.bf16 %v2917_v14 }
  0xb4   :  { %vm3546_vm8 = vcmp.gt.f32.partialorder %v2857_v31, 0.0 }
  0xb5   :  { %2683 = vmatmul.msk.bf16.vlgmr.msra.gmra.mxu2 %vm4775_vm0, %v658_v40 }
  0xbf   :  { %v236_v43 = vpop.f32.mrf.mxu0 }
  0xc0   :  { %v276_v45 = vmul.f32 0.17677669, %v236_v43  ;;  %v2861_v43 = vunpack.c.l.bf16 %v2918_v35 }
  0xc2   :  { %v292_v46 = vsel %vm3462_vm1, %v276_v45, -1e+30  ;;  %vm3570_vm10 = vcmp.gt.f32.partialorder %v2861_v43, 0.0 }
  0xc3   :  { %308 = vmax.xlane.f32.xlu1 %v292_v46 }
  0xc5   :  { %2684 = vmatmul.msk.bf16.gmra.mxu2 %vm4775_vm0, %v660_v47 }
  0xc7   :  { %v238_v49 = vpop.f32.mrf.mxu0 }
  0xc8   :  { %v277_v51 = vmul.f32 0.17677669, %v238_v49 }
  0xca   :  { %v3478_v53 = vsel %vm3469_vm2, %v277_v51, -1e+30 }
  0xcb   :  { %310 = vmax.xlane.f32.xlu2 %v3478_v53 }
  0xcf   :  { %v241_v55 = vpop.f32.mrf.mxu0 }
  0xd0   :  { %v278_v57 = vmul.f32 0.17677669, %v241_v55 }
  0xd2   :  { %v3487_v58 = vsel %vm3481_vm3, %v278_v57, -1e+30 }
  0xd3   :  { %312 = vmax.xlane.f32.xlu0 %v3487_v58 }
  0xd5   :  { %2685 = vmatmul.msk.bf16.gmra.mxu2 %vm4775_vm0, %v662_v59 }
  0xd7   :  { %v243_v61 = vpop.f32.mrf.mxu0 }
  0xd8   :  { %v279_v63 = vmul.f32 0.17677669, %v243_v61 }
  0xda   :  { %v3500_v1 = vsel %vm3491_vm4, %v279_v63, -1e+30 }
  0xdb   :  { %314 = vmax.xlane.f32.xlu2 %v3500_v1 }
  0xdf   :  { %v246_v3 = vpop.f32.mrf.mxu0 }
  0xe0   :  { %v280_v5 = vmul.f32 0.17677669, %v246_v3 }
  0xe2   :  { %v3509_v6 = vsel %vm3503_vm5, %v280_v5, -1e+30 }
  0xe3   :  { %316 = vmax.xlane.f32.xlu0 %v3509_v6 }
  0xe5   :  { %2686 = vmatmul.msk.bf16.gmra.mxu2 %vm4775_vm0, %v664_v7 }
  0xe7   :  { %v248_v9 = vpop.f32.mrf.mxu0 }
  0xe8   :  { %v281_v11 = vmul.f32 0.17677669, %v248_v9 }
  0xea   :  { %v3519_v12 = vsel %vm3513_vm6, %v281_v11, -1e+30 }
  0xeb   :  { %318 = vmax.xlane.f32.xlu1 %v3519_v12 }
  0xef   :  { %v251_v13 = vpop.f32.mrf.mxu0 }
  0xf0   :  { %v282_v33 = vmul.f32 0.17677669, %v251_v13 }
  0xf5   :  { %2687 = vmatmul.msk.bf16.gmra.mxu2 %vm4775_vm0, %v666_v15 }
  0xf7   :  { %v253_v17 = vpop.f32.mrf.mxu0 }
  0xf8   :  { %v283_v19 = vmul.f32 0.17677669, %v253_v17 }
  0xfa   :  { %v3532_v20 = vsel %vm3526_vm7, %v283_v19, -1e+30  ;;  %v4808_v19 = vmov 0 }
  0xfb   :  { %322 = vmax.xlane.f32.xlu2 %v3532_v20 }
  0xff   :  { %v256_v24 = vpop.f32.mrf.mxu0 }
 0x100   :  { %v284_v47 = vmul.f32 0.17677669, %v256_v24 }
 0x102   :  { %v3581_v61 = vsel %vm3570_vm10, %v284_v47, -1e+30 }
 0x105   :  { %2688 = vmatmul.msk.bf16.gmra.mxu2 %vm4775_vm0, %v668_v21 }
 0x107   :  { %v258_v32 = vpop.f32.mrf.mxu0 }
 0x108   :  { %v285_v48 = vmul.f32 0.17677669, %v258_v32 }
 0x10a   :  { %v3577_v60 = vsel %vm3566_vm9, %v285_v48, -1e+30 }
 0x10f   :  { %v261_v57 = vpop.f32.mrf.mxu0 }
 0x115   :  { %2689 = vmatmul.msk.bf16.gmra.mxu2 %vm4775_vm0, %v670_v22 }
 0x117   :  { %v263_v11 = vpop.f32.mrf.mxu0 }
 0x118   :  { %v287_v15 = vmul.f32 0.17677669, %v263_v11  ;;  %v4812_v11 = vmov 0 }
 0x125   :  { %2690 = vmatmul.msk.bf16.gmra.mxu2 %vm4775_vm0, %v672_v23 }
 0x136   :  { %v309_v25 = vpop.xlane.xlu1 %308 }
 0x137   :  { %v340_v26 = vsub.f32 %v292_v46, %v309_v25  ;;  %v3562_v46 = vsel %vm3546_vm8, %v282_v33, -1e+30 }
 0x138   :  { %v746_v27 = vpop.f32.mrf.mxu2 }
 0x139   :  { %v356_v28 = vmul.f32 1.442695, %v340_v26  ;;  %v786_v29 = vmul.f32 0.17677669, %v746_v27 }
 0x13b   :  { %2942 = vpow2.f32 %v356_v28  ;;  %v3540_v30 = vsel %vm3462_vm1, %v786_v29, -1e+30  ;;  %v4810_v29 = vmov 0 }
 0x13c   :  { %818 = vmax.xlane.f32.xlu1 %v3540_v30 }
 0x13e   :  { %v311_v34 = vpop.xlane.xlu2 %310 }
 0x13f   :  { %v341_v40 = vsub.f32 %v3478_v53, %v311_v34 }
 0x140   :  { %v748_v36 = vpop.f32.mrf.mxu2 }
 0x141   :  { %v2943_v38 = vpop.eup %2942  ;;  %v787_v39 = vmul.f32 0.17677669, %v748_v36  ;;  %v358_v49 = vmul.f32 1.442695, %v341_v40 }
 0x142   :  { %v3553_v41 = vsel %vm3462_vm1, %v2943_v38, 0.0 }
 0x143   :  { %404 = vadd.xlane.f32.xlu0 %v3553_v41  ;;  %v3558_v45 = vsel %vm3469_vm2, %v787_v39, -1e+30  ;;  %2944 = vpow2.f32 %v358_v49 }
 0x144   :  { %820 = vmax.xlane.f32.xlu2 %v3558_v45  ;;  %320 = vmax.xlane.f32.xlu1 %v3562_v46 }
 0x146   :  { %v313_v51 = vpop.xlane.xlu0 %312 }
 0x147   :  { %v342_v54 = vsub.f32 %v3487_v58, %v313_v51  ;;  %v2919_v58 = vld [vmem:[%s4772_s0 + $0x28] sm:$0xff]   ;;  %v266_v51 = vpop.f32.mrf.mxu0 }
 0x148   :  { %v751_v55 = vpop.f32.mrf.mxu2  ;;  %v2866_v13 = vunpack.c.h.bf16 %v2919_v58  ;;  %v2865_v26 = vunpack.c.l.bf16 %v2919_v58 }
 0x149   :  { %v360_v59 = vmul.f32 1.442695, %v342_v54  ;;  %v788_v63 = vmul.f32 0.17677669, %v751_v55  ;;  %v2945_v2 = vpop.eup %2944 }
 0x14a   :  { %v3600_v14 = vsel %vm3469_vm2, %v2945_v2, 0.0  ;;  %vm3604_vm11 = vcmp.gt.f32.partialorder %v2866_v13, 0.0  ;;  %vm3624_vm12 = vcmp.gt.f32.partialorder %v2865_v26, 0.0 }
 0x14b   :  { %2946 = vpow2.f32 %v360_v59  ;;  %v3590_v7 = vsel %vm3481_vm3, %v788_v63, -1e+30  ;;  %v4809_v19 = vsel %vm3604_vm11, 4294967295, %v4808_v19  ;;  %v3611_v25 = vsel %vm3604_vm11, %v287_v15, -1e+30  ;;  %v2920_v59 = vld [vmem:[%s4772_s0 + $0x30] sm:$0xff]  }
 0x14c   :  { %326 = vmax.xlane.f32.xlu2 %v3577_v60  ;;  %324 = vmax.xlane.f32.xlu1 %v3581_v61  ;;  %v4811_v29 = vsel %vm3624_vm12, 4294967295, %v4810_v29 }
 0x14e   :  { %v315_v0 = vpop.xlane.xlu2 %314 }
 0x14f   :  { %v343_v8 = vsub.f32 %v3500_v1, %v315_v0  ;;  %v268_v2 = vpop.f32.mrf.mxu0 }
 0x150   :  { %v753_v3 = vpop.f32.mrf.mxu2 }
 0x151   :  { %v2947_v5 = vpop.eup %2946  ;;  %v362_v16 = vmul.f32 1.442695, %v343_v8  ;;  %v789_v17 = vmul.f32 0.17677669, %v753_v3  ;;  %v2870_v3 = vunpack.c.h.bf16 %v2920_v59  ;;  %v289_v8 = vmul.f32 0.17677669, %v268_v2 }
 0x152   :  { %v3595_v9 = vsel %vm3481_vm3, %v2947_v5, 0.0 }
 0x153   :  { %408 = vadd.xlane.f32.xlu0 %v3595_v9  ;;  %2948 = vpow2.f32 %v362_v16  ;;  %v3615_v27 = vsel %vm3491_vm4, %v789_v17, -1e+30  ;;  %vm3672_vm13 = vcmp.gt.f32.partialorder %v2870_v3, 0.0 }
 0x154   :  { %822 = vmax.xlane.f32.xlu2 %v3590_v7  ;;  %406 = vadd.xlane.f32.xlu1 %v3600_v14  ;;  %v4813_v11 = vsel %vm3672_vm13, 4294967295, %v4812_v11  ;;  %v3678_v15 = vsel %vm3672_vm13, %v289_v8, -1e+30 }
 0x156   :  { %v317_v1 = vpop.xlane.xlu0 %316 }
 0x157   :  { %v344_v21 = vsub.f32 %v3509_v6, %v317_v1  ;;  %v286_v6 = vmul.f32 0.17677669, %v261_v57 }
 0x158   :  { %v756_v22 = vpop.f32.mrf.mxu2 }
 0x159   :  { %v364_v23 = vmul.f32 1.442695, %v344_v21  ;;  %v790_v24 = vmul.f32 0.17677669, %v756_v22  ;;  %v2949_v32 = vpop.eup %2948  ;;  %v3630_v34 = vsel %vm3624_vm12, %v286_v6, -1e+30 }
 0x15a   :  { %v3640_v39 = vsel %vm3491_vm4, %v2949_v32, 0.0 }
 0x15b   :  { %2950 = vpow2.f32 %v364_v23  ;;  %824 = vmax.xlane.f32.xlu0 %v3615_v27  ;;  %v3620_v28 = vsel %vm3503_vm5, %v790_v24, -1e+30 }
 0x15c   :  { %826 = vmax.xlane.f32.xlu2 %v3620_v28  ;;  %330 = vmax.xlane.f32.xlu1 %v3611_v25 }
 0x15e   :  { %v319_v31 = vpop.xlane.xlu1 %318 }
 0x15f   :  { %v345_v36 = vsub.f32 %v3519_v12, %v319_v31 }
 0x160   :  { %v758_v33 = vpop.f32.mrf.mxu2 }
 0x161   :  { %v2951_v35 = vpop.eup %2950  ;;  %v366_v40 = vmul.f32 1.442695, %v345_v36  ;;  %v791_v42 = vmul.f32 0.17677669, %v758_v33 }
 0x162   :  { %v3635_v38 = vsel %vm3503_vm5, %v2951_v35, 0.0 }
 0x163   :  { %328 = vmax.xlane.f32.xlu0 %v3630_v34  ;;  %2952 = vpow2.f32 %v366_v40  ;;  %v3646_v12 = vsel %vm3513_vm6, %v791_v42, -1e+30 }
 0x164   :  { %412 = vadd.xlane.f32.xlu2 %v3635_v38  ;;  %410 = vadd.xlane.f32.xlu1 %v3640_v39 }
 0x168   :  { %v761_v43 = vpop.f32.mrf.mxu2 }
 0x169   :  { %v792_v47 = vmul.f32 0.17677669, %v761_v43  ;;  %v2953_v49 = vpop.eup %2952 }
 0x16a   :  { %v3656_v55 = vsel %vm3513_vm6, %v2953_v49, 0.0 }
 0x16b   :  { %828 = vmax.xlane.f32.xlu0 %v3646_v12  ;;  %v3651_v48 = vsel %vm3546_vm8, %v792_v47, -1e+30 }
 0x16c   :  { %830 = vmax.xlane.f32.xlu2 %v3651_v48 }
 0x16e   :  { %v323_v1 = vpop.xlane.xlu2 %322 }
 0x170   :  { %v763_v54 = vpop.f32.mrf.mxu2 }
 0x171   :  { %v793_v57 = vmul.f32 0.17677669, %v763_v54 }
 0x173   :  { %414 = vadd.xlane.f32.xlu0 %v3656_v55  ;;  %v3664_v0 = vsel %vm3526_vm7, %v793_v57, -1e+30 }
 0x178   :  { %v766_v63 = vpop.f32.mrf.mxu2 }
 0x179   :  { %v794_v58 = vmul.f32 0.17677669, %v766_v63 }
 0x17b   :  { %832 = vmax.xlane.f32.xlu0 %v3664_v0  ;;  %v3669_v5 = vsel %vm3570_vm10, %v794_v58, -1e+30  ;;  %v288_v58 = vmul.f32 0.17677669, %v266_v51 }
 0x17c   :  { %834 = vmax.xlane.f32.xlu1 %v3669_v5 }
 0x180   :  { %v768_v13 = vpop.f32.mrf.mxu2 }
 0x181   :  { %v795_v16 = vmul.f32 0.17677669, %v768_v13 }
 0x183   :  { %334 = vmax.xlane.f32.xlu0 %v3678_v15  ;;  %v3683_v17 = vsel %vm3566_vm9, %v795_v16, -1e+30  ;;  %v3714_v16 = vpop.f32.mrf.mxu0 }
 0x184   :  { %836 = vmax.xlane.f32.xlu2 %v3683_v17 }
 0x1af   :  { %v819_v21 = vpop.xlane.xlu1 %818 }
 0x1b0   :  { %v850_v22 = vsub.f32 %v3540_v30, %v819_v21 }
 0x1b2   :  { %v866_v23 = vmul.f32 1.442695, %v850_v22 }
 0x1b4   :  { %2954 = vpow2.f32 %v866_v23 }
 0x1b6   :  { %v405_v30 = vpop.xlane.xlu0 %404 }
 0x1b7   :  { %v821_v24 = vpop.xlane.xlu2 %820  ;;  %v321_v26 = vpop.xlane.xlu1 %320  ;;  %v436_v54 = vmax.f32 %v405_v30, 1e-20 }
 0x1b8   :  { %v851_v6 = vsub.f32 %v3558_v45, %v821_v24  ;;  %v346_v31 = vsub.f32 %v3562_v46, %v321_v26  ;;  %v347_v45 = vsub.f32 %v3532_v20, %v323_v1  ;;  %v2869_v46 = vunpack.c.l.bf16 %v2920_v59 }
 0x1b9   :  { %v4814_v20 = vmov 0 }
 0x1ba   :  { %v2955_v32 = vpop.eup %2954  ;;  %v868_v33 = vmul.f32 1.442695, %v851_v6  ;;  %v368_v35 = vmul.f32 1.442695, %v346_v31  ;;  %v370_v63 = vmul.f32 1.442695, %v347_v45  ;;  %v771_v31 = vpop.f32.mrf.mxu2 }
 0x1bb   :  { %v3691_v36 = vsel %vm3462_vm1, %v2955_v32, 0.0  ;;  %vm3709_vm14 = vcmp.gt.f32.partialorder %v2869_v46, 0.0 }
 0x1bc   :  { %2956 = vpow2.f32 %v868_v33  ;;  %914 = vadd.xlane.f32.xlu1 %v3691_v36  ;;  %v4815_v20 = vsel %vm3709_vm14, 4294967295, %v4814_v20  ;;  %v3718_v1 = vsel %vm3709_vm14, %v288_v58, -1e+30 }
 0x1bd   :  { %2958 = vpow2.f32 %v368_v35 }
 0x1be   :  { %2960 = vrcp.f32 %v436_v54 }
 0x1bf   :  { %v3694_v40 = vpop.xlane.xlu2 %326  ;;  %v3696_v42 = vpop.xlane.xlu1 %324  ;;  %2962 = vpow2.f32 %v370_v63 }
 0x1c2   :  { %v2957_v43 = vpop.eup %2956 }
 0x1c3   :  { %v2959_v47 = vpop.eup %2958  ;;  %v3701_v49 = vsel %vm3469_vm2, %v2957_v43, 0.0  ;;  %v273_v43 = vpop.f32.mrf.mxu0 }
 0x1c4   :  { %916 = vadd.xlane.f32.xlu2 %v3701_v49  ;;  %v3706_v57 = vsel %vm3546_vm8, %v2959_v47, 0.0  ;;  %v2961_v21 = vpop.eup %2960  ;;  %v291_v54 = vmul.f32 0.17677669, %v273_v43 }
 0x1c5   :  { %416 = vadd.xlane.f32.xlu1 %v3706_v57  ;;  %v2963_v23 = vpop.eup %2962  ;;  %v468_v33 = vmul.f32 %v2961_v21, %v3553_v41  ;;  %v2921_v41 = vld [vmem:[%s4772_s0 + $0x38] sm:$0xff]  }
 0x1c6   :  { %v409_v2 = vpop.xlane.xlu0 %408  ;;  %v3729_v46 = vsel %vm3526_vm7, %v2963_v23, 0.0 }
 0x1c7   :  { %v823_v59 = vpop.xlane.xlu2 %822  ;;  %v407_v3 = vpop.xlane.xlu1 %406 }
 0x1c8   :  { %v852_v8 = vsub.f32 %v3590_v7, %v823_v59  ;;  %v437_v13 = vmax.f32 %v407_v3, 1e-20  ;;  %v796_v59 = vmul.f32 0.17677669, %v771_v31  ;;  %v348_v31 = vsub.f32 %v3581_v61, %v3696_v42 }
 0x1ca   :  { %v870_v51 = vmul.f32 1.442695, %v852_v8  ;;  %2964 = vrcp.f32 %v437_v13  ;;  %v4816_v13 = vmov 0  ;;  %v3757_v23 = vsel %vm3624_vm12, %v796_v59, -1e+30 }
 0x1cb   :  { %v2873_v59 = vunpack.c.l.bf16 %v2921_v41 }
 0x1cc   :  { %2966 = vpow2.f32 %v870_v51  ;;  %332 = vmax.xlane.f32.xlu2 %v3718_v1 }
 0x1cd   :  { %vm3780_vm0 = vcmp.gt.f32.partialorder %v2873_v59, 0.0 }
 0x1ce   :  { %v825_v22 = vpop.xlane.xlu0 %824 }
 0x1cf   :  { %v853_v24 = vsub.f32 %v3615_v27, %v825_v22  ;;  %v827_v26 = vpop.xlane.xlu2 %826  ;;  %v3722_v7 = vpop.xlane.xlu1 %330 }
 0x1d0   :  { %v2965_v6 = vpop.eup %2964  ;;  %v854_v45 = vsub.f32 %v3620_v28, %v827_v26  ;;  %v438_v28 = vmax.f32 %v409_v2, 1e-20  ;;  %v773_v22 = vpop.f32.mrf.mxu2 }
 0x1d1   :  { %v872_v32 = vmul.f32 1.442695, %v853_v24  ;;  %v469_v35 = vmul.f32 %v2965_v6, %v3600_v14  ;;  %v2874_v14 = vunpack.c.h.bf16 %v2921_v41  ;;  %v797_v26 = vmul.f32 0.17677669, %v773_v22 }
 0x1d2   :  { %v2967_v30 = vpop.eup %2966  ;;  %v874_v63 = vmul.f32 1.442695, %v854_v45  ;;  %v349_v6 = vsub.f32 %v3577_v60, %v3694_v40 }
 0x1d3   :  { %2968 = vpow2.f32 %v872_v32  ;;  %v3733_v27 = vsel %vm3481_vm3, %v2967_v30, 0.0  ;;  %v484_v47 = vpack.c.bf16 %v469_v35, %v468_v33  ;;  %vm3742_vm15 = vcmp.gt.f32.partialorder %v2874_v14, 0.0 }
 0x1d4   :  { %418 = vadd.xlane.f32.xlu2 %v3729_v46  ;;  %918 = vadd.xlane.f32.xlu0 %v3733_v27  ;;  %v4817_v13 = vsel %vm3742_vm15, 4294967295, %v4816_v13  ;;  %2970 = vrcp.f32 %v438_v28  ;;  %v3748_v21 = vsel %vm3742_vm15, %v291_v54, -1e+30  ;;  %v372_v14 = vmul.f32 1.442695, %v348_v31 }
 0x1d5   :  { %508 = vmatmul.bf16.vlgmr.msra.gmra.mxu1 %v484_v47  ;;  %2972 = vpow2.f32 %v874_v63  ;;  %v374_v47 = vmul.f32 1.442695, %v349_v6  ;;  %v3768_v28 = vsel %vm3604_vm11, %v797_v26, -1e+30 }
 0x1d6   :  { %v3740_v58 = vpop.xlane.xlu0 %328 }
 0x1d7   :  { %v411_v3 = vpop.xlane.xlu1 %410  ;;  %v413_v24 = vpop.xlane.xlu2 %412 }
 0x1d8   :  { %v439_v8 = vmax.f32 %v411_v3, 1e-20  ;;  %v776_v40 = vpop.f32.mrf.mxu2  ;;  %v440_v42 = vmax.f32 %v413_v24, 1e-20  ;;  %v290_v3 = vmul.f32 0.17677669, %v3714_v16 }
 0x1d9   :  { %v2969_v51 = vpop.eup %2968  ;;  %v798_v54 = vmul.f32 0.17677669, %v776_v40 }
 0x1da   :  { %v3752_v2 = vsel %vm3491_vm4, %v2969_v51, 0.0  ;;  %2974 = vrcp.f32 %v439_v8  ;;  %v2971_v33 = vpop.eup %2970  ;;  %v3794_v24 = vsel %vm3780_vm0, %v290_v3, -1e+30 }
 0x1db   :  { %920 = vadd.xlane.f32.xlu1 %v3752_v2  ;;  %v2973_v30 = vpop.eup %2972  ;;  %v470_v61 = vmul.f32 %v2971_v33, %v3595_v9  ;;  %v3786_v41 = vsel %vm3709_vm14, %v798_v54, -1e+30 }
 0x1dc   :  { %338 = vmax.xlane.f32.xlu2 %v3748_v21  ;;  %838 = vmax.xlane.f32.xlu0 %v3757_v23  ;;  %v3773_v60 = vsel %vm3503_vm5, %v2973_v30, 0.0 }
 0x1de   :  { %v829_v32 = vpop.xlane.xlu0 %828 }
 0x1df   :  { %v855_v35 = vsub.f32 %v3646_v12, %v829_v32  ;;  %v831_v8 = vpop.xlane.xlu2 %830 }
 0x1e0   :  { %v2975_v43 = vpop.eup %2974  ;;  %v856_v9 = vsub.f32 %v3651_v48, %v831_v8 }
 0x1e1   :  { %v876_v45 = vmul.f32 1.442695, %v855_v35  ;;  %v471_v12 = vmul.f32 %v2975_v43, %v3640_v39  ;;  %v4818_v39 = vmov 0 }
 0x1e2   :  { %v4819_v39 = vsel %vm3780_vm0, 4294967295, %v4818_v39  ;;  %v878_v31 = vmul.f32 1.442695, %v856_v9 }
 0x1e3   :  { %2976 = vpow2.f32 %v876_v45  ;;  %840 = vmax.xlane.f32.xlu1 %v3768_v28  ;;  %v485_v63 = vpack.c.bf16 %v471_v12, %v470_v61  ;;  %v778_v45 = vpop.f32.mrf.mxu2  ;;  %v350_v12 = vsub.f32 %v3630_v34, %v3740_v58 }
 0x1e4   :  { %922 = vadd.xlane.f32.xlu2 %v3773_v60  ;;  %2978 = vpow2.f32 %v374_v47  ;;  %v351_v47 = vsub.f32 %v3611_v25, %v3722_v7  ;;  %v799_v54 = vmul.f32 0.17677669, %v778_v45 }
 0x1e5   :  { %2980 = vpow2.f32 %v372_v14  ;;  %513 = vmatmul.bf16.gmra.mxu1 %v485_v63 }
 0x1e6   :  { %v415_v51 = vpop.xlane.xlu0 %414  ;;  %2982 = vrcp.f32 %v440_v42 }
 0x1e7   :  { %v441_v22 = vmax.f32 %v415_v51, 1e-20 }
 0x1e9   :  { %v2977_v26 = vpop.eup %2976  ;;  %2984 = vrcp.f32 %v441_v22 }
 0x1ea   :  { %v3790_v16 = vsel %vm3513_vm6, %v2977_v26, 0.0  ;;  %v2979_v48 = vpop.eup %2978  ;;  %2986 = vpow2.f32 %v878_v31 }
 0x1eb   :  { %924 = vadd.xlane.f32.xlu0 %v3790_v16  ;;  %336 = vmax.xlane.f32.xlu1 %v3794_v24  ;;  %v2981_v6 = vpop.eup %2980  ;;  %v3808_v40 = vsel %vm3566_vm9, %v2979_v48, 0.0  ;;  %v781_v3 = vpop.f32.mrf.mxu2 }
 0x1ec   :  { %842 = vmax.xlane.f32.xlu2 %v3786_v41  ;;  %v2983_v32 = vpop.eup %2982  ;;  %v800_v26 = vmul.f32 0.17677669, %v781_v3 }
 0x1ed   :  { %v472_v61 = vmul.f32 %v2983_v32, %v3635_v38  ;;  %v376_v38 = vmul.f32 1.442695, %v350_v12 }
 0x1ee   :  { %v833_v33 = vpop.xlane.xlu0 %832  ;;  %v3836_v32 = vsel %vm3780_vm0, %v800_v26, -1e+30 }
 0x1ef   :  { %v2985_v35 = vpop.eup %2984  ;;  %v857_v30 = vsub.f32 %v3664_v0, %v833_v33  ;;  %v3812_v0 = vsel %vm3570_vm10, %v2981_v6, 0.0  ;;  %v835_v7 = vpop.xlane.xlu1 %834 }
 0x1f0   :  { %v473_v43 = vmul.f32 %v2985_v35, %v3656_v55  ;;  %v378_v55 = vmul.f32 1.442695, %v351_v47  ;;  %v2987_v42 = vpop.eup %2986  ;;  %v858_v58 = vsub.f32 %v3669_v5, %v835_v7  ;;  %v3830_v5 = vsel %vm3672_vm13, %v799_v54, -1e+30 }
 0x1f1   :  { %v880_v14 = vmul.f32 1.442695, %v857_v30  ;;  %v3824_v51 = vsel %vm3546_vm8, %v2987_v42, 0.0 }
 0x1f2   :  { %v486_v25 = vpack.c.bf16 %v473_v43, %v472_v61  ;;  %v882_v22 = vmul.f32 1.442695, %v858_v58 }
 0x1f3   :  { %2988 = vpow2.f32 %v880_v14  ;;  %422 = vadd.xlane.f32.xlu1 %v3808_v40  ;;  %420 = vadd.xlane.f32.xlu0 %v3812_v0  ;;  %v783_v30 = vpop.f32.mrf.mxu2 }
 0x1f4   :  { %2990 = vpow2.f32 %v378_v55  ;;  %v801_v47 = vmul.f32 0.17677669, %v783_v30 }
 0x1f5   :  { %518 = vmatmul.bf16.gmra.mxu1 %v486_v25  ;;  %2992 = vpow2.f32 %v376_v38 }
 0x1f6   :  { %v335_v9 = vpop.xlane.xlu0 %334  ;;  %2994 = vpow2.f32 %v882_v22  ;;  %v3860_v12 = vsel %vm3742_vm15, %v801_v47, -1e+30 }
 0x1f7   :  { %v837_v34 = vpop.xlane.xlu2 %836  ;;  %v353_v31 = vsub.f32 %v3678_v15, %v335_v9 }
 0x1f8   :  { %v859_v59 = vsub.f32 %v3683_v17, %v837_v34 }
 0x1f9   :  { %v2989_v63 = vpop.eup %2988  ;;  %v382_v15 = vmul.f32 1.442695, %v353_v31 }
 0x1fa   :  { %v3820_v8 = vsel %vm3526_vm7, %v2989_v63, 0.0  ;;  %v884_v17 = vmul.f32 1.442695, %v859_v59  ;;  %v2991_v48 = vpop.eup %2990 }
 0x1fb   :  { %928 = vadd.xlane.f32.xlu2 %v3820_v8  ;;  %926 = vadd.xlane.f32.xlu1 %v3824_v51  ;;  %v2993_v6 = vpop.eup %2992  ;;  %v3840_v33 = vsel %vm3604_vm11, %v2991_v48, 0.0 }
 0x1fc   :  { %844 = vmax.xlane.f32.xlu0 %v3830_v5  ;;  %2996 = vpow2.f32 %v884_v17  ;;  %v3845_v35 = vsel %vm3624_vm12, %v2993_v6, 0.0  ;;  %v2995_v45 = vpop.eup %2994 }
 0x1fd   :  { %2998 = vpow2.f32 %v382_v15  ;;  %v3855_v61 = vsel %vm3570_vm10, %v2995_v45, 0.0 }
 0x202   :  { %v2997_v43 = vpop.eup %2996 }
 0x203   :  { %846 = vmax.xlane.f32.xlu2 %v3836_v32  ;;  %426 = vadd.xlane.f32.xlu1 %v3840_v33  ;;  %v3851_v14 = vsel %vm3566_vm9, %v2997_v43, 0.0  ;;  %v2999_v25 = vpop.eup %2998 }
 0x204   :  { %424 = vadd.xlane.f32.xlu0 %v3845_v35  ;;  %v3866_v55 = vsel %vm3672_vm13, %v2999_v25, 0.0 }
 0x20b   :  { %932 = vadd.xlane.f32.xlu2 %v3851_v14  ;;  %930 = vadd.xlane.f32.xlu1 %v3855_v61 }
 0x20c   :  { %848 = vmax.xlane.f32.xlu0 %v3860_v12 }
 0x213   :  { %430 = vadd.xlane.f32.xlu1 %v3866_v55 }
 0x22f   :  { %v915_v7 = vpop.xlane.xlu1 %914 }
 0x230   :  { %v946_v38 = vmax.f32 %v915_v7, 1e-20 }
 0x232   :  { %3000 = vrcp.f32 %v946_v38 }
 0x237   :  { %v917_v42 = vpop.xlane.xlu2 %916 }
 0x238   :  { %v947_v54 = vmax.f32 %v917_v42, 1e-20  ;;  %v3001_v34 = vpop.eup %3000  ;;  %v417_v3 = vpop.xlane.xlu1 %416 }
 0x239   :  { %v978_v22 = vmul.f32 %v3001_v34, %v3691_v36  ;;  %v442_v48 = vmax.f32 %v417_v3, 1e-20 }
 0x23a   :  { %3002 = vrcp.f32 %v947_v54 }
 0x23f   :  { %v333_v58 = vpop.xlane.xlu2 %332 }
 0x240   :  { %v3003_v63 = vpop.eup %3002  ;;  %v352_v59 = vsub.f32 %v3718_v1, %v333_v58 }
 0x241   :  { %v979_v17 = vmul.f32 %v3003_v63, %v3701_v49 }
 0x242   :  { %v380_v26 = vmul.f32 1.442695, %v352_v59 }
 0x243   :  { %v994_v9 = vpack.c.bf16 %v979_v17, %v978_v22 }
 0x244   :  { %3004 = vpow2.f32 %v380_v26 }
 0x245   :  { %1018 = vmatmul.bf16.vlgmr.msra.gmra.mxu3 %v994_v9  ;;  %3006 = vrcp.f32 %v442_v48 }
 0x247   :  { %v419_v6 = vpop.xlane.xlu2 %418  ;;  %v919_v31 = vpop.xlane.xlu0 %918 }
 0x248   :  { %v443_v30 = vmax.f32 %v419_v6, 1e-20  ;;  %v948_v45 = vmax.f32 %v919_v31, 1e-20 }
 0x24a   :  { %v3005_v15 = vpop.eup %3004  ;;  %3008 = vrcp.f32 %v443_v30 }
 0x24b   :  { %v3874_v1 = vsel %vm3709_vm14, %v3005_v15, 0.0  ;;  %v3007_v36 = vpop.eup %3006  ;;  %3010 = vrcp.f32 %v948_v45 }
 0x24c   :  { %428 = vadd.xlane.f32.xlu0 %v3874_v1  ;;  %v474_v42 = vmul.f32 %v3007_v36, %v3706_v57 }
 0x24e   :  { %v921_v49 = vpop.xlane.xlu1 %920 }
 0x24f   :  { %v949_v43 = vmax.f32 %v921_v49, 1e-20  ;;  %v339_v47 = vpop.xlane.xlu2 %338  ;;  %v839_v25 = vpop.xlane.xlu0 %838 }
 0x250   :  { %v3009_v7 = vpop.eup %3008  ;;  %v860_v38 = vsub.f32 %v3757_v23, %v839_v25  ;;  %v355_v34 = vsub.f32 %v3748_v21, %v339_v47 }
 0x251   :  { %3012 = vrcp.f32 %v949_v43  ;;  %v475_v54 = vmul.f32 %v3009_v7, %v3729_v46  ;;  %v3011_v59 = vpop.eup %3010 }
 0x252   :  { %v886_v58 = vmul.f32 1.442695, %v860_v38  ;;  %v386_v3 = vmul.f32 1.442695, %v355_v34  ;;  %v980_v23 = vmul.f32 %v3011_v59, %v3733_v27 }
 0x253   :  { %v487_v63 = vpack.c.bf16 %v475_v54, %v474_v42 }
 0x254   :  { %3014 = vpow2.f32 %v886_v58 }
 0x255   :  { %523 = vmatmul.bf16.gmra.mxu1 %v487_v63  ;;  %3016 = vpow2.f32 %v386_v3 }
 0x256   :  { %v841_v22 = vpop.xlane.xlu1 %840 }
 0x257   :  { %v3013_v17 = vpop.eup %3012  ;;  %v861_v26 = vsub.f32 %v3768_v28, %v841_v22  ;;  %v923_v9 = vpop.xlane.xlu2 %922 }
 0x258   :  { %v981_v48 = vmul.f32 %v3013_v17, %v3752_v2  ;;  %v950_v21 = vmax.f32 %v923_v9, 1e-20 }
 0x259   :  { %v888_v57 = vmul.f32 1.442695, %v861_v26 }
 0x25a   :  { %v995_v46 = vpack.c.bf16 %v981_v48, %v980_v23  ;;  %v3015_v6 = vpop.eup %3014 }
 0x25b   :  { %3018 = vpow2.f32 %v888_v57  ;;  %v3886_v31 = vsel %vm3624_vm12, %v3015_v6, 0.0  ;;  %v3017_v45 = vpop.eup %3016 }
 0x25c   :  { %1023 = vmatmul.bf16.gmra.mxu3 %v995_v46  ;;  %934 = vadd.xlane.f32.xlu2 %v3886_v31  ;;  %3020 = vrcp.f32 %v950_v21  ;;  %v3898_v7 = vsel %vm3742_vm15, %v3017_v45, 0.0 }
 0x25e   :  { %v925_v30 = vpop.xlane.xlu0 %924  ;;  %v337_v28 = vpop.xlane.xlu1 %336 }
 0x25f   :  { %v951_v15 = vmax.f32 %v925_v30, 1e-20  ;;  %v354_v27 = vsub.f32 %v3794_v24, %v337_v28  ;;  %v843_v2 = vpop.xlane.xlu2 %842 }
 0x260   :  { %v862_v36 = vsub.f32 %v3786_v41, %v843_v2 }
 0x261   :  { %v3019_v49 = vpop.eup %3018  ;;  %3022 = vrcp.f32 %v951_v15  ;;  %v384_v43 = vmul.f32 1.442695, %v354_v27 }
 0x262   :  { %v890_v47 = vmul.f32 1.442695, %v862_v36  ;;  %v3893_v25 = vsel %vm3604_vm11, %v3019_v49, 0.0  ;;  %v3021_v24 = vpop.eup %3020 }
 0x263   :  { %3024 = vpow2.f32 %v384_v43  ;;  %936 = vadd.xlane.f32.xlu0 %v3893_v25  ;;  %v982_v58 = vmul.f32 %v3021_v24, %v3773_v60 }
 0x264   :  { %3026 = vpow2.f32 %v890_v47  ;;  %434 = vadd.xlane.f32.xlu2 %v3898_v7 }
 0x266   :  { %v421_v41 = vpop.xlane.xlu0 %420  ;;  %v423_v38 = vpop.xlane.xlu1 %422 }
 0x267   :  { %v3023_v42 = vpop.eup %3022  ;;  %v444_v54 = vmax.f32 %v421_v41, 1e-20  ;;  %v445_v34 = vmax.f32 %v423_v38, 1e-20 }
 0x268   :  { %v983_v63 = vmul.f32 %v3023_v42, %v3790_v16 }
 0x269   :  { %v3025_v59 = vpop.eup %3024  ;;  %3028 = vrcp.f32 %v444_v54 }
 0x26a   :  { %v3027_v3 = vpop.eup %3026  ;;  %v3905_v22 = vsel %vm3780_vm0, %v3025_v59, 0.0  ;;  %v996_v17 = vpack.c.bf16 %v983_v63, %v982_v58  ;;  %3030 = vrcp.f32 %v445_v34 }
 0x26b   :  { %432 = vadd.xlane.f32.xlu1 %v3905_v22  ;;  %v3910_v26 = vsel %vm3709_vm14, %v3027_v3, 0.0 }
 0x26c   :  { %1028 = vmatmul.bf16.gmra.mxu3 %v996_v17  ;;  %938 = vadd.xlane.f32.xlu0 %v3910_v26 }
 0x26e   :  { %v929_v60 = vpop.xlane.xlu2 %928  ;;  %v927_v16 = vpop.xlane.xlu1 %926 }
 0x26f   :  { %v953_v9 = vmax.f32 %v929_v60, 1e-20  ;;  %v845_v23 = vpop.xlane.xlu0 %844  ;;  %v952_v48 = vmax.f32 %v927_v16, 1e-20  ;;  %v3029_v57 = vpop.eup %3028 }
 0x270   :  { %v863_v46 = vsub.f32 %v3830_v5, %v845_v23  ;;  %v3031_v6 = vpop.eup %3030  ;;  %v476_v21 = vmul.f32 %v3029_v57, %v3812_v0 }
 0x271   :  { %3032 = vrcp.f32 %v953_v9  ;;  %v477_v28 = vmul.f32 %v3031_v6, %v3808_v40 }
 0x272   :  { %v892_v30 = vmul.f32 1.442695, %v863_v46  ;;  %3034 = vrcp.f32 %v952_v48 }
 0x273   :  { %v488_v15 = vpack.c.bf16 %v477_v28, %v476_v21  ;;  %v3330_v28 = vld [vmem:[%s4770_s1 + $0x18] sm:$0xff] }
 0x274   :  { %3036 = vpow2.f32 %v892_v30  ;;  %v3329_v30 = vld [vmem:[%s4770_s1 + $0x20] sm:$0xff] }
 0x275   :  { %528 = vmatmul.bf16.gmra.mxu1 %v488_v15  ;;  %v3331_v15 = vld [vmem:[%s4770_s1 + $0x10] sm:$0xff] }
 0x276   :  { %v847_v27 = vpop.xlane.xlu2 %846  ;;  %v427_v2 = vpop.xlane.xlu1 %426 }
 0x277   :  { %v864_v45 = vsub.f32 %v3836_v32, %v847_v27  ;;  %v425_v36 = vpop.xlane.xlu0 %424  ;;  %v3033_v49 = vpop.eup %3032  ;;  %v447_v47 = vmax.f32 %v427_v2, 1e-20  ;;  %v3332_v27 = vld [vmem:[%s4770_s1 + $0x8] sm:$0xff] }
 0x278   :  { %v446_v43 = vmax.f32 %v425_v36, 1e-20  ;;  %v3035_v5 = vpop.eup %3034  ;;  %v985_v0 = vmul.f32 %v3033_v49, %v3820_v8 }
 0x279   :  { %v894_v24 = vmul.f32 1.442695, %v864_v45  ;;  %v984_v40 = vmul.f32 %v3035_v5, %v3824_v51  ;;  %v3333_v45 = vld [vmem:[%s4770_s1] sm:$0xff]  ;;  %v3335_v5 = vld [vmem:[%s4771_s2 + $0x8] sm:$0xff] }
 0x27a   :  { %v3037_v41 = vpop.eup %3036  ;;  %3038 = vrcp.f32 %v446_v43 }
 0x27b   :  { %3040 = vpow2.f32 %v894_v24  ;;  %v3921_v38 = vsel %vm3672_vm13, %v3037_v41, 0.0  ;;  %v997_v32 = vpack.c.bf16 %v985_v0, %v984_v40 }
 0x27c   :  { %3042 = vrcp.f32 %v447_v47  ;;  %940 = vadd.xlane.f32.xlu1 %v3921_v38  ;;  %v3334_v47 = vld [vmem:[%s4771_s2] sm:$0xff] }
 0x27d   :  { %1033 = vmatmul.bf16.gmra.mxu3 %v997_v32 }
 0x27e   :  { %v933_v42 = vpop.xlane.xlu2 %932  ;;  %v931_v54 = vpop.xlane.xlu1 %930 }
 0x27f   :  { %v955_v34 = vmax.f32 %v933_v42, 1e-20  ;;  %v849_v58 = vpop.xlane.xlu0 %848  ;;  %v954_v63 = vmax.f32 %v931_v54, 1e-20  ;;  %v3336_v42 = vld [vmem:[%s4771_s2 + $0x10] sm:$0xff] }
 0x280   :  { %v3039_v8 = vpop.eup %3038  ;;  %v865_v59 = vsub.f32 %v3860_v12, %v849_v58 }
 0x281   :  { %v3041_v3 = vpop.eup %3040  ;;  %v478_v51 = vmul.f32 %v3039_v8, %v3845_v35  ;;  %3044 = vrcp.f32 %v955_v34 }
 0x282   :  { %v3043_v17 = vpop.eup %3042  ;;  %v896_v60 = vmul.f32 1.442695, %v865_v59  ;;  %v3928_v16 = vsel %vm3780_vm0, %v3041_v3, 0.0  ;;  %3046 = vrcp.f32 %v954_v63  ;;  %v3338_v63 = vld [vmem:[%s4771_s2 + $0x20] sm:$0xff]  ;;  %v2838_v59 = vld [vmem:[%s4773_s3 + $0x18] sm:$0xff] }
 0x283   :  { %942 = vadd.xlane.f32.xlu2 %v3928_v16  ;;  %v479_v9 = vmul.f32 %v3043_v17, %v3840_v33  ;;  %v3326_v33 = vld [vmem:[%s4770_s1 + $0x38] sm:$0xff]  ;;  %1209 = vmatpush.bf16.msrb.mxu1 %v2838_v59 }
 0x284   :  { %3048 = vpow2.f32 %v896_v60  ;;  %v2837_v60 = vld [vmem:[%s4773_s3 + $0x10] sm:$0xff] }
 0x285   :  { %v489_v23 = vpack.c.bf16 %v479_v9, %v478_v51 }
 0x286   :  { %v431_v2 = vpop.xlane.xlu1 %430 }
 0x287   :  { %533 = vmatmul.bf16.gmra.mxu1 %v489_v23  ;;  %v3045_v48 = vpop.eup %3044  ;;  %v449_v36 = vmax.f32 %v431_v2, 1e-20  ;;  %v3339_v23 = vld [vmem:[%s4771_s2 + $0x28] sm:$0xff] }
 0x288   :  { %v3047_v12 = vpop.eup %3046  ;;  %v987_v57 = vmul.f32 %v3045_v48, %v3851_v14  ;;  %v3327_v14 = vld [vmem:[%s4770_s1 + $0x30] sm:$0xff]  ;;  %1210 = vmatpush.bf16.msrb.mxu1 %v2837_v60 }
 0x289   :  { %v986_v46 = vmul.f32 %v3047_v12, %v3855_v61  ;;  %v3328_v61 = vld [vmem:[%s4770_s1 + $0x28] sm:$0xff]  ;;  %3050 = vrcp.f32 %v449_v36 }
 0x28a   :  { %v3049_v35 = vpop.eup %3048 }
 0x28b   :  { %v3936_v6 = vsel %vm3742_vm15, %v3049_v35, 0.0  ;;  %v998_v21 = vpack.c.bf16 %v987_v57, %v986_v46 }
 0x28c   :  { %944 = vadd.xlane.f32.xlu0 %v3936_v6 }
 0x28d   :  { %1038 = vmatmul.bf16.gmra.mxu3 %v998_v21 }
 0x28f   :  { %v3051_v24 = vpop.eup %3050 }
 0x290   :  { %v481_v40 = vmul.f32 %v3051_v24, %v3866_v55  ;;  %v3337_v55 = vld [vmem:[%s4771_s2 + $0x18] sm:$0xff]  ;;  %v2835_v24 = vld [vmem:[%s4773_s3] sm:$0xff] }
 0x295   :  { %1978 = vrot.lane.b32.xlu1 %v3326_v33, %s3343_s13 }
 0x29b   :  { %1367 = vrot.lane.b32.xlu2 %v3326_v33, %s3344_s14 }
 0x29d   :  { %1365 = vrot.lane.b32.xlu1 %v3327_v14, %s3344_s14 }
 0x2a0   :  { %1976 = vrot.lane.b32.xlu0 %v3327_v14, %s3343_s13 }
 0x2a3   :  { %1363 = vrot.lane.b32.xlu2 %v3328_v61, %s3344_s14 }
 0x2a5   :  { %1972 = vrot.lane.b32.xlu1 %v3329_v30, %s3343_s13 }
 0x2a8   :  { %1974 = vrot.lane.b32.xlu0 %v3328_v61, %s3343_s13 }
 0x2ab   :  { %1970 = vrot.lane.b32.xlu2 %v3330_v28, %s3343_s13 }
 0x2ad   :  { %1359 = vrot.lane.b32.xlu1 %v3330_v28, %s3344_s14  ;;  %v4033_v28 = vpop.f32.mrf.mxu1 }
 0x2ae   :  { %vm549_vm12 = vcmp.gt.f32.partialorder %v4033_v28, 0.0 }
 0x2b0   :  { %1361 = vrot.lane.b32.xlu0 %v3329_v30, %s3344_s14  ;;  %v3340_v30 = vld [vmem:[%s4771_s2 + $0x30] sm:$0xff] }
 0x2b3   :  { %1357 = vrot.lane.b32.xlu2 %v3331_v15, %s3344_s14 }
 0x2b5   :  { %1966 = vrot.lane.b32.xlu1 %v3332_v27, %s3343_s13 }
 0x2b8   :  { %1968 = vrot.lane.b32.xlu0 %v3331_v15, %s3343_s13 }
 0x2bb   :  { %1964 = vrot.lane.b32.xlu2 %v3333_v45, %s3343_s13 }
 0x2bd   :  { %1353 = vrot.lane.b32.xlu1 %v3333_v45, %s3344_s14 }
 0x2bf   :  { %v429_v49 = vpop.xlane.xlu0 %428 }
 0x2c0   :  { %v448_v43 = vmax.f32 %v429_v49, 1e-20  ;;  %1355 = vrot.lane.b32.xlu0 %v3332_v27, %s3344_s14 }
 0x2c2   :  { %3052 = vrcp.f32 %v448_v43 }
 0x2c3   :  { %1337 = vrot.lane.b32.xlu2 %v3334_v47, %s3344_s14 }
 0x2c5   :  { %1950 = vrot.lane.b32.xlu1 %v3335_v5, %s3343_s13 }
 0x2c8   :  { %v3053_v0 = vpop.eup %3052  ;;  %1948 = vrot.lane.b32.xlu0 %v3334_v47, %s3343_s13  ;;  %v3994_v54 = vpop.f32.mrf.mxu3 }
 0x2c9   :  { %v480_v41 = vmul.f32 %v3053_v0, %v3874_v1  ;;  %v2836_v1 = vld [vmem:[%s4773_s3 + $0x8] sm:$0xff]  ;;  %v1075_v15 = vmin.f32 %v3994_v54, 0.0  ;;  %vm1059_vm15 = vcmp.gt.f32.partialorder %v3994_v54, 0.0 }
 0x2ca   :  { %1294 = vmatpush.bf16.msrb.mxu3 %v2836_v1 }
 0x2cb   :  { %v490_v32 = vpack.c.bf16 %v481_v40, %v480_v41  ;;  %1952 = vrot.lane.b32.xlu2 %v3336_v42, %s3343_s13  ;;  %v1091_v36 = vmul.f32 1.442695, %v1075_v15  ;;  %v4048_v41 = vpop.f32.mrf.mxu1 }
 0x2cd   :  { %538 = vmatmul.bf16.gmra.mxu1 %v490_v32  ;;  %1341 = vrot.lane.b32.xlu1 %v3336_v42, %s3344_s14 }
 0x2ce   :  { %1295 = vmatpush.bf16.msrb.mxu3 %v2835_v24 }
 0x2cf   :  { %v935_v34 = vpop.xlane.xlu2 %934 }
 0x2d0   :  { %1339 = vrot.lane.b32.xlu0 %v3335_v5, %s3344_s14  ;;  %v956_v58 = vmax.f32 %v935_v34, 1e-20  ;;  %v4012_v3 = vpop.f32.mrf.mxu3 }
 0x2d1   :  { %v1076_v14 = vmin.f32 %v4012_v3, 0.0  ;;  %vm1060_vm0 = vcmp.gt.f32.partialorder %v4012_v3, 0.0 }
 0x2d2   :  { %3054 = vrcp.f32 %v956_v58 }
 0x2d3   :  { %1343 = vrot.lane.b32.xlu2 %v3337_v55, %s3344_s14 }
 0x2d5   :  { %1956 = vrot.lane.b32.xlu1 %v3338_v63, %s3343_s13 }
 0x2d6   :  { %v937_v8 = vpop.xlane.xlu0 %936 }
 0x2d7   :  { %v957_v51 = vmax.f32 %v937_v8, 1e-20  ;;  %v435_v17 = vpop.xlane.xlu2 %434 }
 0x2d8   :  { %1954 = vrot.lane.b32.xlu0 %v3337_v55, %s3343_s13  ;;  %v451_v9 = vmax.f32 %v435_v17, 1e-20  ;;  %v3055_v48 = vpop.eup %3054 }
 0x2d9   :  { %3056 = vrcp.f32 %v957_v51  ;;  %v988_v21 = vmul.f32 %v3055_v48, %v3886_v31  ;;  %v3341_v31 = vld [vmem:[%s4771_s2 + $0x38] sm:$0xff] }
 0x2da   :  { %3058 = vrcp.f32 %v451_v9  ;;  %v4059_v9 = vpop.f32.mrf.mxu1 }
 0x2db   :  { %1958 = vrot.lane.b32.xlu2 %v3339_v23, %s3343_s13 }
 0x2dd   :  { %1347 = vrot.lane.b32.xlu1 %v3339_v23, %s3344_s14 }
 0x2de   :  { %v433_v12 = vpop.xlane.xlu1 %432 }
 0x2df   :  { %v3057_v57 = vpop.eup %3056  ;;  %v450_v35 = vmax.f32 %v433_v12, 1e-20  ;;  %v4023_v46 = vpop.f32.mrf.mxu3 }
 0x2e0   :  { %1345 = vrot.lane.b32.xlu0 %v3338_v63, %s3344_s14  ;;  %v989_v33 = vmul.f32 %v3057_v57, %v3893_v25  ;;  %v3059_v27 = vpop.eup %3058  ;;  %v1093_v25 = vmul.f32 1.442695, %v1076_v14  ;;  %v939_v47 = vpop.xlane.xlu0 %938  ;;  %v1077_v55 = vmin.f32 %v4023_v46, 0.0 }
 0x2e1   :  { %3060 = vrcp.f32 %v450_v35  ;;  %v483_v43 = vmul.f32 %v3059_v27, %v3898_v7  ;;  %v958_v0 = vmax.f32 %v939_v47, 1e-20 }
 0x2e2   :  { %v999_v61 = vpack.c.bf16 %v989_v33, %v988_v21  ;;  %3062 = vpow2.f32 %v1093_v25  ;;  %v1095_v23 = vmul.f32 1.442695, %v1077_v55  ;;  %v4069_v15 = vpop.f32.mrf.mxu1 }
 0x2e3   :  { %1349 = vrot.lane.b32.xlu2 %v3340_v30, %s3344_s14  ;;  %3064 = vpow2.f32 %v1091_v36  ;;  %v565_v36 = vmin.f32 %v4033_v28, 0.0 }
 0x2e4   :  { %1043 = vmatmul.bf16.gmra.mxu3 %v999_v61  ;;  %3066 = vrcp.f32 %v958_v0 }
 0x2e5   :  { %1962 = vrot.lane.b32.xlu1 %v3341_v31, %s3343_s13 }
 0x2e7   :  { %v3061_v2 = vpop.eup %3060  ;;  %v4040_v45 = vpop.f32.mrf.mxu3 }
 0x2e8   :  { %v482_v49 = vmul.f32 %v3061_v2, %v3905_v22  ;;  %1960 = vrot.lane.b32.xlu0 %v3340_v30, %s3343_s13  ;;  %v3063_v22 = vpop.eup %3062  ;;  %v1078_v34 = vmin.f32 %v4040_v45, 0.0 }
 0x2e9   :  { %v3065_v42 = vpop.eup %3064  ;;  %v2692_v1 = vadd.f32 -1.0, %v3063_v22 }
 0x2ea   :  { %v491_v5 = vpack.c.bf16 %v483_v43, %v482_v49  ;;  %v2691_v58 = vadd.f32 -1.0, %v3065_v42  ;;  %v3067_v63 = vpop.eup %3066  ;;  %v1097_v8 = vmul.f32 1.442695, %v1078_v34  ;;  %v581_v42 = vmul.f32 1.442695, %v565_v36 }
 0x2eb   :  { %v1140_v51 = vsel %vm1060_vm0, %v4012_v3, %v2692_v1  ;;  %v990_v12 = vmul.f32 %v3067_v63, %v3910_v26  ;;  %vm4820_vm0 = vcmask 261120  }
 0x2ec   :  { %543 = vmatmul.bf16.gmra.mxu1 %v491_v5  ;;  %v1139_v48 = vsel %vm1059_vm15, %v3994_v54, %v2691_v58  ;;  %vm4821_vm13 = vmmov %vm4820_vm0  ;;  %vm1061_vm15 = vcmp.gt.f32.partialorder %v4023_v46, 0.0 }
 0x2ed   :  { %v1155_v35 = vpack.c.bf16 %v1140_v51, %v1139_v48 }
 0x2ef   :  { %v941_v40 = vpop.xlane.xlu1 %940  ;;  %v4050_v32 = vpop.f32.mrf.mxu3 }
 0x2f0   :  { %v959_v7 = vmax.f32 %v941_v40, 1e-20  ;;  %1351 = vrot.lane.b32.xlu0 %v3341_v31, %s3344_s14  ;;  %v566_v31 = vmin.f32 %v4048_v41, 0.0  ;;  %v1079_v2 = vmin.f32 %v4050_v32, 0.0  ;;  %vm1063_vm14 = vcmp.gt.f32.partialorder %v4050_v32, 0.0 }
 0x2f2   :  { %3068 = vrcp.f32 %v959_v7  ;;  %v583_v5 = vmul.f32 1.442695, %v566_v31  ;;  %v1099_v22 = vmul.f32 1.442695, %v1079_v2 }
 0x2f3   :  { %3070 = vpow2.f32 %v1097_v8  ;;  %v4087_v8 = vpop.f32.mrf.mxu1 }
 0x2f4   :  { %3072 = vpow2.f32 %v1095_v23 }
 0x2f6   :  { %v943_v59 = vpop.xlane.xlu2 %942 }
 0x2f7   :  { %v4057_v17 = vpop.f32.mrf.mxu3  ;;  %v960_v33 = vmax.f32 %v943_v59, 1e-20 }
 0x2f8   :  { %v3069_v60 = vpop.eup %3068  ;;  %v1080_v27 = vmin.f32 %v4057_v17, 0.0 }
 0x2f9   :  { %v991_v57 = vmul.f32 %v3069_v60, %v3921_v38  ;;  %v3071_v30 = vpop.eup %3070  ;;  %3074 = vrcp.f32 %v960_v33 }
 0x2fa   :  { %v3073_v38 = vpop.eup %3072  ;;  %v2694_v25 = vadd.f32 -1.0, %v3071_v30  ;;  %v1101_v47 = vmul.f32 1.442695, %v1080_v27 }
 0x2fb   :  { %v1000_v21 = vpack.c.bf16 %v991_v57, %v990_v12  ;;  %v2693_v49 = vadd.f32 -1.0, %v3073_v38  ;;  %v568_v57 = vmin.f32 %v4069_v15, 0.0  ;;  %v4101_v38 = vpop.f32.mrf.mxu1 }
 0x2fc   :  { %2715 = vmatmul.msk.bf16.vlgmr.msrb.gmra.mxu1 %vm4820_vm0, %v1155_v35 }
 0x2fd   :  { %1048 = vmatmul.bf16.gmra.mxu3 %v1000_v21  ;;  %v1141_v34 = vsel %vm1061_vm15, %v4023_v46, %v2693_v49  ;;  %vm4823_vm15 = vmmov %vm4820_vm0 }
 0x2fe   :  { %v1368_v3 = vpop.permute.xlu2 %1367 }
 0x2ff   :  { %v945_v14 = vpop.xlane.xlu0 %944  ;;  %1690 = vmatpush.bf16.msrb.mxu2 %v1368_v3  ;;  %v1415_v61 = vsel %vm4821_vm13, %v1368_v3, 0  ;;  %v3075_v43 = vpop.eup %3074  ;;  %vm1062_vm13 = vcmp.gt.f32.partialorder %v4040_v45, 0.0 }
 0x300   :  { %v961_v54 = vmax.f32 %v945_v14, 1e-20  ;;  %1417 = vmatpush.bf16.xpose.msrb.mxu0 %v1415_v61  ;;  %2929 = vmatpush.bf16.xpose.msra.mxu1 %v1415_v61  ;;  %v4067_v26 = vpop.f32.mrf.mxu3  ;;  %v1142_v0 = vsel %vm1062_vm13, %v4040_v45, %v2694_v25  ;;  %v992_v1 = vmul.f32 %v3075_v43, %v3928_v16  ;;  %vm4822_vm13 = vmmov %vm4820_vm0  ;;  %v567_v14 = vmin.f32 %v4059_v9, 0.0 }
 0x301   :  { %v1156_v58 = vpack.c.bf16 %v1142_v0, %v1141_v34  ;;  %v1081_v3 = vmin.f32 %v4067_v26, 0.0  ;;  %v587_v25 = vmul.f32 1.442695, %v568_v57 }
 0x302   :  { %3076 = vrcp.f32 %v961_v54 }
 0x303   :  { %3078 = vpow2.f32 %v1101_v47  ;;  %v1103_v49 = vmul.f32 1.442695, %v1081_v3  ;;  %v585_v47 = vmul.f32 1.442695, %v567_v14 }
 0x304   :  { %3080 = vpow2.f32 %v583_v5 }
 0x305   :  { %3082 = vpow2.f32 %v1099_v22 }
 0x306   :  { %3084 = vpow2.f32 %v581_v42 }
 0x307   :  { %v4076_v24 = vpop.permute.xlu1 %1978 }
 0x308   :  { %v3077_v40 = vpop.eup %3076  ;;  %v2026_v7 = vsel %vm4820_vm0, %v4076_v24, 0  ;;  %v4085_v63 = vpop.f32.mrf.mxu3 }
 0x309   :  { %2028 = vmatpush.bf16.xpose.msra.mxu3 %v2026_v7  ;;  %v993_v55 = vmul.f32 %v3077_v40, %v3936_v6  ;;  %v3079_v46 = vpop.eup %3078  ;;  %v1364_v6 = vpop.permute.xlu2 %1363  ;;  %v1082_v23 = vmin.f32 %v4085_v63, 0.0 }
 0x30a   :  { %v3081_v51 = vpop.eup %3080  ;;  %v2696_v35 = vadd.f32 -1.0, %v3079_v46 }
 0x30b   :  { %v1001_v45 = vpack.c.bf16 %v993_v55, %v992_v1  ;;  %v3083_v60 = vpop.eup %3082  ;;  %v2668_v33 = vadd.f32 -1.0, %v3081_v51  ;;  %v1105_v27 = vmul.f32 1.442695, %v1082_v23 }
 0x30c   :  { %2716 = vmatmul.msk.bf16.gmra.mxu1 %vm4822_vm13, %v1156_v58  ;;  %v3085_v12 = vpop.eup %3084  ;;  %v2695_v61 = vadd.f32 -1.0, %v3083_v60  ;;  %vm1064_vm13 = vcmp.gt.f32.partialorder %v4057_v17, 0.0 }
 0x30d   :  { %1053 = vmatmul.bf16.gmra.mxu3 %v1001_v45  ;;  %v2667_v54 = vadd.f32 -1.0, %v3085_v12  ;;  %v1144_v2 = vsel %vm1064_vm13, %v4057_v17, %v2696_v35  ;;  %3086 = vpow2.f32 %v1105_v27  ;;  %v569_v12 = vmin.f32 %v4087_v8, 0.0 }
 0x30e   :  { %v1143_v5 = vsel %vm1063_vm14, %v4050_v32, %v2695_v61  ;;  %3088 = vpow2.f32 %v587_v25  ;;  %v4120_v32 = vpop.f32.mrf.mxu1 }
 0x30f   :  { %v1366_v59 = vpop.permute.xlu1 %1365  ;;  %v629_v0 = vsel %vm549_vm12, %v4033_v28, %v2667_v54  ;;  %v1157_v17 = vpack.c.bf16 %v1144_v2, %v1143_v5  ;;  %3090 = vpow2.f32 %v1103_v49 }
 0x310   :  { %1691 = vmatpush.bf16.msrb.mxu2 %v1366_v59  ;;  %v1412_v16 = vsel %vm4823_vm15, %v1366_v59, 0  ;;  %v4099_v30 = vpop.f32.mrf.mxu3  ;;  %vm4824_vm15 = vmmov %vm4820_vm0  ;;  %3092 = vpow2.f32 %v585_v47 }
 0x311   :  { %1418 = vmatpush.bf16.xpose.msrb.mxu0 %v1412_v16  ;;  %2930 = vmatpush.bf16.xpose.msra.mxu1 %v1412_v16  ;;  %v1409_v31 = vsel %vm4824_vm15, %v1364_v6, 0  ;;  %vm4825_vm13 = vmmov %vm4824_vm15  ;;  %v4122_v7 = vpop.permute.xlu2 %1970  ;;  %v570_v16 = vmin.f32 %v4101_v38, 0.0  ;;  %v1083_v23 = vmin.f32 %v4099_v30, 0.0 }
 0x312   :  { %v4092_v48 = vpop.permute.xlu0 %1976  ;;  %vm4826_vm15 = vmmov %vm4825_vm13 }
 0x313   :  { %v2023_v21 = vsel %vm4820_vm0, %v4092_v48, 0  ;;  %vm550_vm0 = vcmp.gt.f32.partialorder %v4048_v41, 0.0  ;;  %v3087_v42 = vpop.eup %3086  ;;  %v1107_v61 = vmul.f32 1.442695, %v1083_v23 }
 0x314   :  { %1692 = vmatpush.bf16.msrb.mxu2 %v1364_v6  ;;  %2029 = vmatpush.bf16.xpose.msra.mxu3 %v2023_v21  ;;  %v630_v36 = vsel %vm550_vm0, %v4048_v41, %v2668_v33  ;;  %vm4827_vm0 = vmmov %vm4825_vm13  ;;  %v3089_v34 = vpop.eup %3088  ;;  %v2698_v51 = vadd.f32 -1.0, %v3087_v42  ;;  %v591_v33 = vmul.f32 1.442695, %v570_v16 }
 0x315   :  { %v645_v22 = vpack.c.bf16 %v630_v36, %v629_v0  ;;  %v3091_v1 = vpop.eup %3090  ;;  %vm4828_vm12 = vmmov %vm4827_vm0  ;;  %v2670_v60 = vadd.f32 -1.0, %v3089_v34 }
 0x316   :  { %v3093_v46 = vpop.eup %3092  ;;  %vm4829_vm14 = vmmov %vm4827_vm0  ;;  %v2697_v57 = vadd.f32 -1.0, %v3091_v1  ;;  %v4136_v14 = vpop.f32.mrf.mxu1 }
 0x317   :  { %v4109_v43 = vpop.permute.xlu1 %1972  ;;  %v2669_v35 = vadd.f32 -1.0, %v3093_v46  ;;  %v572_v34 = vmin.f32 %v4136_v14, 0.0 }
 0x318   :  { %v4124_v28 = vpop.f32.mrf.mxu3  ;;  %v2017_v59 = vsel %vm4828_vm12, %v4109_v43, 0  ;;  %vm551_vm12 = vcmp.gt.f32.partialorder %v4059_v9, 0.0 }
 0x319   :  { %1419 = vmatpush.bf16.xpose.msrb.mxu0 %v1409_v31  ;;  %2931 = vmatpush.bf16.xpose.msra.mxu1 %v1409_v31  ;;  %v1084_v55 = vmin.f32 %v4124_v28, 0.0  ;;  %v1358_v27 = vpop.permute.xlu2 %1357  ;;  %v589_v31 = vmul.f32 1.442695, %v569_v12  ;;  %v631_v36 = vsel %vm551_vm12, %v4059_v9, %v2669_v35 }
 0x31a   :  { %v4114_v40 = vpop.permute.xlu0 %1974 }
 0x31b   :  { %v2020_v41 = vsel %vm4825_vm13, %v4114_v40, 0  ;;  %vm1066_vm13 = vcmp.gt.f32.partialorder %v4085_v63, 0.0  ;;  %v1109_v21 = vmul.f32 1.442695, %v1084_v55 }
 0x31c   :  { %2717 = vmatmul.msk.bf16.gmra.mxu1 %vm4826_vm15, %v1157_v17  ;;  %2030 = vmatpush.bf16.xpose.msra.mxu3 %v2020_v41  ;;  %vm552_vm15 = vcmp.gt.f32.partialorder %v4069_v15, 0.0  ;;  %v1146_v3 = vsel %vm1066_vm13, %v4085_v63, %v2698_v51  ;;  %vm4830_vm13 = vmmov %vm4829_vm14  ;;  %v595_v51 = vmul.f32 1.442695, %v572_v34 }
 0x31d   :  { %2731 = vmatmul.msk.bf16.vlgmr.msrb.gmra.mxu3 %vm4827_vm0, %v645_v22  ;;  %vm1065_vm0 = vcmp.gt.f32.partialorder %v4067_v26, 0.0  ;;  %v632_v54 = vsel %vm552_vm15, %v4069_v15, %v2670_v60  ;;  %3094 = vpow2.f32 %v1109_v21  ;;  %v2014_v15 = vsel %vm4830_vm13, %v4122_v7, 0  ;;  %vm4831_vm15 = vmmov %vm4830_vm13 }
 0x31e   :  { %v1145_v25 = vsel %vm1065_vm0, %v4067_v26, %v2697_v57  ;;  %3096 = vpow2.f32 %v591_v33  ;;  %v646_v5 = vpack.c.bf16 %v632_v54, %v631_v36  ;;  %vm4832_vm0 = vmmov %vm4830_vm13  ;;  %v4152_v26 = vpop.f32.mrf.mxu1  ;;  %vm1068_vm13 = vcmp.gt.f32.partialorder %v4124_v28, 0.0 }
 0x31f   :  { %v1360_v45 = vpop.permute.xlu1 %1359  ;;  %v1158_v63 = vpack.c.bf16 %v1146_v3, %v1145_v25  ;;  %3098 = vpow2.f32 %v1107_v61  ;;  %vm4833_vm12 = vmmov %vm4832_vm0 }
 0x320   :  { %v1403_v2 = vsel %vm4829_vm14, %v1360_v45, 0  ;;  %3100 = vpow2.f32 %v589_v31  ;;  %v1400_v17 = vsel %vm4833_vm12, %v1358_v27, 0  ;;  %vm553_vm12 = vcmp.gt.f32.partialorder %v4087_v8, 0.0 }
 0x321   :  { %3102 = vpow2.f32 %v595_v51 }
 0x322   :  { %v1362_v58 = vpop.permute.xlu0 %1361 }
 0x323   :  { %v1406_v6 = vsel %vm4829_vm14, %v1362_v58, 0  ;;  %1693 = vmatpush.bf16.msrb.mxu2 %v1362_v58  ;;  %v3095_v9 = vpop.eup %3094  ;;  %vm4834_vm14 = vmmov %vm4832_vm0 }
 0x324   :  { %1420 = vmatpush.bf16.xpose.msrb.mxu0 %v1406_v6  ;;  %2932 = vmatpush.bf16.xpose.msra.mxu1 %v1406_v6  ;;  %v3097_v0 = vpop.eup %3096  ;;  %v2700_v1 = vadd.f32 -1.0, %v3095_v9 }
 0x325   :  { %2031 = vmatpush.bf16.xpose.msra.mxu3 %v2017_v59  ;;  %v3099_v22 = vpop.eup %3098  ;;  %v2672_v58 = vadd.f32 -1.0, %v3097_v0  ;;  %v571_v59 = vmin.f32 %v4120_v32, 0.0 }
 0x326   :  { %v3101_v42 = vpop.eup %3100  ;;  %v2699_v46 = vadd.f32 -1.0, %v3099_v22  ;;  %v1148_v6 = vsel %vm1068_vm13, %v4124_v28, %v2700_v1  ;;  %v531_v21 = vpop.f32.mrf.mxu1  ;;  %vm4835_vm13 = vmmov %vm4834_vm14 }
 0x327   :  { %1694 = vmatpush.bf16.msrb.mxu2 %v1360_v45  ;;  %v4146_v47 = vpop.permute.xlu1 %1966  ;;  %v2671_v16 = vadd.f32 -1.0, %v3101_v42  ;;  %v593_v23 = vmul.f32 1.442695, %v571_v59  ;;  %vm4836_vm11 = vmmov %vm4835_vm13  ;;  %v574_v54 = vmin.f32 %v531_v21, 0.0 }
 0x328   :  { %v2008_v28 = vsel %vm4835_vm13, %v4146_v47, 0 }
 0x329   :  { %v633_v35 = vsel %vm553_vm12, %v4087_v8, %v2671_v16  ;;  %3104 = vpow2.f32 %v593_v23 }
 0x32a   :  { %v4144_v49 = vpop.permute.xlu0 %1968 }
 0x32b   :  { %1695 = vmatpush.bf16.msrb.mxu2 %v1358_v27  ;;  %v2011_v55 = vsel %vm4834_vm14, %v4144_v49, 0 }
 0x32c   :  { %1421 = vmatpush.bf16.xpose.msrb.mxu0 %v1403_v2  ;;  %2718 = vmatmul.msk.bf16.gmra.mxu1 %vm4831_vm15, %v1158_v63  ;;  %vm554_vm15 = vcmp.gt.f32.partialorder %v4101_v38, 0.0  ;;  %v599_v63 = vmul.f32 1.442695, %v574_v54 }
 0x32d   :  { %2732 = vmatmul.msk.bf16.gmra.mxu3 %vm4832_vm0, %v646_v5  ;;  %2933 = vmatpush.bf16.xpose.msra.mxu1 %v1403_v2  ;;  %vm1067_vm0 = vcmp.gt.f32.partialorder %v4099_v30, 0.0  ;;  %v634_v60 = vsel %vm554_vm15, %v4101_v38, %v2672_v58  ;;  %vm4837_vm15 = vmmov %vm4836_vm11  ;;  %v1965_v38 = vpop.permute.xlu2 %1964  ;;  %v573_v2 = vmin.f32 %v4152_v26, 0.0 }
 0x32e   :  { %2032 = vmatpush.bf16.xpose.msra.mxu3 %v2014_v15  ;;  %v1147_v12 = vsel %vm1067_vm0, %v4099_v30, %v2699_v46  ;;  %v647_v3 = vpack.c.bf16 %v634_v60, %v633_v35  ;;  %v3103_v30 = vpop.eup %3102  ;;  %vm4838_vm0 = vmmov %vm4836_vm11  ;;  %v4174_v25 = vpop.f32.mrf.mxu1  ;;  %3106 = vpow2.f32 %v599_v63 }
 0x32f   :  { %v1354_v45 = vpop.permute.xlu1 %1353  ;;  %v1159_v33 = vpack.c.bf16 %v1148_v6, %v1147_v12  ;;  %v3105_v8 = vpop.eup %3104  ;;  %vm4839_vm12 = vmmov %vm4838_vm0  ;;  %v2674_v31 = vadd.f32 -1.0, %v3103_v30  ;;  %v597_v9 = vmul.f32 1.442695, %v573_v2 }
 0x330   :  { %v1394_v61 = vsel %vm4838_vm0, %v1354_v45, 0  ;;  %v2005_v27 = vsel %vm4839_vm12, %v1965_v38, 0  ;;  %v2673_v36 = vadd.f32 -1.0, %v3105_v8  ;;  %vm4840_vm13 = vmmov %vm4838_vm0  ;;  %vm557_vm12 = vcmp.gt.f32.partialorder %v4152_v26, 0.0 }
 0x331   :  { %3108 = vpow2.f32 %v597_v9 }
 0x332   :  { %v1356_v41 = vpop.permute.xlu0 %1355 }
 0x333   :  { %1696 = vmatpush.bf16.msrb.mxu2 %v1356_v41  ;;  %v1397_v57 = vsel %vm4834_vm14, %v1356_v41, 0  ;;  %vm555_vm14 = vcmp.gt.f32.partialorder %v4120_v32, 0.0 }
 0x334   :  { %1422 = vmatpush.bf16.xpose.msrb.mxu0 %v1400_v17  ;;  %v635_v0 = vsel %vm555_vm14, %v4120_v32, %v2673_v36  ;;  %v575_v32 = vmin.f32 %v4174_v25, 0.0 }
 0x335   :  { %2934 = vmatpush.bf16.xpose.msra.mxu1 %v1400_v17  ;;  %v1338_v5 = vpop.permute.xlu2 %1337 }
 0x336   :  { %2033 = vmatpush.bf16.xpose.msra.mxu3 %v2011_v55  ;;  %v536_v17 = vpop.f32.mrf.mxu1 }
 0x337   :  { %1697 = vmatpush.bf16.msrb.mxu2 %v1354_v45  ;;  %v576_v42 = vmin.f32 %v536_v17, 0.0 }
 0x339   :  { %v603_v55 = vmul.f32 1.442695, %v576_v42 }
 0x33a   :  { %v4186_v22 = vpop.permute.xlu0 %1948 }
 0x33b   :  { %3110 = vpow2.f32 %v603_v55 }
 0x33c   :  { %1423 = vmatpush.bf16.xpose.msrb.mxu0 %v1397_v57  ;;  %2719 = vmatmul.msk.bf16.gmra.mxu1 %vm4836_vm11, %v1159_v33  ;;  %vm556_vm11 = vcmp.gt.f32.partialorder %v4136_v14, 0.0 }
 0x33d   :  { %2733 = vmatmul.msk.bf16.gmra.mxu3 %vm4837_vm15, %v647_v3  ;;  %2935 = vmatpush.bf16.xpose.msra.mxu1 %v1397_v57  ;;  %v636_v15 = vsel %vm556_vm11, %v4136_v14, %v2674_v31  ;;  %vm4841_vm15 = vmmov %vm4838_vm0  ;;  %v3107_v14 = vpop.eup %3106  ;;  %vm558_vm0 = vcmp.gt.f32.partialorder %v531_v21, 0.0  ;;  %v4203_v30 = vpop.permute.xlu2 %1952 }
 0x33e   :  { %2034 = vmatpush.bf16.xpose.msra.mxu3 %v2008_v28  ;;  %v3109_v41 = vpop.eup %3108  ;;  %vm4842_vm11 = vmmov %vm4840_vm13 }
 0x33f   :  { %v2675_v34 = vadd.f32 -1.0, %v3109_v41  ;;  %vm4843_vm14 = vmmov %vm4842_vm11 }
 0x341   :  { %v3111_v16 = vpop.eup %3110 }
 0x342   :  { %v1340_v45 = vpop.permute.xlu0 %1339  ;;  %v2678_v60 = vadd.f32 -1.0, %v3111_v16 }
 0x344   :  { %1424 = vmatpush.bf16.xpose.msrb.mxu0 %v1394_v61 }
 0x345   :  { %2936 = vmatpush.bf16.xpose.msra.mxu1 %v1394_v61 }
 0x346   :  { %2035 = vmatpush.bf16.xpose.msra.mxu3 %v2005_v27 }
 0x34a   :  { %v539_v1 = vpop.f32.mrf.mxu1 }
 0x34b   :  { %2739 = vmatmul.msk.bf16.vlgmr.msrb.gmra.mxu0 %vm4840_vm13, %v1338_v5  ;;  %vm560_vm13 = vcmp.gt.f32.partialorder %v536_v17, 0.0 }
 0x34c   :  { %2301 = vmatpush.bf16.msra.mxu0 %v4076_v24  ;;  %v648_v24 = vpack.c.bf16 %v636_v15, %v635_v0  ;;  %v640_v12 = vsel %vm560_vm13, %v536_v17, %v2678_v60 }
 0x34e   :  { %2734 = vmatmul.msk.bf16.gmra.mxu3 %vm4841_vm15, %v648_v24  ;;  %vm559_vm15 = vcmp.gt.f32.partialorder %v4174_v25, 0.0  ;;  %v1344_v24 = vpop.permute.xlu2 %1343 }
 0x350   :  { %2302 = vmatpush.bf16.msra.mxu0 %v4092_v48  ;;  %v2676_v48 = vadd.f32 -1.0, %v3107_v14 }
 0x352   :  { %v638_v58 = vsel %vm558_vm0, %v531_v21, %v2676_v48  ;;  %v541_v46 = vpop.f32.mrf.mxu1  ;;  %vm4844_vm0 = vmmov %vm4842_vm11 }
 0x353   :  { %v578_v6 = vmin.f32 %v541_v46, 0.0  ;;  %vm4846_vm13 = vmmov %vm4844_vm0 }
 0x354   :  { %2303 = vmatpush.bf16.msra.mxu0 %v4114_v40  ;;  %v601_v40 = vmul.f32 1.442695, %v575_v32 }
 0x356   :  { %3112 = vpow2.f32 %v601_v40 }
 0x358   :  { %2304 = vmatpush.bf16.msra.mxu0 %v4109_v43  ;;  %v637_v43 = vsel %vm557_vm12, %v4152_v26, %v2675_v34  ;;  %v607_v26 = vmul.f32 1.442695, %v578_v6  ;;  %vm4845_vm12 = vmmov %vm4844_vm0 }
 0x359   :  { %v649_v59 = vpack.c.bf16 %v638_v58, %v637_v43 }
 0x35a   :  { %3114 = vpow2.f32 %v607_v26 }
 0x35b   :  { %2740 = vmatmul.msk.bf16.gmra.mxu0 %vm4842_vm11, %v1340_v45  ;;  %vm562_vm11 = vcmp.gt.f32.partialorder %v541_v46, 0.0 }
 0x35c   :  { %2305 = vmatpush.bf16.msra.mxu0 %v4122_v7  ;;  %v4197_v7 = vpop.permute.xlu1 %1950  ;;  %v3113_v51 = vpop.eup %3112 }
 0x35d   :  { %v2677_v23 = vadd.f32 -1.0, %v3113_v51 }
 0x35e   :  { %2735 = vmatmul.msk.bf16.gmra.mxu3 %vm4843_vm14, %v649_v59  ;;  %vm561_vm14 = vcmp.gt.f32.partialorder %v539_v1, 0.0 }
 0x35f   :  { %v639_v3 = vsel %vm559_vm15, %v4174_v25, %v2677_v23 }
 0x360   :  { %2306 = vmatpush.bf16.msra.mxu0 %v4144_v49  ;;  %v577_v49 = vmin.f32 %v539_v1, 0.0  ;;  %v650_v28 = vpack.c.bf16 %v640_v12, %v639_v3  ;;  %v3115_v8 = vpop.eup %3114 }
 0x361   :  { %v2680_v63 = vadd.f32 -1.0, %v3115_v8 }
 0x362   :  { %v605_v21 = vmul.f32 1.442695, %v577_v49 }
 0x363   :  { %v642_v0 = vsel %vm562_vm11, %v541_v46, %v2680_v63  ;;  %vm4847_vm11 = vmmov %vm4845_vm12 }
 0x364   :  { %2307 = vmatpush.bf16.msra.mxu0 %v4146_v47  ;;  %v1342_v35 = vpop.permute.xlu1 %1341  ;;  %3116 = vpow2.f32 %v605_v21 }
 0x367   :  { %v1044_v57 = vpop.f32.mrf.mxu3 }
 0x368   :  { %2308 = vmatpush.bf16.msra.mxu0 %v1965_v38  ;;  %v1085_v33 = vmin.f32 %v1044_v57, 0.0  ;;  %vm1069_vm15 = vcmp.gt.f32.partialorder %v1044_v57, 0.0 }
 0x369   :  { %v544_v47 = vpop.f32.mrf.mxu1 }
 0x36a   :  { %v1111_v38 = vmul.f32 1.442695, %v1085_v33  ;;  %v3117_v31 = vpop.eup %3116  ;;  %v579_v25 = vmin.f32 %v544_v47, 0.0  ;;  %v1955_v33 = vpop.permute.xlu0 %1954 }
 0x36b   :  { %2741 = vmatmul.msk.bf16.gmra.mxu0 %vm4844_vm0, %v1342_v35  ;;  %v2679_v5 = vadd.f32 -1.0, %v3117_v31 }
 0x36c   :  { %3118 = vpow2.f32 %v1111_v38  ;;  %v609_v17 = vmul.f32 1.442695, %v579_v25 }
 0x36d   :  { %v641_v14 = vsel %vm561_vm14, %v539_v1, %v2679_v5 }
 0x36e   :  { %2736 = vmatmul.msk.bf16.gmra.mxu3 %vm4845_vm12, %v650_v28  ;;  %v651_v48 = vpack.c.bf16 %v642_v0, %v641_v14 }
 0x36f   :  { %v1046_v61 = vpop.f32.mrf.mxu3 }
 0x370   :  { %v1086_v54 = vmin.f32 %v1046_v61, 0.0  ;;  %vm1070_vm0 = vcmp.gt.f32.partialorder %v1046_v61, 0.0 }
 0x371   :  { %v546_v27 = vpop.f32.mrf.mxu1 }
 0x372   :  { %v1113_v2 = vmul.f32 1.442695, %v1086_v54  ;;  %v580_v36 = vmin.f32 %v546_v27, 0.0  ;;  %v3119_v15 = vpop.eup %3118  ;;  %vm564_vm14 = vcmp.gt.f32.partialorder %v546_v27, 0.0 }
 0x373   :  { %v2701_v41 = vadd.f32 -1.0, %v3119_v15 }
 0x374   :  { %3120 = vpow2.f32 %v1113_v2  ;;  %v611_v9 = vmul.f32 1.442695, %v580_v36  ;;  %v1346_v36 = vpop.permute.xlu0 %1345 }
 0x375   :  { %v1149_v34 = vsel %vm1069_vm15, %v1044_v57, %v2701_v41  ;;  %vm4848_vm15 = vmmov %vm4847_vm11 }
 0x376   :  { %3122 = vpow2.f32 %v611_v9 }
 0x377   :  { %3124 = vpow2.f32 %v609_v17 }
 0x379   :  { %v1212_v57 = vpop.f32.mrf.mxu1 }
 0x37a   :  { %v3121_v42 = vpop.eup %3120 }
 0x37b   :  { %2742 = vmatmul.msk.bf16.gmra.mxu0 %vm4846_vm13, %v1344_v24  ;;  %v2702_v32 = vadd.f32 -1.0, %v3121_v42  ;;  %vm563_vm13 = vcmp.gt.f32.partialorder %v544_v47, 0.0 }
 0x37c   :  { %v3123_v40 = vpop.eup %3122 }
 0x37d   :  { %v1150_v55 = vsel %vm1070_vm0, %v1046_v61, %v2702_v32  ;;  %v3125_v1 = vpop.eup %3124  ;;  %v2682_v59 = vadd.f32 -1.0, %v3123_v40 }
 0x37e   :  { %2737 = vmatmul.msk.bf16.gmra.mxu3 %vm4845_vm12, %v651_v48  ;;  %v1160_v58 = vpack.c.bf16 %v1150_v55, %v1149_v34  ;;  %v2681_v16 = vadd.f32 -1.0, %v3125_v1 }
 0x37f   :  { %v644_v51 = vsel %vm564_vm14, %v546_v27, %v2682_v59  ;;  %vm4849_vm14 = vmmov %vm4847_vm11 }
 0x380   :  { %v1049_v45 = vpop.f32.mrf.mxu3  ;;  %2720 = vmatmul.msk.bf16.gmra.mxu1 %vm4847_vm11, %v1160_v58  ;;  %v643_v49 = vsel %vm563_vm13, %v544_v47, %v2681_v16  ;;  %vm4850_vm13 = vmmov %vm4847_vm11  ;;  %v1957_v16 = vpop.permute.xlu1 %1956 }
 0x381   :  { %v1087_v43 = vmin.f32 %v1049_v45, 0.0  ;;  %v652_v23 = vpack.c.bf16 %v644_v51, %v643_v49  ;;  %vm1071_vm0 = vcmp.gt.f32.partialorder %v1049_v45, 0.0  ;;  %v4209_v31 = vpop.f32.mrf.mxu1 }
 0x383   :  { %v1115_v46 = vmul.f32 1.442695, %v1087_v43 }
 0x385   :  { %3126 = vpow2.f32 %v1115_v46 }
 0x388   :  { %v1051_v6 = vpop.f32.mrf.mxu3 }
 0x389   :  { %v1088_v60 = vmin.f32 %v1051_v6, 0.0  ;;  %vm1072_vm12 = vcmp.gt.f32.partialorder %v1051_v6, 0.0  ;;  %v1217_v24 = vpop.f32.mrf.mxu1 }
 0x38b   :  { %v1117_v26 = vmul.f32 1.442695, %v1088_v60  ;;  %v3127_v12 = vpop.eup %3126  ;;  %2743 = vmatmul.msk.bf16.gmra.mxu0 %vm4849_vm14, %v1346_v36  ;;  %vm4852_vm14 = vmmov %vm4847_vm11 }
 0x38c   :  { %v2703_v3 = vadd.f32 -1.0, %v3127_v12 }
 0x38d   :  { %3128 = vpow2.f32 %v1117_v26 }
 0x38e   :  { %2738 = vmatmul.msk.bf16.gmra.mxu3 %vm4848_vm15, %v652_v23  ;;  %v1151_v8 = vsel %vm1071_vm0, %v1049_v45, %v2703_v3  ;;  %v1348_v23 = vpop.permute.xlu1 %1347 }
 0x390   :  { %v1054_v35 = vpop.f32.mrf.mxu3 }
 0x391   :  { %v1089_v21 = vmin.f32 %v1054_v35, 0.0  ;;  %vm1073_vm15 = vcmp.gt.f32.partialorder %v1054_v35, 0.0  ;;  %v4220_v32 = vpop.f32.mrf.mxu1 }
 0x393   :  { %v3129_v28 = vpop.eup %3128  ;;  %v1119_v61 = vmul.f32 1.442695, %v1089_v21 }
 0x394   :  { %v2704_v38 = vadd.f32 -1.0, %v3129_v28  ;;  %v1959_v28 = vpop.permute.xlu2 %1958 }
 0x395   :  { %3130 = vpow2.f32 %v1119_v61 }
 0x396   :  { %v1152_v54 = vsel %vm1072_vm12, %v1051_v6, %v2704_v38  ;;  %vm4851_vm12 = vmmov %vm4847_vm11 }
 0x397   :  { %v1161_v27 = vpack.c.bf16 %v1152_v54, %v1151_v8 }
 0x398   :  { %v1056_v47 = vpop.f32.mrf.mxu3 }
 0x399   :  { %v1090_v2 = vmin.f32 %v1056_v47, 0.0  ;;  %2721 = vmatmul.msk.bf16.gmra.mxu1 %vm4847_vm11, %v1161_v27  ;;  %vm1074_vm0 = vcmp.gt.f32.partialorder %v1056_v47, 0.0  ;;  %v1222_v55 = vpop.f32.mrf.mxu1 }
 0x39b   :  { %v1121_v63 = vmul.f32 1.442695, %v1090_v2  ;;  %v3131_v25 = vpop.eup %3130 }
 0x39c   :  { %v2705_v9 = vadd.f32 -1.0, %v3131_v25 }
 0x39d   :  { %3132 = vpow2.f32 %v1121_v63 }
 0x39e   :  { %2779 = vmatmul.msk.bf16.vlgmr.msra.gmra.mxu3 %vm4850_vm13, %v4186_v22  ;;  %v1153_v14 = vsel %vm1073_vm15, %v1054_v35, %v2705_v9  ;;  %vm4855_vm13 = vmmov %vm4847_vm11 }
 0x39f   :  { %vm4857_vm15 = vmmov %vm4847_vm11 }
 0x3a0   :  { %v1297_v5 = vpop.f32.mrf.mxu3  ;;  %2744 = vmatmul.msk.bf16.gmra.mxu0 %vm4857_vm15, %v1348_v23 }
 0x3a1   :  { %v4215_v15 = vadd.f32 %v1297_v5, %v1212_v57  ;;  %v4230_v40 = vpop.f32.mrf.mxu1 }
 0x3a3   :  { %v3133_v0 = vpop.eup %3132 }
 0x3a4   :  { %v2706_v17 = vadd.f32 -1.0, %v3133_v0 }
 0x3a6   :  { %v1154_v41 = vsel %vm1074_vm0, %v1056_v47, %v2706_v17  ;;  %vm4860_vm0 = vmmov %vm4847_vm11  ;;  %v1350_v47 = vpop.permute.xlu2 %1349 }
 0x3a7   :  { %v1162_v42 = vpack.c.bf16 %v1154_v41, %v1153_v14  ;;  %v1961_v14 = vpop.permute.xlu0 %1960  ;;  %vm4874_vm15 = vmmov %vm4860_vm0 }
 0x3a8   :  { %v4217_v48 = vpop.f32.mrf.mxu3 }
 0x3a9   :  { %2722 = vmatmul.msk.bf16.gmra.mxu1 %vm4851_vm12, %v1162_v42  ;;  %vm4863_vm12 = vmmov %vm4860_vm0 }
 0x3ae   :  { %2780 = vmatmul.msk.bf16.gmra.mxu3 %vm4847_vm11, %v4197_v7  ;;  %v1227_v7 = vpop.f32.mrf.mxu1  ;;  %vm4864_vm11 = vmmov %vm4860_vm0 }
 0x3b0   :  { %v1302_v22 = vpop.f32.mrf.mxu3  ;;  %2745 = vmatmul.msk.bf16.gmra.mxu0 %vm4863_vm12, %v1350_v47 }
 0x3b1   :  { %v4224_v34 = vadd.f32 %v1302_v22, %v1217_v24 }
 0x3b6   :  { %v4250_v12 = vpop.f32.mrf.mxu1 }
 0x3b7   :  { %4858 = vst [vmem:[#allocation5_spill] sm:$0xff] %v4250_v12 }
 0x3b8   :  { %v4226_v58 = vpop.f32.mrf.mxu3 }
 0x3be   :  { %2781 = vmatmul.msk.bf16.gmra.mxu3 %vm4852_vm14, %v4203_v30  ;;  %v1232_v3 = vpop.f32.mrf.mxu1  ;;  %vm4866_vm14 = vmmov %vm4860_vm0 }
 0x3c0   :  { %v1307_v45 = vpop.f32.mrf.mxu3 }
 0x3c1   :  { %v4232_v43 = vadd.f32 %v1307_v45, %v1222_v55 }
 0x3c3   :  { %4853 = vst [vmem:[#allocation2_spill] sm:$0xff] %v4232_v43 }
 0x3c6   :  { %v4276_v0 = vpop.f32.mrf.mxu1 }
 0x3c7   :  { %4865 = vst [vmem:[#allocation9_spill] sm:$0xff] %v4276_v0 }
 0x3c8   :  { %v4234_v1 = vpop.f32.mrf.mxu3  ;;  %v1426_v59 = vpop.f32.mrf.mxu0 }
 0x3c9   :  { %4854 = vst [vmem:[#allocation3_spill] sm:$0xff] %v4234_v1  ;;  %v1466_v46 = vmul.f32 0.17677669, %v1426_v59 }
 0x3cb   :  { %v4238_v51 = vsel %vm3462_vm1, %v1466_v46, -1e+30 }
 0x3cc   :  { %1498 = vmax.xlane.f32.xlu2 %v4238_v51 }
 0x3ce   :  { %2782 = vmatmul.msk.bf16.gmra.mxu3 %vm4855_vm13, %v1955_v33  ;;  %vm4869_vm13 = vmmov %vm4860_vm0 }
 0x3d0   :  { %v1428_v6 = vpop.f32.mrf.mxu0 }
 0x3d1   :  { %v1312_v30 = vpop.f32.mrf.mxu3  ;;  %v1467_v49 = vmul.f32 0.17677669, %v1428_v6 }
 0x3d2   :  { %v4242_v60 = vadd.f32 %v1312_v30, %v1227_v7  ;;  %v1963_v30 = vpop.permute.xlu1 %1962 }
 0x3d3   :  { %v4247_v26 = vsel %vm3469_vm2, %v1467_v49, -1e+30 }
 0x3d4   :  { %4856 = vst [vmem:[#allocation4_spill] sm:$0xff] %v4242_v60  ;;  %1500 = vmax.xlane.f32.xlu1 %v4247_v26 }
 0x3d8   :  { %v1431_v35 = vpop.f32.mrf.mxu0 }
 0x3d9   :  { %v4252_v57 = vpop.f32.mrf.mxu3  ;;  %v1468_v21 = vmul.f32 0.17677669, %v1431_v35 }
 0x3da   :  { %4859 = vst [vmem:[#allocation6_spill] sm:$0xff] %v4252_v57 }
 0x3db   :  { %v4256_v33 = vsel %vm3481_vm3, %v1468_v21, -1e+30 }
 0x3dc   :  { %1502 = vmax.xlane.f32.xlu1 %v4256_v33 }
 0x3de   :  { %2783 = vmatmul.msk.bf16.gmra.mxu3 %vm4860_vm0, %v1957_v16  ;;  %vm4875_vm0 = vnez %v4809_v19 }
 0x3e0   :  { %v1433_v61 = vpop.f32.mrf.mxu0 }
 0x3e1   :  { %v1317_v38 = vpop.f32.mrf.mxu3  ;;  %v1469_v54 = vmul.f32 0.17677669, %v1433_v61 }
 0x3e2   :  { %v4260_v8 = vadd.f32 %v1317_v38, %v1232_v3 }
 0x3e3   :  { %v4264_v27 = vsel %vm3491_vm4, %v1469_v54, -1e+30 }
 0x3e4   :  { %4861 = vst [vmem:[#allocation7_spill] sm:$0xff] %v4260_v8  ;;  %1504 = vmax.xlane.f32.xlu0 %v4264_v27 }
 0x3e8   :  { %v1436_v36 = vpop.f32.mrf.mxu0 }
 0x3e9   :  { %v4267_v2 = vpop.f32.mrf.mxu3  ;;  %v1470_v54 = vmul.f32 0.17677669, %v1436_v36 }
 0x3ea   :  { %4862 = vst [vmem:[#allocation8_spill] sm:$0xff] %v4267_v2 }
 0x3ee   :  { %2784 = vmatmul.msk.bf16.gmra.mxu3 %vm4864_vm11, %v1959_v28 }
 0x3f0   :  { %v1438_v25 = vpop.f32.mrf.mxu0 }
 0x3f1   :  { %v1322_v63 = vpop.f32.mrf.mxu3  ;;  %v1471_v5 = vmul.f32 0.17677669, %v1438_v25 }
 0x3f3   :  { %v4273_v9 = vsel %vm3513_vm6, %v1471_v5, -1e+30 }
 0x3f4   :  { %1508 = vmax.xlane.f32.xlu2 %v4273_v9 }
 0x3f8   :  { %v1441_v17 = vpop.f32.mrf.mxu0 }
 0x3f9   :  { %v1324_v24 = vpop.f32.mrf.mxu3 }
 0x3fd   :  { %v1237_v41 = vpop.f32.mrf.mxu1 }
 0x3fe   :  { %2785 = vmatmul.msk.bf16.gmra.mxu3 %vm4866_vm14, %v1961_v14  ;;  %v4279_v42 = vadd.f32 %v1322_v63, %v1237_v41  ;;  %v1352_v41 = vpop.permute.xlu0 %1351 }
 0x3ff   :  { %2746 = vmatmul.msk.bf16.vlgmr.msra.gmra.mxu1 %vm4874_vm15, %v1352_v41 }
 0x400   :  { %4867 = vst [vmem:[#allocation10_spill] sm:$0xff] %v4279_v42  ;;  %v1443_v55 = vpop.f32.mrf.mxu0 }
 0x401   :  { %v1327_v22 = vpop.f32.mrf.mxu3  ;;  %v1473_v45 = vmul.f32 0.17677669, %v1443_v55 }
 0x403   :  { %v4283_v59 = vsel %vm3526_vm7, %v1473_v45, -1e+30 }
 0x404   :  { %1512 = vmax.xlane.f32.xlu1 %v4283_v59 }
 0x405   :  { %v1239_v46 = vpop.f32.mrf.mxu1 }
 0x406   :  { %v4286_v16 = vadd.f32 %v1324_v24, %v1239_v46  ;;  %v4304_v24 = vsel %vm3503_vm5, %v1470_v54, -1e+30 }
 0x408   :  { %4868 = vst [vmem:[#allocation11_spill] sm:$0xff] %v4286_v16  ;;  %v1446_v55 = vpop.f32.mrf.mxu0 }
 0x409   :  { %v1329_v7 = vpop.f32.mrf.mxu3 }
 0x40e   :  { %2786 = vmatmul.msk.bf16.gmra.mxu3 %vm4869_vm13, %v1963_v30 }
 0x411   :  { %v1332_v6 = vpop.f32.mrf.mxu3 }
 0x416   :  { %v1242_v49 = vpop.f32.mrf.mxu1 }
 0x417   :  { %v4289_v23 = vadd.f32 %v1327_v22, %v1242_v49  ;;  %v1472_v22 = vmul.f32 0.17677669, %v1441_v17 }
 0x419   :  { %4870 = vst [vmem:[#allocation12_spill] sm:$0xff] %v4289_v23  ;;  %v4291_v35 = vpop.f32.mrf.mxu3  ;;  %v4315_v45 = vsel %vm3546_vm8, %v1472_v22, -1e+30 }
 0x41a   :  { %4871 = vst [vmem:[#allocation13_spill] sm:$0xff] %v4291_v35 }
 0x41e   :  { %v1244_v21 = vpop.f32.mrf.mxu1 }
 0x41f   :  { %v4293_v3 = vadd.f32 %v1329_v7, %v1244_v21 }
 0x421   :  { %4872 = vst [vmem:[#allocation14_spill] sm:$0xff] %v4293_v3  ;;  %v2037_v28 = vpop.f32.mrf.mxu3 }
 0x422   :  { %v2077_v38 = vmul.f32 0.17677669, %v2037_v28 }
 0x424   :  { %v4297_v61 = vsel %vm3462_vm1, %v2077_v38, -1e+30 }
 0x425   :  { %2109 = vmax.xlane.f32.xlu0 %v4297_v61 }
 0x426   :  { %v1247_v47 = vpop.f32.mrf.mxu1 }
 0x427   :  { %v4300_v63 = vadd.f32 %v1332_v6, %v1247_v47  ;;  %v1448_v6 = vpop.f32.mrf.mxu0 }
 0x428   :  { %v1475_v21 = vmul.f32 0.17677669, %v1448_v6 }
 0x429   :  { %4873 = vst [vmem:[#allocation15_spill] sm:$0xff] %v4300_v63  ;;  %v2039_v25 = vpop.f32.mrf.mxu3 }
 0x42a   :  { %v2078_v5 = vmul.f32 0.17677669, %v2039_v25  ;;  %v4331_v47 = vsel %vm3566_vm9, %v1475_v21, -1e+30 }
 0x42c   :  { %v4308_v14 = vsel %vm3469_vm2, %v2078_v5, -1e+30 }
 0x42d   :  { %1506 = vmax.xlane.f32.xlu0 %v4304_v24  ;;  %2111 = vmax.xlane.f32.xlu2 %v4308_v14 }
 0x431   :  { %v2042_v36 = vpop.f32.mrf.mxu3 }
 0x432   :  { %v2079_v46 = vmul.f32 0.17677669, %v2042_v36 }
 0x434   :  { %v4320_v49 = vsel %vm3481_vm3, %v2079_v46, -1e+30 }
 0x435   :  { %1510 = vmax.xlane.f32.xlu2 %v4315_v45 }
 0x439   :  { %v2044_v7 = vpop.f32.mrf.mxu3 }
 0x43a   :  { %v2080_v30 = vmul.f32 0.17677669, %v2044_v7 }
 0x43c   :  { %v4324_v17 = vsel %vm3491_vm4, %v2080_v30, -1e+30 }
 0x43d   :  { %2113 = vmax.xlane.f32.xlu2 %v4320_v49  ;;  %2115 = vmax.xlane.f32.xlu1 %v4324_v17 }
 0x43f   :  { %v1499_v28 = vpop.xlane.xlu2 %1498 }
 0x440   :  { %v1530_v38 = vsub.f32 %v4238_v51, %v1499_v28 }
 0x441   :  { %v2047_v54 = vpop.f32.mrf.mxu3 }
 0x442   :  { %v1546_v25 = vmul.f32 1.442695, %v1530_v38  ;;  %v2081_v51 = vmul.f32 0.17677669, %v2047_v54  ;;  %v1474_v54 = vmul.f32 0.17677669, %v1446_v55 }
 0x444   :  { %3134 = vpow2.f32 %v1546_v25 }
 0x445   :  { %1516 = vmax.xlane.f32.xlu2 %v4331_v47 }
 0x447   :  { %v1501_v5 = vpop.xlane.xlu1 %1500 }
 0x448   :  { %v1531_v41 = vsub.f32 %v4247_v26, %v1501_v5  ;;  %v4343_v26 = vsel %vm3503_vm5, %v2081_v51, -1e+30 }
 0x449   :  { %v2049_v22 = vpop.f32.mrf.mxu3 }
 0x44a   :  { %v3135_v36 = vpop.eup %3134  ;;  %v1548_v46 = vmul.f32 1.442695, %v1531_v41  ;;  %v2082_v55 = vmul.f32 0.17677669, %v2049_v22 }
 0x44b   :  { %v4337_v7 = vsel %vm3462_vm1, %v3135_v36, 0.0  ;;  %v4354_v36 = vsel %vm3570_vm10, %v1474_v54, -1e+30 }
 0x44c   :  { %3136 = vpow2.f32 %v1548_v46  ;;  %1594 = vadd.xlane.f32.xlu1 %v4337_v7  ;;  %v4368_v54 = vsel %vm3513_vm6, %v2082_v55, -1e+30 }
 0x44f   :  { %v1503_v30 = vpop.xlane.xlu1 %1502 }
 0x450   :  { %v1532_v6 = vsub.f32 %v4256_v33, %v1503_v30 }
 0x451   :  { %v2052_v21 = vpop.f32.mrf.mxu3 }
 0x452   :  { %v3137_v28 = vpop.eup %3136  ;;  %v1550_v38 = vmul.f32 1.442695, %v1532_v6 }
 0x453   :  { %v4347_v25 = vsel %vm3469_vm2, %v3137_v28, 0.0 }
 0x454   :  { %3138 = vpow2.f32 %v1550_v38  ;;  %2117 = vmax.xlane.f32.xlu1 %v4343_v26  ;;  %1596 = vadd.xlane.f32.xlu0 %v4347_v25 }
 0x457   :  { %v1505_v5 = vpop.xlane.xlu0 %1504 }
 0x458   :  { %v1533_v33 = vsub.f32 %v4264_v27, %v1505_v5 }
 0x459   :  { %v2054_v41 = vpop.f32.mrf.mxu3 }
 0x45a   :  { %v3139_v46 = vpop.eup %3138  ;;  %v1552_v51 = vmul.f32 1.442695, %v1533_v33  ;;  %v2084_v6 = vmul.f32 0.17677669, %v2054_v41  ;;  %v2083_v33 = vmul.f32 0.17677669, %v2052_v21  ;;  %v1451_v41 = vpop.f32.mrf.mxu0 }
 0x45b   :  { %v4358_v30 = vsel %vm3481_vm3, %v3139_v46, 0.0 }
 0x45c   :  { %3140 = vpow2.f32 %v1552_v51  ;;  %1514 = vmax.xlane.f32.xlu0 %v4354_v36  ;;  %1598 = vadd.xlane.f32.xlu2 %v4358_v30  ;;  %v4374_v5 = vsel %vm3526_vm7, %v2084_v6, -1e+30  ;;  %v4383_v55 = vsel %vm3546_vm8, %v2083_v33, -1e+30 }
 0x461   :  { %v2057_v28 = vpop.f32.mrf.mxu3 }
 0x462   :  { %v3141_v27 = vpop.eup %3140  ;;  %v2085_v22 = vmul.f32 0.17677669, %v2057_v28  ;;  %v1453_v21 = vpop.f32.mrf.mxu0 }
 0x463   :  { %v4364_v38 = vsel %vm3491_vm4, %v3141_v27, 0.0  ;;  %v1477_v28 = vmul.f32 0.17677669, %v1453_v21 }
 0x464   :  { %1600 = vadd.xlane.f32.xlu1 %v4364_v38  ;;  %2119 = vmax.xlane.f32.xlu0 %v4368_v54  ;;  %v4379_v46 = vsel %vm3570_vm10, %v2085_v22, -1e+30 }
 0x465   :  { %2123 = vmax.xlane.f32.xlu2 %v4374_v5  ;;  %v4394_v22 = vsel %vm4875_vm0, %v1477_v28, -1e+30 }
 0x467   :  { %v1509_v33 = vpop.xlane.xlu2 %1508 }
 0x468   :  { %v1535_v21 = vsub.f32 %v4273_v9, %v1509_v33 }
 0x469   :  { %v2059_v51 = vpop.f32.mrf.mxu3 }
 0x46a   :  { %v2086_v6 = vmul.f32 0.17677669, %v2059_v51 }
 0x46c   :  { %2125 = vmax.xlane.f32.xlu1 %v4379_v46  ;;  %2121 = vmax.xlane.f32.xlu0 %v4383_v55  ;;  %v4389_v27 = vsel %vm3566_vm9, %v2086_v6, -1e+30 }
 0x474   :  { %2127 = vmax.xlane.f32.xlu0 %v4389_v27 }
 0x47c   :  { %1520 = vmax.xlane.f32.xlu0 %v4394_v22 }
 0x498   :  { %v2110_v63 = vpop.xlane.xlu0 %2109 }
 0x499   :  { %v2141_v35 = vsub.f32 %v4297_v61, %v2110_v63  ;;  %v4406_v61 = vpop.xlane.xlu1 %1512 }
 0x49a   :  { %v1537_v4 = vsub.f32 %v4283_v59, %v4406_v61 }
 0x49b   :  { %v2157_v3 = vmul.f32 1.442695, %v2141_v35  ;;  %v1556_v35 = vmul.f32 1.442695, %v1535_v21 }
 0x49d   :  { %3142 = vpow2.f32 %v2157_v3  ;;  %v2062_v3 = vpop.f32.mrf.mxu3 }
 0x4a0   :  { %v1507_v51 = vpop.xlane.xlu0 %1506  ;;  %v2112_v23 = vpop.xlane.xlu2 %2111 }
 0x4a1   :  { %v1534_v6 = vsub.f32 %v4304_v24, %v1507_v51  ;;  %v2142_v16 = vsub.f32 %v4308_v14, %v2112_v23  ;;  %v2087_v23 = vmul.f32 0.17677669, %v2062_v3  ;;  %v1476_v51 = vmul.f32 0.17677669, %v1451_v41 }
 0x4a3   :  { %v3143_v42 = vpop.eup %3142  ;;  %v1554_v8 = vmul.f32 1.442695, %v1534_v6  ;;  %v2159_v28 = vmul.f32 1.442695, %v2142_v16 }
 0x4a4   :  { %v4403_v2 = vsel %vm3462_vm1, %v3143_v42, 0.0  ;;  %vm4876_vm1 = vnez %v4811_v29 }
 0x4a5   :  { %3144 = vpow2.f32 %v1554_v8  ;;  %2205 = vadd.xlane.f32.xlu2 %v4403_v2  ;;  %v4416_v44 = vsel %vm4876_vm1, %v2087_v23, -1e+30  ;;  %v1456_v23 = vpop.f32.mrf.mxu0 }
 0x4a6   :  { %3146 = vpow2.f32 %v2159_v28  ;;  %v2064_v28 = vpop.f32.mrf.mxu3 }
 0x4a7   :  { %3148 = vpow2.f32 %v1556_v35 }
 0x4a8   :  { %v4408_v63 = vpop.xlane.xlu2 %1510 }
 0x4a9   :  { %v1536_v0 = vsub.f32 %v4315_v45, %v4408_v63 }
 0x4ab   :  { %v3145_v24 = vpop.eup %3144  ;;  %v1558_v12 = vmul.f32 1.442695, %v1536_v0 }
 0x4ac   :  { %v3147_v9 = vpop.eup %3146  ;;  %v4412_v16 = vsel %vm3503_vm5, %v3145_v24, 0.0  ;;  %v4433_v24 = vsel %vm4876_vm1, %v1476_v51, -1e+30 }
 0x4ad   :  { %v4420_v8 = vsel %vm3469_vm2, %v3147_v9, 0.0  ;;  %1602 = vadd.xlane.f32.xlu0 %v4412_v16  ;;  %2129 = vmax.xlane.f32.xlu2 %v4416_v44  ;;  %v3149_v33 = vpop.eup %3148  ;;  %vm4878_vm2 = vnez %v4815_v20  ;;  %v2840_v20 = vld [vmem:[%s4773_s3 + $0x28] sm:$0xff] }
 0x4ae   :  { %2207 = vadd.xlane.f32.xlu1 %v4420_v8  ;;  %v4429_v50 = vsel %vm3513_vm6, %v3149_v33, 0.0  ;;  %1889 = vmatpush.bf16.msrb.mxu1 %v2840_v20 }
 0x4b0   :  { %v2114_v42 = vpop.xlane.xlu2 %2113  ;;  %v2116_v14 = vpop.xlane.xlu1 %2115 }
 0x4b1   :  { %v2143_v6 = vsub.f32 %v4320_v49, %v2114_v42  ;;  %v2144_v21 = vsub.f32 %v4324_v17, %v2116_v14  ;;  %v2088_v49 = vmul.f32 0.17677669, %v2064_v28  ;;  %v4437_v17 = vpop.f32.mrf.mxu1  ;;  %v2067_v14 = vpop.f32.mrf.mxu3  ;;  %v1478_v28 = vmul.f32 0.17677669, %v1456_v23 }
 0x4b2   :  { %4877 = vst [vmem:[#allocation16_spill] sm:$0xff] %v4437_v17 }
 0x4b3   :  { %v2161_v35 = vmul.f32 1.442695, %v2143_v6  ;;  %v2163_v3 = vmul.f32 1.442695, %v2144_v21  ;;  %v4445_v33 = vsel %vm4875_vm0, %v2088_v49, -1e+30  ;;  %v1458_v21 = vpop.f32.mrf.mxu0 }
 0x4b4   :  { %v2089_v6 = vmul.f32 0.17677669, %v2067_v14 }
 0x4b5   :  { %3150 = vpow2.f32 %v2161_v35  ;;  %1604 = vadd.xlane.f32.xlu2 %v4429_v50  ;;  %v1479_v35 = vmul.f32 0.17677669, %v1458_v21 }
 0x4b6   :  { %3152 = vpow2.f32 %v2163_v3  ;;  %1518 = vmax.xlane.f32.xlu1 %v4433_v24  ;;  %v4456_v3 = vsel %vm4878_vm2, %v2089_v6, -1e+30 }
 0x4b8   :  { %v4471_v14 = vpop.xlane.xlu2 %1516 }
 0x4b9   :  { %v4458_v49 = vpop.f32.mrf.mxu1  ;;  %v2069_v23 = vpop.f32.mrf.mxu3 }
 0x4ba   :  { %v2090_v6 = vmul.f32 0.17677669, %v2069_v23 }
 0x4bb   :  { %v3151_v41 = vpop.eup %3150 }
 0x4bc   :  { %v3153_v9 = vpop.eup %3152  ;;  %v4441_v42 = vsel %vm3481_vm3, %v3151_v41, 0.0  ;;  %vm4879_vm3 = vnez %v4813_v11 }
 0x4bd   :  { %2209 = vadd.xlane.f32.xlu0 %v4441_v42  ;;  %v4450_v51 = vsel %vm3491_vm4, %v3153_v9, 0.0  ;;  %v4462_v62 = vsel %vm4879_vm3, %v1479_v35, -1e+30  ;;  %v4467_v9 = vsel %vm4878_vm2, %v1478_v28, -1e+30  ;;  %vm4880_vm4 = vnez %v4817_v13 }
 0x4be   :  { %2131 = vmax.xlane.f32.xlu1 %v4445_v33  ;;  %2211 = vadd.xlane.f32.xlu2 %v4450_v51  ;;  %v4478_v60 = vsel %vm4879_vm3, %v2090_v6, -1e+30 }
 0x4bf   :  { %v1595_v56 = vpop.xlane.xlu1 %1594 }
 0x4c0   :  { %v1626_v41 = vmax.f32 %v1595_v56, 1e-20 }
 0x4c1   :  { %v1463_v57 = vpop.f32.mrf.mxu1 }
 0x4c2   :  { %3154 = vrcp.f32 %v1626_v41  ;;  %v1481_v43 = vmul.f32 0.17677669, %v1463_v57 }
 0x4c5   :  { %2133 = vmax.xlane.f32.xlu0 %v4456_v3 }
 0x4c6   :  { %1524 = vmax.xlane.f32.xlu1 %v4462_v62  ;;  %1522 = vmax.xlane.f32.xlu2 %v4467_v9 }
 0x4c7   :  { %v1597_v21 = vpop.xlane.xlu0 %1596  ;;  %v2118_v56 = vpop.xlane.xlu1 %2117 }
 0x4c8   :  { %v1627_v17 = vmax.f32 %v1597_v21, 1e-20  ;;  %v2145_v35 = vsub.f32 %v4343_v26, %v2118_v56  ;;  %v3155_v23 = vpop.eup %3154 }
 0x4c9   :  { %v1658_v26 = vmul.f32 %v3155_v23, %v4337_v7 }
 0x4ca   :  { %3156 = vrcp.f32 %v1627_v17  ;;  %v2165_v28 = vmul.f32 1.442695, %v2145_v35  ;;  %v4485_v17 = vsel %vm4880_vm4, %v1481_v43, -1e+30 }
 0x4cc   :  { %3158 = vpow2.f32 %v2165_v28 }
 0x4cd   :  { %3160 = vpow2.f32 %v1558_v12 }
 0x4ce   :  { %2135 = vmax.xlane.f32.xlu2 %v4478_v60 }
 0x4cf   :  { %v1515_v41 = vpop.xlane.xlu0 %1514  ;;  %v1599_v21 = vpop.xlane.xlu2 %1598 }
 0x4d0   :  { %v3157_v1 = vpop.eup %3156  ;;  %v1628_v0 = vmax.f32 %v1599_v21, 1e-20 }
 0x4d1   :  { %v1659_v45 = vmul.f32 %v3157_v1, %v4347_v25 }
 0x4d2   :  { %v3159_v63 = vpop.eup %3158  ;;  %3162 = vrcp.f32 %v1628_v0  ;;  %v1538_v0 = vsub.f32 %v4354_v36, %v1515_v41 }
 0x4d3   :  { %v4489_v6 = vsel %vm3503_vm5, %v3159_v63, 0.0  ;;  %v1674_v56 = vpack.c.bf16 %v1659_v45, %v1658_v26  ;;  %v3161_v1 = vpop.eup %3160  ;;  %vm4881_vm5 = vnez %v4819_v39 }
 0x4d4   :  { %2213 = vadd.xlane.f32.xlu1 %v4489_v6  ;;  %v4499_v21 = vsel %vm3546_vm8, %v3161_v1, 0.0  ;;  %v1539_v1 = vsub.f32 %v4331_v47, %v4471_v14  ;;  %v1562_v36 = vmul.f32 1.442695, %v1538_v0 }
 0x4d5   :  { %1698 = vmatmul.bf16.vlgmr.msrb.gmra.mxu2 %v1674_v56 }
 0x4d6   :  { %1528 = vmax.xlane.f32.xlu2 %v4485_v17 }
 0x4d7   :  { %v2120_v57 = vpop.xlane.xlu0 %2119  ;;  %v1601_v7 = vpop.xlane.xlu1 %1600 }
 0x4d8   :  { %v2146_v12 = vsub.f32 %v4368_v54, %v2120_v57  ;;  %v2124_v25 = vpop.xlane.xlu2 %2123  ;;  %v1629_v43 = vmax.f32 %v1601_v7, 1e-20  ;;  %v3163_v26 = vpop.eup %3162  ;;  %v1560_v54 = vmul.f32 1.442695, %v1537_v4 }
 0x4d9   :  { %v2148_v35 = vsub.f32 %v4374_v5, %v2124_v25  ;;  %v1660_v56 = vmul.f32 %v3163_v26, %v4358_v30 }
 0x4da   :  { %v2167_v28 = vmul.f32 1.442695, %v2146_v12  ;;  %3164 = vrcp.f32 %v1629_v43 }
 0x4db   :  { %v2171_v23 = vmul.f32 1.442695, %v2148_v35 }
 0x4dc   :  { %3166 = vpow2.f32 %v2167_v28  ;;  %1606 = vadd.xlane.f32.xlu1 %v4499_v21 }
 0x4dd   :  { %3168 = vpow2.f32 %v2171_v23  ;;  %v1480_v23 = vmul.f32 0.17677669, %v4458_v49 }
 0x4de   :  { %3170 = vpow2.f32 %v1560_v54 }
 0x4df   :  { %v2122_v45 = vpop.xlane.xlu0 %2121  ;;  %v2126_v18 = vpop.xlane.xlu1 %2125 }
 0x4e0   :  { %v3165_v63 = vpop.eup %3164  ;;  %v2147_v5 = vsub.f32 %v4383_v55, %v2122_v45  ;;  %v2072_v55 = vpop.f32.mrf.mxu3  ;;  %v2149_v37 = vsub.f32 %v4379_v46, %v2126_v18  ;;  %v4538_v45 = vsel %vm4881_vm5, %v1480_v23, -1e+30 }
 0x4e1   :  { %v1661_v59 = vmul.f32 %v3165_v63, %v4364_v38  ;;  %v1564_v38 = vmul.f32 1.442695, %v1539_v1  ;;  %v2091_v14 = vmul.f32 0.17677669, %v2072_v55 }
 0x4e2   :  { %v3167_v61 = vpop.eup %3166  ;;  %v2169_v57 = vmul.f32 1.442695, %v2147_v5  ;;  %v2173_v46 = vmul.f32 1.442695, %v2149_v37 }
 0x4e3   :  { %v3169_v7 = vpop.eup %3168  ;;  %v4510_v12 = vsel %vm3513_vm6, %v3167_v61, 0.0  ;;  %v1675_v25 = vpack.c.bf16 %v1661_v59, %v1660_v56  ;;  %v4531_v28 = vsel %vm4881_vm5, %v2091_v14, -1e+30 }
 0x4e4   :  { %3172 = vpow2.f32 %v2169_v57  ;;  %2215 = vadd.xlane.f32.xlu0 %v4510_v12  ;;  %v4515_v30 = vsel %vm3526_vm7, %v3169_v7, 0.0  ;;  %v3171_v47 = vpop.eup %3170 }
 0x4e5   :  { %2219 = vadd.xlane.f32.xlu1 %v4515_v30  ;;  %1703 = vmatmul.bf16.gmra.mxu2 %v1675_v25  ;;  %3174 = vpow2.f32 %v1562_v36  ;;  %v4521_v35 = vsel %vm3526_vm7, %v3171_v47, 0.0 }
 0x4e6   :  { %3176 = vpow2.f32 %v1564_v38 }
 0x4e7   :  { %v2128_v41 = vpop.xlane.xlu0 %2127 }
 0x4e8   :  { %v2150_v43 = vsub.f32 %v4389_v27, %v2128_v41  ;;  %v2074_v5 = vpop.f32.mrf.mxu3 }
 0x4e9   :  { %v2092_v56 = vmul.f32 0.17677669, %v2074_v5 }
 0x4ea   :  { %v3173_v10 = vpop.eup %3172  ;;  %v2175_v27 = vmul.f32 1.442695, %v2150_v43 }
 0x4eb   :  { %v4525_v4 = vsel %vm3546_vm8, %v3173_v10, 0.0  ;;  %v3175_v26 = vpop.eup %3174  ;;  %v4554_v57 = vsel %vm4880_vm4, %v2092_v56, -1e+30  ;;  %vm4882_vm8 = vmmov %vm4864_vm11 }
 0x4ec   :  { %1608 = vadd.xlane.f32.xlu0 %v4521_v35  ;;  %2217 = vadd.xlane.f32.xlu2 %v4525_v4  ;;  %v3177_v54 = vpop.eup %3176  ;;  %3178 = vpow2.f32 %v2175_v27  ;;  %v4542_v63 = vsel %vm3570_vm10, %v3175_v26, 0.0  ;;  %vm4883_vm12 = vmmov %vm4882_vm8 }
 0x4ed   :  { %2137 = vmax.xlane.f32.xlu1 %v4531_v28  ;;  %v4548_v49 = vsel %vm3566_vm9, %v3177_v54, 0.0  ;;  %3180 = vpow2.f32 %v2173_v46  ;;  %vm4884_vm13 = vmmov %vm4882_vm8 }
 0x4ef   :  { %v1521_v59 = vpop.xlane.xlu0 %1520 }
 0x4f0   :  { %v1541_v0 = vsub.f32 %v4394_v22, %v1521_v59 }
 0x4f2   :  { %v3179_v61 = vpop.eup %3178  ;;  %v1568_v1 = vmul.f32 1.442695, %v1541_v0 }
 0x4f3   :  { %v4558_v7 = vsel %vm3566_vm9, %v3179_v61, 0.0  ;;  %v3181_v25 = vpop.eup %3180 }
 0x4f4   :  { %1526 = vmax.xlane.f32.xlu0 %v4538_v45  ;;  %1610 = vadd.xlane.f32.xlu2 %v4542_v63  ;;  %3182 = vpow2.f32 %v1568_v1  ;;  %v4564_v36 = vsel %vm3570_vm10, %v3181_v25, 0.0 }
 0x4f5   :  { %1612 = vadd.xlane.f32.xlu1 %v4548_v49 }
 0x4fa   :  { %v3183_v22 = vpop.eup %3182 }
 0x4fb   :  { %v4569_v38 = vsel %vm4875_vm0, %v3183_v22, 0.0 }
 0x4fc   :  { %2139 = vmax.xlane.f32.xlu0 %v4554_v57  ;;  %2223 = vadd.xlane.f32.xlu2 %v4558_v7 }
 0x504   :  { %2221 = vadd.xlane.f32.xlu0 %v4564_v36 }
 0x50c   :  { %1616 = vadd.xlane.f32.xlu0 %v4569_v38 }
 0x518   :  { %v2206_v52 = vpop.xlane.xlu2 %2205 }
 0x519   :  { %v2237_v55 = vmax.f32 %v2206_v52, 1e-20 }
 0x51b   :  { %3184 = vrcp.f32 %v2237_v55 }
 0x520   :  { %v2130_v41 = vpop.xlane.xlu2 %2129  ;;  %v1603_v10 = vpop.xlane.xlu0 %1602 }
 0x521   :  { %v2151_v47 = vsub.f32 %v4416_v44, %v2130_v41  ;;  %v2208_v14 = vpop.xlane.xlu1 %2207  ;;  %v1630_v27 = vmax.f32 %v1603_v10, 1e-20  ;;  %v3185_v23 = vpop.eup %3184 }
 0x522   :  { %v2238_v53 = vmax.f32 %v2208_v14, 1e-20  ;;  %v2269_v56 = vmul.f32 %v3185_v23, %v4403_v2 }
 0x523   :  { %v2177_v43 = vmul.f32 1.442695, %v2151_v47 }
 0x524   :  { %3186 = vrcp.f32 %v2238_v53 }
 0x525   :  { %3188 = vpow2.f32 %v2177_v43 }
 0x526   :  { %3190 = vrcp.f32 %v1630_v27 }
 0x528   :  { %v1605_v18 = vpop.xlane.xlu2 %1604 }
 0x529   :  { %v1631_v26 = vmax.f32 %v1605_v18, 1e-20  ;;  %v1519_v54 = vpop.xlane.xlu1 %1518 }
 0x52a   :  { %v3187_v37 = vpop.eup %3186  ;;  %v1540_v5 = vsub.f32 %v4433_v24, %v1519_v54 }
 0x52b   :  { %v3189_v46 = vpop.eup %3188  ;;  %v2270_v44 = vmul.f32 %v3187_v37, %v4420_v8  ;;  %3192 = vrcp.f32 %v1631_v26 }
 0x52c   :  { %v1566_v59 = vmul.f32 1.442695, %v1540_v5  ;;  %v4578_v61 = vsel %vm4876_vm1, %v3189_v46, 0.0  ;;  %v3191_v1 = vpop.eup %3190 }
 0x52d   :  { %v2285_v0 = vpack.c.bf16 %v2270_v44, %v2269_v56  ;;  %2225 = vadd.xlane.f32.xlu2 %v4578_v61  ;;  %v1662_v41 = vmul.f32 %v3191_v1, %v4412_v16 }
 0x52e   :  { %3194 = vpow2.f32 %v1566_v59 }
 0x52f   :  { %2309 = vmatmul.bf16.vlgmr.msra.gmra.mxu0 %v2285_v0 }
 0x530   :  { %v2210_v25 = vpop.xlane.xlu0 %2209 }
 0x531   :  { %v3193_v22 = vpop.eup %3192  ;;  %v2239_v24 = vmax.f32 %v2210_v25, 1e-20  ;;  %v2212_v52 = vpop.xlane.xlu2 %2211 }
 0x532   :  { %v2132_v55 = vpop.xlane.xlu1 %2131  ;;  %v2240_v2 = vmax.f32 %v2212_v52, 1e-20  ;;  %v1663_v47 = vmul.f32 %v3193_v22, %v4429_v50 }
 0x533   :  { %v2152_v8 = vsub.f32 %v4445_v33, %v2132_v55  ;;  %3196 = vrcp.f32 %v2239_v24 }
 0x534   :  { %v3195_v14 = vpop.eup %3194  ;;  %3198 = vrcp.f32 %v2240_v2  ;;  %v1676_v53 = vpack.c.bf16 %v1663_v47, %v1662_v41  ;;  %v2839_v41 = vld [vmem:[%s4773_s3 + $0x20] sm:$0xff] }
 0x535   :  { %v2179_v10 = vmul.f32 1.442695, %v2152_v8  ;;  %v4586_v43 = vsel %vm4876_vm1, %v3195_v14, 0.0  ;;  %1890 = vmatpush.bf16.msrb.mxu1 %v2839_v41 }
 0x536   :  { %1614 = vadd.xlane.f32.xlu1 %v4586_v43  ;;  %1708 = vmatmul.bf16.gmra.mxu2 %v1676_v53 }
 0x537   :  { %3200 = vpow2.f32 %v2179_v10 }
 0x538   :  { %v2134_v27 = vpop.xlane.xlu0 %2133 }
 0x539   :  { %v3197_v23 = vpop.eup %3196  ;;  %v2153_v33 = vsub.f32 %v4456_v3, %v2134_v27  ;;  %v1523_v16 = vpop.xlane.xlu2 %1522 }
 0x53a   :  { %v1525_v18 = vpop.xlane.xlu1 %1524  ;;  %v3199_v50 = vpop.eup %3198  ;;  %v1542_v26 = vsub.f32 %v4467_v9, %v1523_v16  ;;  %v2271_v37 = vmul.f32 %v3197_v23, %v4441_v42 }
 0x53b   :  { %v1543_v54 = vsub.f32 %v4462_v62, %v1525_v18  ;;  %v2181_v29 = vmul.f32 1.442695, %v2153_v33  ;;  %v2272_v5 = vmul.f32 %v3199_v50, %v4450_v51 }
 0x53c   :  { %v1570_v56 = vmul.f32 1.442695, %v1542_v26 }
 0x53d   :  { %v3201_v46 = vpop.eup %3200  ;;  %v1572_v44 = vmul.f32 1.442695, %v1543_v54  ;;  %3202 = vpow2.f32 %v2181_v29  ;;  %v2286_v3 = vpack.c.bf16 %v2272_v5, %v2271_v37 }
 0x53e   :  { %v4596_v59 = vsel %vm4875_vm0, %v3201_v46, 0.0  ;;  %3204 = vpow2.f32 %v1570_v56 }
 0x53f   :  { %2227 = vadd.xlane.f32.xlu1 %v4596_v59  ;;  %3206 = vpow2.f32 %v1572_v44  ;;  %2314 = vmatmul.bf16.gmra.mxu0 %v2286_v3 }
 0x541   :  { %v2136_v62 = vpop.xlane.xlu2 %2135 }
 0x542   :  { %v2154_v42 = vsub.f32 %v4478_v60, %v2136_v62 }
 0x543   :  { %v3203_v9 = vpop.eup %3202 }
 0x544   :  { %v3205_v0 = vpop.eup %3204  ;;  %v2183_v51 = vmul.f32 1.442695, %v2154_v42  ;;  %v4602_v1 = vsel %vm4878_vm2, %v3203_v9, 0.0 }
 0x545   :  { %v3207_v25 = vpop.eup %3206  ;;  %v4606_v19 = vsel %vm4878_vm2, %v3205_v0, 0.0 }
 0x546   :  { %3208 = vpow2.f32 %v2183_v51  ;;  %1618 = vadd.xlane.f32.xlu0 %v4606_v19  ;;  %v4612_v60 = vsel %vm4879_vm3, %v3207_v25, 0.0 }
 0x547   :  { %2229 = vadd.xlane.f32.xlu1 %v4602_v1  ;;  %1620 = vadd.xlane.f32.xlu2 %v4612_v60  ;;  %v2214_v22 = vpop.xlane.xlu1 %2213 }
 0x548   :  { %v2241_v14 = vmax.f32 %v2214_v22, 1e-20 }
 0x549   :  { %v1529_v24 = vpop.xlane.xlu2 %1528 }
 0x54a   :  { %v1545_v52 = vsub.f32 %v4485_v17, %v1529_v24 }
 0x54c   :  { %v3209_v55 = vpop.eup %3208  ;;  %v1576_v2 = vmul.f32 1.442695, %v1545_v52 }
 0x54d   :  { %v4621_v8 = vsel %vm4879_vm3, %v3209_v55, 0.0  ;;  %vm4885_vm3 = vmmov %vm4882_vm8 }
 0x54e   :  { %3210 = vpow2.f32 %v1576_v2  ;;  %2231 = vadd.xlane.f32.xlu0 %v4621_v8 }
 0x54f   :  { %v1607_v47 = vpop.xlane.xlu1 %1606  ;;  %3212 = vrcp.f32 %v2241_v14 }
 0x550   :  { %v1632_v16 = vmax.f32 %v1607_v47, 1e-20 }
 0x554   :  { %v3211_v17 = vpop.eup %3210 }
 0x555   :  { %v4629_v10 = vsel %vm4880_vm4, %v3211_v17, 0.0  ;;  %v3213_v18 = vpop.eup %3212 }
 0x556   :  { %1624 = vadd.xlane.f32.xlu1 %v4629_v10  ;;  %v2273_v44 = vmul.f32 %v3213_v18, %v4489_v6 }
 0x557   :  { %v2216_v11 = vpop.xlane.xlu0 %2215 }
 0x558   :  { %v2242_v53 = vmax.f32 %v2216_v11, 1e-20  ;;  %v2220_v27 = vpop.xlane.xlu1 %2219  ;;  %v1699_v23 = vpop.f32.mrf.mxu2 }
 0x559   :  { %v1755_v33 = vmin.f32 %v1699_v23, 0.0  ;;  %v2244_v25 = vmax.f32 %v2220_v27, 1e-20  ;;  %vm1739_vm6 = vcmp.gt.f32.partialorder %v1699_v23, 0.0 }
 0x55a   :  { %3214 = vrcp.f32 %v2242_v53 }
 0x55b   :  { %v1771_v50 = vmul.f32 1.442695, %v1755_v33  ;;  %3216 = vrcp.f32 %v1632_v16 }
 0x55d   :  { %3218 = vpow2.f32 %v1771_v50 }
 0x55f   :  { %v1609_v26 = vpop.xlane.xlu0 %1608  ;;  %v2218_v54 = vpop.xlane.xlu2 %2217 }
 0x560   :  { %v3215_v37 = vpop.eup %3214  ;;  %v1633_v29 = vmax.f32 %v1609_v26, 1e-20  ;;  %v2243_v5 = vmax.f32 %v2218_v54, 1e-20  ;;  %v2138_v46 = vpop.xlane.xlu1 %2137 }
 0x561   :  { %v1701_v56 = vpop.f32.mrf.mxu2  ;;  %v2155_v3 = vsub.f32 %v4531_v28, %v2138_v46  ;;  %v2274_v42 = vmul.f32 %v3215_v37, %v4510_v12  ;;  %v3217_v22 = vpop.eup %3216 }
 0x562   :  { %v1756_v62 = vmin.f32 %v1701_v56, 0.0  ;;  %3220 = vrcp.f32 %v1633_v29  ;;  %v1664_v47 = vmul.f32 %v3217_v22, %v4499_v21  ;;  %vm1740_vm7 = vcmp.gt.f32.partialorder %v1701_v56, 0.0 }
 0x563   :  { %v2185_v9 = vmul.f32 1.442695, %v2155_v3  ;;  %v2287_v51 = vpack.c.bf16 %v2274_v42, %v2273_v44  ;;  %3222 = vrcp.f32 %v2243_v5  ;;  %v3219_v24 = vpop.eup %3218 }
 0x564   :  { %v1773_v0 = vmul.f32 1.442695, %v1756_v62  ;;  %v2747_v33 = vadd.f32 -1.0, %v3219_v24 }
 0x565   :  { %3224 = vpow2.f32 %v2185_v9  ;;  %2319 = vmatmul.bf16.gmra.mxu0 %v2287_v51 }
 0x566   :  { %3226 = vpow2.f32 %v1773_v0 }
 0x567   :  { %v1527_v52 = vpop.xlane.xlu0 %1526  ;;  %v1611_v20 = vpop.xlane.xlu2 %1610  ;;  %3228 = vrcp.f32 %v2244_v25 }
 0x568   :  { %v3221_v6 = vpop.eup %3220  ;;  %v1544_v28 = vsub.f32 %v4538_v45, %v1527_v52  ;;  %v1613_v55 = vpop.xlane.xlu1 %1612  ;;  %v1634_v12 = vmax.f32 %v1611_v20, 1e-20 }
 0x569   :  { %v4636_v2 = vpop.f32.mrf.mxu2  ;;  %v1665_v17 = vmul.f32 %v3221_v6, %v4521_v35  ;;  %v3223_v14 = vpop.eup %3222  ;;  %v1635_v53 = vmax.f32 %v1613_v55, 1e-20  ;;  %v1819_v35 = vsel %vm1739_vm6, %v1699_v23, %v2747_v33 }
 0x56a   :  { %v1757_v41 = vmin.f32 %v4636_v2, 0.0  ;;  %v1574_v11 = vmul.f32 1.442695, %v1544_v28  ;;  %v2275_v29 = vmul.f32 %v3223_v14, %v4525_v4  ;;  %vm1741_vm9 = vcmp.gt.f32.partialorder %v4636_v2, 0.0 }
 0x56b   :  { %v3225_v27 = vpop.eup %3224  ;;  %v1677_v16 = vpack.c.bf16 %v1665_v17, %v1664_v47 }
 0x56c   :  { %v3227_v18 = vpop.eup %3226  ;;  %3230 = vpow2.f32 %v1574_v11  ;;  %v4643_v45 = vsel %vm4881_vm5, %v3225_v27, 0.0  ;;  %v1775_v26 = vmul.f32 1.442695, %v1757_v41 }
 0x56d   :  { %v2748_v50 = vadd.f32 -1.0, %v3227_v18  ;;  %3232 = vrcp.f32 %v1634_v12  ;;  %2233 = vadd.xlane.f32.xlu0 %v4643_v45  ;;  %1713 = vmatmul.bf16.gmra.mxu2 %v1677_v16  ;;  %v3229_v21 = vpop.eup %3228 }
 0x56e   :  { %3234 = vrcp.f32 %v1635_v53  ;;  %v2276_v42 = vmul.f32 %v3229_v21, %v4515_v30 }
 0x56f   :  { %v1820_v54 = vsel %vm1740_vm7, %v1701_v56, %v2748_v50  ;;  %v2140_v37 = vpop.xlane.xlu0 %2139  ;;  %3236 = vpow2.f32 %v1775_v26  ;;  %v2224_v3 = vpop.xlane.xlu2 %2223 }
 0x570   :  { %v1835_v5 = vpack.c.bf16 %v1820_v54, %v1819_v35  ;;  %v2156_v46 = vsub.f32 %v4554_v57, %v2140_v37  ;;  %v2288_v4 = vpack.c.bf16 %v2276_v42, %v2275_v29  ;;  %v2246_v57 = vmax.f32 %v2224_v3, 1e-20 }
 0x571   :  { %v1706_v44 = vpop.f32.mrf.mxu2 }
 0x572   :  { %v1758_v62 = vmin.f32 %v1706_v44, 0.0  ;;  %v3231_v9 = vpop.eup %3230  ;;  %v2187_v0 = vmul.f32 1.442695, %v2156_v46  ;;  %2771 = vmatmul.msk.bf16.vlgmr.msrb.gmra.mxu1 %vm4882_vm8, %v1835_v5  ;;  %vm1742_vm10 = vcmp.gt.f32.partialorder %v1706_v44, 0.0 }
 0x573   :  { %v3233_v51 = vpop.eup %3232  ;;  %v4652_v23 = vsel %vm4881_vm5, %v3231_v9, 0.0 }
 0x574   :  { %v1777_v25 = vmul.f32 1.442695, %v1758_v62  ;;  %v3235_v56 = vpop.eup %3234  ;;  %3238 = vpow2.f32 %v2187_v0  ;;  %1622 = vadd.xlane.f32.xlu2 %v4652_v23  ;;  %v1666_v24 = vmul.f32 %v3233_v51, %v4542_v63 }
 0x575   :  { %2324 = vmatmul.bf16.gmra.mxu0 %v2288_v4  ;;  %v3237_v22 = vpop.eup %3236  ;;  %v1667_v52 = vmul.f32 %v3235_v56, %v4548_v49 }
 0x576   :  { %3240 = vpow2.f32 %v1777_v25  ;;  %v2749_v39 = vadd.f32 -1.0, %v3237_v22 }
 0x577   :  { %v2222_v30 = vpop.xlane.xlu0 %2221  ;;  %3242 = vrcp.f32 %v2246_v57  ;;  %v1678_v12 = vpack.c.bf16 %v1667_v52, %v1666_v24 }
 0x578   :  { %v2245_v20 = vmax.f32 %v2222_v30, 1e-20  ;;  %v1821_v49 = vsel %vm1741_vm9, %v4636_v2, %v2749_v39  ;;  %vm4887_vm9 = vmmov %vm4885_vm3 }
 0x57a   :  { %v3239_v6 = vpop.eup %3238  ;;  %3244 = vrcp.f32 %v2245_v20 }
 0x57b   :  { %v4659_v55 = vsel %vm4880_vm4, %v3239_v6, 0.0  ;;  %vm4886_vm4 = vmmov %vm4885_vm3 }
 0x57c   :  { %v3241_v28 = vpop.eup %3240  ;;  %2235 = vadd.xlane.f32.xlu2 %v4659_v55 }
 0x57d   :  { %v2750_v41 = vadd.f32 -1.0, %v3241_v28  ;;  %1718 = vmatmul.bf16.gmra.mxu2 %v1678_v12  ;;  %v3243_v63 = vpop.eup %3242 }
 0x57e   :  { %v2278_v13 = vmul.f32 %v3243_v63, %v4558_v7 }
 0x57f   :  { %v1822_v47 = vsel %vm1742_vm10, %v1706_v44, %v2750_v41  ;;  %v1617_v27 = vpop.xlane.xlu0 %1616  ;;  %vm4888_vm10 = vmmov %vm4885_vm3 }
 0x580   :  { %v1836_v17 = vpack.c.bf16 %v1822_v47, %v1821_v49  ;;  %v3245_v14 = vpop.eup %3244  ;;  %v1637_v33 = vmax.f32 %v1617_v27, 1e-20  ;;  %v2841_v27 = vld [vmem:[%s4773_s3 + $0x30] sm:$0xff] }
 0x581   :  { %v2277_v11 = vmul.f32 %v3245_v14, %v4564_v36 }
 0x582   :  { %2772 = vmatmul.msk.bf16.gmra.mxu1 %vm4883_vm12, %v1836_v17  ;;  %3246 = vrcp.f32 %v1637_v33 }
 0x583   :  { %v2289_v53 = vpack.c.bf16 %v2278_v13, %v2277_v11 }
 0x585   :  { %2329 = vmatmul.bf16.gmra.mxu0 %v2289_v53  ;;  %v2842_v53 = vld [vmem:[%s4773_s3 + $0x38] sm:$0xff] }
 0x586   :  { %2500 = vmatpush.bf16.msra.mxu2 %v2842_v53  ;;  %2937 = vmatpush.bf16.msrb.mxu3 %v2842_v53 }
 0x588   :  { %v3247_v2 = vpop.eup %3246 }
 0x589   :  { %v1669_v7 = vmul.f32 %v3247_v2, %v4569_v38 }
 0x58a   :  { %2501 = vmatpush.bf16.msra.mxu2 %v2841_v27  ;;  %2938 = vmatpush.bf16.msrb.mxu3 %v2841_v27 }
 0x5a0   :  { %v2226_v50 = vpop.xlane.xlu2 %2225 }
 0x5a1   :  { %v2247_v26 = vmax.f32 %v2226_v50, 1e-20 }
 0x5a9   :  { %v1615_v16 = vpop.xlane.xlu1 %1614 }
 0x5aa   :  { %v1636_v18 = vmax.f32 %v1615_v16, 1e-20 }
 0x5ac   :  { %3248 = vrcp.f32 %v1636_v18 }
 0x5ad   :  { %3250 = vrcp.f32 %v2247_v26 }
 0x5b2   :  { %v2228_v21 = vpop.xlane.xlu1 %2227  ;;  %v3249_v35 = vpop.eup %3248 }
 0x5b3   :  { %v2248_v54 = vmax.f32 %v2228_v21, 1e-20  ;;  %v1668_v36 = vmul.f32 %v3249_v35, %v4586_v43  ;;  %v3251_v29 = vpop.eup %3250 }
 0x5b4   :  { %v2279_v25 = vmul.f32 %v3251_v29, %v4578_v61 }
 0x5b5   :  { %3252 = vrcp.f32 %v2248_v54  ;;  %v1679_v37 = vpack.c.bf16 %v1669_v7, %v1668_v36 }
 0x5b7   :  { %1723 = vmatmul.bf16.gmra.mxu2 %v1679_v37 }
 0x5b9   :  { %v1619_v5 = vpop.xlane.xlu0 %1618  ;;  %v1709_v62 = vpop.f32.mrf.mxu2 }
 0x5ba   :  { %v1638_v44 = vmax.f32 %v1619_v5, 1e-20  ;;  %v1621_v3 = vpop.xlane.xlu2 %1620  ;;  %v2230_v9 = vpop.xlane.xlu1 %2229  ;;  %v1759_v0 = vmin.f32 %v1709_v62, 0.0  ;;  %vm1743_vm11 = vcmp.gt.f32.partialorder %v1709_v62, 0.0 }
 0x5bb   :  { %v3253_v46 = vpop.eup %3252  ;;  %v1639_v42 = vmax.f32 %v1621_v3, 1e-20  ;;  %v2249_v43 = vmax.f32 %v2230_v9, 1e-20 }
 0x5bc   :  { %v2280_v51 = vmul.f32 %v3253_v46, %v4596_v59  ;;  %3254 = vrcp.f32 %v1638_v44  ;;  %v1779_v4 = vmul.f32 1.442695, %v1759_v0 }
 0x5bd   :  { %3256 = vrcp.f32 %v1639_v42 }
 0x5be   :  { %v2290_v38 = vpack.c.bf16 %v2280_v51, %v2279_v25  ;;  %3258 = vrcp.f32 %v2249_v43 }
 0x5bf   :  { %3260 = vpow2.f32 %v1779_v4 }
 0x5c0   :  { %2334 = vmatmul.bf16.gmra.mxu0 %v2290_v38 }
 0x5c1   :  { %v2232_v56 = vpop.xlane.xlu0 %2231  ;;  %v1711_v30 = vpop.f32.mrf.mxu2 }
 0x5c2   :  { %v3255_v57 = vpop.eup %3254  ;;  %v2250_v22 = vmax.f32 %v2232_v56, 1e-20  ;;  %v1760_v52 = vmin.f32 %v1711_v30, 0.0  ;;  %vm1744_vm14 = vcmp.gt.f32.partialorder %v1711_v30, 0.0 }
 0x5c3   :  { %v3257_v24 = vpop.eup %3256  ;;  %v1670_v20 = vmul.f32 %v3255_v57, %v4606_v19 }
 0x5c4   :  { %3262 = vrcp.f32 %v2250_v22  ;;  %v1671_v59 = vmul.f32 %v3257_v24, %v4612_v60  ;;  %v1781_v6 = vmul.f32 1.442695, %v1760_v52  ;;  %v3259_v39 = vpop.eup %3258  ;;  %v4675_v60 = vpop.f32.mrf.mxu0 }
 0x5c5   :  { %v3261_v28 = vpop.eup %3260  ;;  %v2281_v41 = vmul.f32 %v3259_v39, %v4602_v1  ;;  %v2366_v35 = vmin.f32 %v4675_v60, 0.0  ;;  %vm2350_vm0 = vcmp.gt.f32.partialorder %v4675_v60, 0.0 }
 0x5c6   :  { %v1680_v61 = vpack.c.bf16 %v1671_v59, %v1670_v20  ;;  %3264 = vpow2.f32 %v1781_v6  ;;  %v2751_v49 = vadd.f32 -1.0, %v3261_v28 }
 0x5c7   :  { %v2382_v44 = vmul.f32 1.442695, %v2366_v35 }
 0x5c8   :  { %1728 = vmatmul.bf16.gmra.mxu2 %v1680_v61  ;;  %v1823_v19 = vsel %vm1743_vm11, %v1709_v62, %v2751_v49 }
 0x5ca   :  { %v3263_v12 = vpop.eup %3262 }
 0x5cb   :  { %v2282_v63 = vmul.f32 %v3263_v12, %v4621_v8  ;;  %v1625_v8 = vpop.xlane.xlu1 %1624 }
 0x5cc   :  { %v3265_v47 = vpop.eup %3264  ;;  %v2312_v1 = vpop.f32.mrf.mxu0  ;;  %v1641_v16 = vmax.f32 %v1625_v8, 1e-20 }
 0x5cd   :  { %v2291_v17 = vpack.c.bf16 %v2282_v63, %v2281_v41  ;;  %v2752_v14 = vadd.f32 -1.0, %v3265_v47  ;;  %v2367_v2 = vmin.f32 %v2312_v1, 0.0  ;;  %vm2351_vm15 = vcmp.gt.f32.partialorder %v2312_v1, 0.0 }
 0x5ce   :  { %3266 = vrcp.f32 %v1641_v16 }
 0x5cf   :  { %v1824_v11 = vsel %vm1744_vm14, %v1711_v30, %v2752_v14  ;;  %v2384_v7 = vmul.f32 1.442695, %v2367_v2  ;;  %vm4889_vm14 = vmmov %vm4885_vm3 }
 0x5d0   :  { %2339 = vmatmul.bf16.gmra.mxu0 %v2291_v17  ;;  %v1837_v13 = vpack.c.bf16 %v1824_v11, %v1823_v19 }
 0x5d2   :  { %2773 = vmatmul.msk.bf16.gmra.mxu1 %vm4884_vm13, %v1837_v13 }
 0x5d4   :  { %v4684_v33 = vpop.f32.mrf.mxu0  ;;  %v3267_v54 = vpop.eup %3266 }
 0x5d5   :  { %v1673_v42 = vmul.f32 %v3267_v54, %v4629_v10  ;;  %v2368_v20 = vmin.f32 %v4684_v33, 0.0  ;;  %vm2352_vm6 = vcmp.gt.f32.partialorder %v4684_v33, 0.0 }
 0x5dc   :  { %v4687_v36 = vpop.f32.mrf.mxu0 }
 0x5dd   :  { %v2369_v10 = vmin.f32 %v4687_v36, 0.0  ;;  %vm2353_vm5 = vcmp.gt.f32.partialorder %v4687_v36, 0.0 }
 0x5df   :  { %v2388_v61 = vmul.f32 1.442695, %v2369_v10 }
 0x5e0   :  { %v2234_v26 = vpop.xlane.xlu0 %2233 }
 0x5e1   :  { %v2251_v21 = vmax.f32 %v2234_v26, 1e-20 }
 0x5e4   :  { %v4691_v25 = vpop.f32.mrf.mxu0 }
 0x5e5   :  { %v2370_v26 = vmin.f32 %v4691_v25, 0.0  ;;  %vm2354_vm11 = vcmp.gt.f32.partialorder %v4691_v25, 0.0 }
 0x5e7   :  { %v1623_v18 = vpop.xlane.xlu2 %1622 }
 0x5e8   :  { %v1640_v50 = vmax.f32 %v1623_v18, 1e-20 }
 0x5ea   :  { %3268 = vrcp.f32 %v1640_v50 }
 0x5eb   :  { %3270 = vrcp.f32 %v2251_v21 }
 0x5ec   :  { %v4697_v28 = vpop.f32.mrf.mxu0 }
 0x5ed   :  { %v2371_v16 = vmin.f32 %v4697_v28, 0.0  ;;  %vm2355_vm12 = vcmp.gt.f32.partialorder %v4697_v28, 0.0 }
 0x5ef   :  { %v2236_v37 = vpop.xlane.xlu2 %2235  ;;  %v2392_v35 = vmul.f32 1.442695, %v2371_v16 }
 0x5f0   :  { %v3269_v29 = vpop.eup %3268  ;;  %v2252_v5 = vmax.f32 %v2236_v37, 1e-20  ;;  %v1714_v46 = vpop.f32.mrf.mxu2 }
 0x5f1   :  { %v1761_v3 = vmin.f32 %v1714_v46, 0.0  ;;  %v1672_v62 = vmul.f32 %v3269_v29, %v4652_v23  ;;  %v3271_v51 = vpop.eup %3270  ;;  %vm1745_vm1 = vcmp.gt.f32.partialorder %v1714_v46, 0.0 }
 0x5f2   :  { %3272 = vrcp.f32 %v2252_v5  ;;  %v2283_v57 = vmul.f32 %v3271_v51, %v4643_v45 }
 0x5f3   :  { %3274 = vpow2.f32 %v2384_v7  ;;  %v1681_v9 = vpack.c.bf16 %v1673_v42, %v1672_v62  ;;  %v1783_v0 = vmul.f32 1.442695, %v1761_v3  ;;  %v2390_v7 = vmul.f32 1.442695, %v2370_v26 }
 0x5f4   :  { %3276 = vpow2.f32 %v2382_v44 }
 0x5f5   :  { %1733 = vmatmul.bf16.gmra.mxu2 %v1681_v9  ;;  %3278 = vpow2.f32 %v1783_v0 }
 0x5f8   :  { %v3273_v43 = vpop.eup %3272  ;;  %v1716_v38 = vpop.f32.mrf.mxu2 }
 0x5f9   :  { %v3275_v4 = vpop.eup %3274  ;;  %v1762_v56 = vmin.f32 %v1716_v38, 0.0  ;;  %v2284_v23 = vmul.f32 %v3273_v43, %v4659_v55  ;;  %v2386_v55 = vmul.f32 1.442695, %v2368_v20  ;;  %vm1746_vm2 = vcmp.gt.f32.partialorder %v1716_v38, 0.0 }
 0x5fa   :  { %v3277_v22 = vpop.eup %3276  ;;  %v2788_v52 = vadd.f32 -1.0, %v3275_v4 }
 0x5fb   :  { %v1785_v30 = vmul.f32 1.442695, %v1762_v56  ;;  %v2292_v24 = vpack.c.bf16 %v2284_v23, %v2283_v57  ;;  %v2787_v59 = vadd.f32 -1.0, %v3277_v22  ;;  %v3279_v6 = vpop.eup %3278 }
 0x5fc   :  { %v2431_v39 = vsel %vm2351_vm15, %v2312_v1, %v2788_v52  ;;  %v2753_v63 = vadd.f32 -1.0, %v3279_v6 }
 0x5fd   :  { %3280 = vpow2.f32 %v1785_v30  ;;  %2344 = vmatmul.bf16.gmra.mxu0 %v2292_v24  ;;  %v2430_v41 = vsel %vm2350_vm0, %v4675_v60, %v2787_v59  ;;  %v2325_v60 = vpop.f32.mrf.mxu0  ;;  %vm4890_vm0 = vmmov %vm4885_vm3 }
 0x5fe   :  { %v2446_v47 = vpack.c.bf16 %v2431_v39, %v2430_v41  ;;  %3282 = vpow2.f32 %v2388_v61  ;;  %v1825_v19 = vsel %vm1745_vm1, %v1714_v46, %v2753_v63  ;;  %v2372_v43 = vmin.f32 %v2325_v60, 0.0 }
 0x5ff   :  { %3284 = vpow2.f32 %v2386_v55  ;;  %vm2356_vm15 = vcmp.gt.f32.partialorder %v2325_v60, 0.0 }
 0x600   :  { %v1719_v45 = vpop.f32.mrf.mxu2  ;;  %v2394_v23 = vmul.f32 1.442695, %v2372_v43 }
 0x601   :  { %v1763_v12 = vmin.f32 %v1719_v45, 0.0  ;;  %vm1747_vm7 = vcmp.gt.f32.partialorder %v1719_v45, 0.0 }
 0x603   :  { %v3281_v49 = vpop.eup %3280  ;;  %v1787_v14 = vmul.f32 1.442695, %v1763_v12 }
 0x604   :  { %v2754_v17 = vadd.f32 -1.0, %v3281_v49  ;;  %v3283_v1 = vpop.eup %3282 }
 0x605   :  { %2811 = vmatmul.msk.bf16.vlgmr.msra.gmra.mxu2 %vm4885_vm3, %v2446_v47  ;;  %3286 = vpow2.f32 %v1787_v14  ;;  %v3285_v27 = vpop.eup %3284  ;;  %v2790_v50 = vadd.f32 -1.0, %v3283_v1  ;;  %v2327_v44 = vpop.f32.mrf.mxu0  ;;  %vm4891_vm3 = vmmov %vm4890_vm0 }
 0x606   :  { %v1826_v11 = vsel %vm1746_vm2, %v1716_v38, %v2754_v17  ;;  %v2789_v2 = vadd.f32 -1.0, %v3285_v27  ;;  %v2373_v51 = vmin.f32 %v2327_v44, 0.0  ;;  %vm2357_vm13 = vcmp.gt.f32.partialorder %v2327_v44, 0.0 }
 0x607   :  { %v1838_v13 = vpack.c.bf16 %v1826_v11, %v1825_v19  ;;  %v2433_v54 = vsel %vm2353_vm5, %v4687_v36, %v2790_v50 }
 0x608   :  { %v1721_v53 = vpop.f32.mrf.mxu2  ;;  %v2432_v37 = vsel %vm2352_vm6, %v4684_v33, %v2789_v2  ;;  %v2396_v56 = vmul.f32 1.442695, %v2373_v51 }
 0x609   :  { %v1764_v8 = vmin.f32 %v1721_v53, 0.0  ;;  %2774 = vmatmul.msk.bf16.gmra.mxu1 %vm4886_vm4, %v1838_v13  ;;  %v2447_v46 = vpack.c.bf16 %v2433_v54, %v2432_v37  ;;  %vm1748_vm8 = vcmp.gt.f32.partialorder %v1721_v53, 0.0 }
 0x60b   :  { %v1789_v18 = vmul.f32 1.442695, %v1764_v8  ;;  %v3287_v21 = vpop.eup %3286 }
 0x60c   :  { %v2755_v29 = vadd.f32 -1.0, %v3287_v21 }
 0x60d   :  { %3288 = vpow2.f32 %v1789_v18  ;;  %v2330_v4 = vpop.f32.mrf.mxu0 }
 0x60e   :  { %3290 = vpow2.f32 %v2392_v35  ;;  %v1827_v62 = vsel %vm1747_vm7, %v1719_v45, %v2755_v29  ;;  %v2374_v6 = vmin.f32 %v2330_v4, 0.0  ;;  %vm2358_vm2 = vcmp.gt.f32.partialorder %v2330_v4, 0.0 }
 0x60f   :  { %3292 = vpow2.f32 %v2390_v7 }
 0x610   :  { %3294 = vpow2.f32 %v2396_v56  ;;  %v2398_v45 = vmul.f32 1.442695, %v2374_v6 }
 0x611   :  { %3296 = vpow2.f32 %v2394_v23 }
 0x613   :  { %v3289_v5 = vpop.eup %3288 }
 0x614   :  { %v2756_v3 = vadd.f32 -1.0, %v3289_v5  ;;  %v3291_v36 = vpop.eup %3290 }
 0x615   :  { %2812 = vmatmul.msk.bf16.gmra.mxu2 %vm4887_vm9, %v2447_v46  ;;  %v3293_v0 = vpop.eup %3292  ;;  %v2792_v33 = vadd.f32 -1.0, %v3291_v36  ;;  %v2332_v30 = vpop.f32.mrf.mxu0  ;;  %vm4893_vm9 = vmmov %vm4890_vm0 }
 0x616   :  { %v1828_v42 = vsel %vm1748_vm8, %v1721_v53, %v2756_v3  ;;  %v2791_v38 = vadd.f32 -1.0, %v3293_v0  ;;  %v3295_v24 = vpop.eup %3294  ;;  %v2375_v20 = vmin.f32 %v2332_v30, 0.0  ;;  %vm2359_vm1 = vcmp.gt.f32.partialorder %v2332_v30, 0.0  ;;  %vm4892_vm8 = vmmov %vm4890_vm0 }
 0x617   :  { %v1839_v9 = vpack.c.bf16 %v1828_v42, %v1827_v62  ;;  %v2435_v57 = vsel %vm2355_vm12, %v4697_v28, %v2792_v33  ;;  %v3297_v52 = vpop.eup %3296  ;;  %v2794_v59 = vadd.f32 -1.0, %v3295_v24 }
 0x618   :  { %v2434_v22 = vsel %vm2354_vm11, %v4691_v25, %v2791_v38  ;;  %v2793_v61 = vadd.f32 -1.0, %v3297_v52  ;;  %v2400_v39 = vmul.f32 1.442695, %v2375_v20 }
 0x619   :  { %2775 = vmatmul.msk.bf16.gmra.mxu1 %vm4888_vm10, %v1839_v9  ;;  %v2448_v10 = vpack.c.bf16 %v2435_v57, %v2434_v22  ;;  %v2437_v28 = vsel %vm2357_vm13, %v2327_v44, %v2794_v59  ;;  %vm4894_vm13 = vmmov %vm4890_vm0 }
 0x61a   :  { %v2436_v55 = vsel %vm2356_vm15, %v2325_v60, %v2793_v61  ;;  %3298 = vpow2.f32 %v2400_v39  ;;  %vm4895_vm15 = vmmov %vm4890_vm0 }
 0x61b   :  { %v2449_v12 = vpack.c.bf16 %v2437_v28, %v2436_v55  ;;  %3300 = vpow2.f32 %v2398_v45 }
 0x620   :  { %v3299_v25 = vpop.eup %3298 }
 0x621   :  { %v3301_v49 = vpop.eup %3300  ;;  %v2796_v47 = vadd.f32 -1.0, %v3299_v25 }
 0x622   :  { %v2795_v19 = vadd.f32 -1.0, %v3301_v49 }
 0x623   :  { %v2439_v13 = vsel %vm2359_vm1, %v2332_v30, %v2796_v47 }
 0x624   :  { %v2438_v8 = vsel %vm2358_vm2, %v2330_v4, %v2795_v19 }
 0x625   :  { %2813 = vmatmul.msk.bf16.gmra.mxu2 %vm4889_vm14, %v2448_v10  ;;  %v2450_v27 = vpack.c.bf16 %v2439_v13, %v2438_v8 }
 0x635   :  { %2814 = vmatmul.msk.bf16.gmra.mxu2 %vm4890_vm0, %v2449_v12 }
 0x63a   :  { %v1724_v41 = vpop.f32.mrf.mxu2 }
 0x63b   :  { %v1765_v63 = vmin.f32 %v1724_v41, 0.0  ;;  %vm1749_vm4 = vcmp.gt.f32.partialorder %v1724_v41, 0.0 }
 0x63d   :  { %v2335_v17 = vpop.f32.mrf.mxu0  ;;  %v1791_v11 = vmul.f32 1.442695, %v1765_v63  ;;  %v1892_v63 = vpop.f32.mrf.mxu1 }
 0x63e   :  { %v2376_v14 = vmin.f32 %v2335_v17, 0.0  ;;  %vm2360_vm6 = vcmp.gt.f32.partialorder %v2335_v17, 0.0 }
 0x63f   :  { %3302 = vpow2.f32 %v1791_v11 }
 0x640   :  { %v2402_v53 = vmul.f32 1.442695, %v2376_v14 }
 0x642   :  { %v1726_v1 = vpop.f32.mrf.mxu2  ;;  %3304 = vpow2.f32 %v2402_v53 }
 0x643   :  { %v1766_v60 = vmin.f32 %v1726_v1, 0.0  ;;  %vm1750_vm5 = vcmp.gt.f32.partialorder %v1726_v1, 0.0 }
 0x645   :  { %v1793_v16 = vmul.f32 1.442695, %v1766_v60  ;;  %v2337_v18 = vpop.f32.mrf.mxu0  ;;  %2815 = vmatmul.msk.bf16.gmra.mxu2 %vm4891_vm3, %v2450_v27  ;;  %v3303_v2 = vpop.eup %3302 }
 0x646   :  { %v2377_v50 = vmin.f32 %v2337_v18, 0.0  ;;  %v2757_v54 = vadd.f32 -1.0, %v3303_v2  ;;  %vm2361_vm7 = vcmp.gt.f32.partialorder %v2337_v18, 0.0  ;;  %v1894_v14 = vpop.f32.mrf.mxu1 }
 0x647   :  { %3306 = vpow2.f32 %v1793_v16 }
 0x648   :  { %v2404_v26 = vmul.f32 1.442695, %v2377_v50  ;;  %v3305_v35 = vpop.eup %3304  ;;  %v1829_v62 = vsel %vm1749_vm4, %v1724_v41, %v2757_v54  ;;  %vm4896_vm4 = vmmov %vm4892_vm8 }
 0x649   :  { %v2797_v44 = vadd.f32 -1.0, %v3305_v35 }
 0x64a   :  { %3308 = vpow2.f32 %v2404_v26 }
 0x64b   :  { %v1729_v21 = vpop.f32.mrf.mxu2  ;;  %v2440_v33 = vsel %vm2360_vm6, %v2335_v17, %v2797_v44 }
 0x64c   :  { %v1767_v7 = vmin.f32 %v1729_v21, 0.0  ;;  %vm1751_vm10 = vcmp.gt.f32.partialorder %v1729_v21, 0.0 }
 0x64d   :  { %v3307_v37 = vpop.eup %3306  ;;  %v2340_v29 = vpop.f32.mrf.mxu0 }
 0x64e   :  { %v2758_v5 = vadd.f32 -1.0, %v3307_v37  ;;  %v2378_v46 = vmin.f32 %v2340_v29, 0.0  ;;  %v1795_v9 = vmul.f32 1.442695, %v1767_v7  ;;  %vm2362_vm11 = vcmp.gt.f32.partialorder %v2340_v29, 0.0  ;;  %v1897_v16 = vpop.f32.mrf.mxu1 }
 0x650   :  { %v3309_v3 = vpop.eup %3308  ;;  %v1830_v42 = vsel %vm1750_vm5, %v1726_v1, %v2758_v5  ;;  %v2406_v51 = vmul.f32 1.442695, %v2378_v46  ;;  %3310 = vpow2.f32 %v1795_v9  ;;  %v1932_v5 = vadd.f32 %v1892_v63, %v4215_v15  ;;  %vm4897_vm5 = vmmov %vm4896_vm4 }
 0x651   :  { %v1840_v36 = vpack.c.bf16 %v1830_v42, %v1829_v62  ;;  %v2798_v0 = vadd.f32 -1.0, %v3309_v3 }
 0x652   :  { %3312 = vpow2.f32 %v2406_v51 }
 0x653   :  { %v2441_v43 = vsel %vm2361_vm7, %v2337_v18, %v2798_v0  ;;  %v1731_v38 = vpop.f32.mrf.mxu2  ;;  %2776 = vmatmul.msk.bf16.gmra.mxu1 %vm4892_vm8, %v1840_v36 }
 0x654   :  { %v2451_v4 = vpack.c.bf16 %v2441_v43, %v2440_v33  ;;  %v1768_v56 = vmin.f32 %v1731_v38, 0.0  ;;  %vm1752_vm12 = vcmp.gt.f32.partialorder %v1731_v38, 0.0 }
 0x655   :  { %v2342_v57 = vpop.f32.mrf.mxu0 }
 0x656   :  { %v1797_v23 = vmul.f32 1.442695, %v1768_v56  ;;  %v2379_v22 = vmin.f32 %v2342_v57, 0.0  ;;  %2816 = vmatmul.msk.bf16.gmra.mxu2 %vm4893_vm9, %v2451_v4  ;;  %v3311_v30 = vpop.eup %3310  ;;  %vm2363_vm14 = vcmp.gt.f32.partialorder %v2342_v57, 0.0  ;;  %v1899_v42 = vpop.f32.mrf.mxu1  ;;  %v1305_v4 = vadd.f32 %v4226_v58, %v4220_v32 }
 0x657   :  { %v2759_v52 = vadd.f32 -1.0, %v3311_v30  ;;  %v1934_v56 = vadd.f32 %v1897_v16, %v4224_v34  ;;  %v4905_v16 = vld [vmem:[#allocation7_spill] sm:$0xff] }
 0x658   :  { %3314 = vpow2.f32 %v1797_v23  ;;  %v2408_v10 = vmul.f32 1.442695, %v2379_v22  ;;  %v3313_v24 = vpop.eup %3312 }
 0x659   :  { %v2799_v59 = vadd.f32 -1.0, %v3313_v24  ;;  %v1831_v39 = vsel %vm1751_vm10, %v1729_v21, %v2759_v52 }
 0x65a   :  { %3316 = vpow2.f32 %v2408_v10 }
 0x65b   :  { %v2442_v12 = vsel %vm2362_vm11, %v2340_v29, %v2799_v59  ;;  %v1300_v29 = vadd.f32 %v4217_v48, %v4209_v31  ;;  %v4898_v59 = vld [vmem:[#allocation3_spill] sm:$0xff] }
 0x65d   :  { %v1933_v62 = vadd.f32 %v1894_v14, %v1300_v29  ;;  %v4906_v29 = vld [vmem:[#allocation10_spill] sm:$0xff] }
 0x65e   :  { %v3315_v20 = vpop.eup %3314  ;;  %v1902_v15 = vpop.f32.mrf.mxu1 }
 0x65f   :  { %v2760_v6 = vadd.f32 -1.0, %v3315_v20 }
 0x660   :  { %v3317_v61 = vpop.eup %3316 }
 0x661   :  { %v1832_v28 = vsel %vm1752_vm12, %v1731_v38, %v2760_v6  ;;  %v2800_v45 = vadd.f32 -1.0, %v3317_v61  ;;  %v1310_v6 = vadd.f32 %v4898_v59, %v4230_v40  ;;  %v4899_v61 = vld [vmem:[#allocation2_spill] sm:$0xff] }
 0x662   :  { %v1841_v55 = vpack.c.bf16 %v1832_v28, %v1831_v39  ;;  %v1936_v39 = vadd.f32 %v1902_v15, %v4899_v61 }
 0x663   :  { %v2443_v25 = vsel %vm2363_vm14, %v2342_v57, %v2800_v45  ;;  %v1935_v57 = vadd.f32 %v1899_v42, %v1305_v4 }
 0x664   :  { %v2452_v41 = vpack.c.bf16 %v2443_v25, %v2442_v12  ;;  %2777 = vmatmul.msk.bf16.gmra.mxu1 %vm4894_vm13, %v1841_v55  ;;  %v4900_v25 = vld [vmem:[#allocation5_spill] sm:$0xff] }
 0x666   :  { %2817 = vmatmul.msk.bf16.gmra.mxu2 %vm4895_vm15, %v2452_v41  ;;  %v1904_v22 = vpop.f32.mrf.mxu1  ;;  %v4901_v41 = vld [vmem:[#allocation6_spill] sm:$0xff] }
 0x667   :  { %v1937_v32 = vadd.f32 %v1904_v22, %v1310_v6  ;;  %v1315_v63 = vadd.f32 %v4901_v41, %v4900_v25 }
 0x678   :  { %v1734_v49 = vpop.f32.mrf.mxu2 }
 0x679   :  { %v1769_v47 = vmin.f32 %v1734_v49, 0.0  ;;  %vm1753_vm0 = vcmp.gt.f32.partialorder %v1734_v49, 0.0 }
 0x67a   :  { %v2345_v17 = vpop.f32.mrf.mxu0 }
 0x67b   :  { %v2380_v19 = vmin.f32 %v2345_v17, 0.0  ;;  %v1799_v11 = vmul.f32 1.442695, %v1769_v47  ;;  %vm2364_vm2 = vcmp.gt.f32.partialorder %v2345_v17, 0.0  ;;  %v4902_v47 = vld [vmem:[#allocation4_spill] sm:$0xff] }
 0x67d   :  { %v2410_v13 = vmul.f32 1.442695, %v2380_v19  ;;  %3318 = vpow2.f32 %v1799_v11 }
 0x67f   :  { %3320 = vpow2.f32 %v2410_v13 }
 0x680   :  { %v1736_v53 = vpop.f32.mrf.mxu2 }
 0x681   :  { %v1770_v1 = vmin.f32 %v1736_v53, 0.0  ;;  %vm1754_vm1 = vcmp.gt.f32.partialorder %v1736_v53, 0.0 }
 0x682   :  { %v2347_v8 = vpop.f32.mrf.mxu0 }
 0x683   :  { %v1801_v60 = vmul.f32 1.442695, %v1770_v1  ;;  %v2381_v27 = vmin.f32 %v2347_v8, 0.0  ;;  %v3319_v50 = vpop.eup %3318  ;;  %vm2365_vm3 = vcmp.gt.f32.partialorder %v2347_v8, 0.0 }
 0x684   :  { %v2761_v21 = vadd.f32 -1.0, %v3319_v50 }
 0x685   :  { %3322 = vpow2.f32 %v1801_v60  ;;  %v2412_v18 = vmul.f32 1.442695, %v2381_v27  ;;  %v3321_v2 = vpop.eup %3320  ;;  %v4904_v60 = vld [vmem:[#allocation8_spill] sm:$0xff] }
 0x686   :  { %v2801_v54 = vadd.f32 -1.0, %v3321_v2  ;;  %v1833_v46 = vsel %vm1753_vm0, %v1734_v49, %v2761_v21  ;;  %v1907_v20 = vpop.f32.mrf.mxu1 }
 0x687   :  { %3324 = vpow2.f32 %v2412_v18 }
 0x688   :  { %v2503_v26 = vpop.f32.mrf.mxu2  ;;  %v2444_v36 = vsel %vm2364_vm2, %v2345_v17, %v2801_v54  ;;  %v1938_v17 = vadd.f32 %v1907_v20, %v4902_v47 }
 0x689   :  { %v2543_v43 = vadd.f32 %v2503_v26, %v1932_v5 }
 0x68b   :  { %v3323_v35 = vpop.eup %3322 }
 0x68c   :  { %v2762_v7 = vadd.f32 -1.0, %v3323_v35 }
 0x68d   :  { %v3325_v37 = vpop.eup %3324 }
 0x68e   :  { %v1834_v44 = vsel %vm1754_vm1, %v1736_v53, %v2762_v7  ;;  %v2802_v3 = vadd.f32 -1.0, %v3325_v37  ;;  %v1909_v45 = vpop.f32.mrf.mxu1 }
 0x68f   :  { %v1842_v9 = vpack.c.bf16 %v1834_v44, %v1833_v46  ;;  %v1939_v40 = vadd.f32 %v1909_v45, %v1315_v63  ;;  %v4907_v46 = vld [vmem:[#allocation11_spill] sm:$0xff] }
 0x690   :  { %v2445_v0 = vsel %vm2365_vm3, %v2347_v8, %v2802_v3  ;;  %v2505_v51 = vpop.f32.mrf.mxu2  ;;  %v4903_v8 = vld [vmem:[#allocation9_spill] sm:$0xff] }
 0x691   :  { %v2453_v33 = vpack.c.bf16 %v2445_v0, %v2444_v36  ;;  %v2544_v38 = vadd.f32 %v2505_v51, %v1933_v62  ;;  %2778 = vmatmul.msk.bf16.gmra.mxu1 %vm4896_vm4, %v1842_v9  ;;  %v1320_v27 = vadd.f32 %v4904_v60, %v4903_v8 }
 0x693   :  { %v2878_v31 = vpack.c.bf16 %v2544_v38, %v2543_v43  ;;  %2818 = vmatmul.msk.bf16.vlgmr.msrb.gmra.mxu3 %vm4897_vm5, %v2453_v33  ;;  %v4908_v33 = vld [vmem:[#allocation12_spill] sm:$0xff]  ;;  %v4909_v38 = vld [vmem:[#allocation14_spill] sm:$0xff] }
 0x695   :  { %2879 = vst [vmem:[%s4774_s4] sm:$0xff] %v2878_v31  }
 0x696   :  { %v1912_v49 = vpop.f32.mrf.mxu1 }
 0x697   :  { %v1940_v18 = vadd.f32 %v1912_v49, %v4905_v16 }
 0x698   :  { %v2508_v48 = vpop.f32.mrf.mxu2 }
 0x699   :  { %v2545_v10 = vadd.f32 %v2508_v48, %v1934_v56 }
 0x69e   :  { %v1914_v53 = vpop.f32.mrf.mxu1 }
 0x69f   :  { %v1941_v50 = vadd.f32 %v1914_v53, %v1320_v27 }
 0x6a0   :  { %v2510_v23 = vpop.f32.mrf.mxu2 }
 0x6a1   :  { %v2546_v30 = vadd.f32 %v2510_v23, %v1935_v57 }
 0x6a3   :  { %v2883_v24 = vpack.c.bf16 %v2546_v30, %v2545_v10  ;;  %v4910_v10 = vld [vmem:[#allocation16_spill] sm:$0xff]  ;;  %v4911_v30 = vld [vmem:[#allocation13_spill] sm:$0xff] }
 0x6a5   :  { %2922 = vst [vmem:[%s4774_s4 + $0x8] sm:$0xff] %v2883_v24   ;;  %v1335_v24 = vadd.f32 %v4911_v30, %v4910_v10 }
 0x6a8   :  { %v2513_v52 = vpop.f32.mrf.mxu2 }
 0x6a9   :  { %v2547_v34 = vadd.f32 %v2513_v52, %v1936_v39  ;;  %v4912_v52 = vld [vmem:[#allocation15_spill] sm:$0xff] }
 0x6b0   :  { %v2515_v58 = vpop.f32.mrf.mxu2 }
 0x6b1   :  { %v2548_v28 = vadd.f32 %v2515_v58, %v1937_v32 }
 0x6b3   :  { %v2888_v55 = vpack.c.bf16 %v2548_v28, %v2547_v34 }
 0x6b5   :  { %2923 = vst [vmem:[%s4774_s4 + $0x10] sm:$0xff] %v2888_v55  }
 0x6b8   :  { %v2518_v12 = vpop.f32.mrf.mxu2 }
 0x6b9   :  { %v2549_v19 = vadd.f32 %v2518_v12, %v1938_v17 }
 0x6c0   :  { %v2520_v14 = vpop.f32.mrf.mxu2 }
 0x6c1   :  { %v2550_v11 = vadd.f32 %v2520_v14, %v1939_v40 }
 0x6c3   :  { %v2893_v13 = vpack.c.bf16 %v2550_v11, %v2549_v19 }
 0x6c5   :  { %2924 = vst [vmem:[%s4774_s4 + $0x18] sm:$0xff] %v2893_v13  }
 0x6c8   :  { %v2523_v1 = vpop.f32.mrf.mxu2 }
 0x6c9   :  { %v2551_v21 = vadd.f32 %v2523_v1, %v1940_v18 }
 0x6d0   :  { %v1917_v26 = vpop.f32.mrf.mxu1  ;;  %v2525_v2 = vpop.f32.mrf.mxu2 }
 0x6d1   :  { %v2552_v35 = vadd.f32 %v2525_v2, %v1941_v50  ;;  %v1942_v5 = vadd.f32 %v1917_v26, %v4906_v29 }
 0x6d3   :  { %v2898_v54 = vpack.c.bf16 %v2552_v35, %v2551_v21 }
 0x6d5   :  { %2925 = vst [vmem:[%s4774_s4 + $0x20] sm:$0xff] %v2898_v54  }
 0x6d8   :  { %v1919_v7 = vpop.f32.mrf.mxu1 }
 0x6d9   :  { %v2528_v37 = vpop.f32.mrf.mxu2  ;;  %v1943_v44 = vadd.f32 %v1919_v7, %v4907_v46 }
 0x6da   :  { %v2553_v62 = vadd.f32 %v2528_v37, %v1942_v5 }
 0x6e1   :  { %v2530_v3 = vpop.f32.mrf.mxu2  ;;  %v1922_v9 = vpop.f32.mrf.mxu1 }
 0x6e2   :  { %v2554_v42 = vadd.f32 %v2530_v3, %v1943_v44  ;;  %v1944_v43 = vadd.f32 %v1922_v9, %v4908_v33 }
 0x6e4   :  { %v2903_v36 = vpack.c.bf16 %v2554_v42, %v2553_v62 }
 0x6e6   :  { %2926 = vst [vmem:[%s4774_s4 + $0x28] sm:$0xff] %v2903_v36  }
 0x6e9   :  { %v2533_v0 = vpop.f32.mrf.mxu2  ;;  %v1924_v51 = vpop.f32.mrf.mxu1 }
 0x6ea   :  { %v1945_v31 = vadd.f32 %v1924_v51, %v4909_v38  ;;  %v2555_v48 = vadd.f32 %v2533_v0, %v1944_v43 }
 0x6f1   :  { %v2535_v15 = vpop.f32.mrf.mxu2 }
 0x6f2   :  { %v2556_v4 = vadd.f32 %v2535_v15, %v1945_v31 }
 0x6f4   :  { %v2908_v56 = vpack.c.bf16 %v2556_v4, %v2555_v48 }
 0x6f6   :  { %2927 = vst [vmem:[%s4774_s4 + $0x30] sm:$0xff] %v2908_v56  }
 0x70e   :  { %v1927_v57 = vpop.f32.mrf.mxu1 }
 0x70f   :  { %v1946_v20 = vadd.f32 %v1927_v57, %v4912_v52 }
 0x716   :  { %v2538_v23 = vpop.f32.mrf.mxu3  ;;  %v1929_v22 = vpop.f32.mrf.mxu1 }
 0x717   :  { %v1947_v59 = vadd.f32 %v1929_v22, %v1335_v24  ;;  %v2557_v61 = vadd.f32 %v2538_v23, %v1946_v20 }
 0x71e   :  { %v2540_v6 = vpop.f32.mrf.mxu3 }
 0x71f   :  { %v2558_v39 = vadd.f32 %v2540_v6, %v1947_v59 }
 0x721   :  { %v2913_v32 = vpack.c.bf16 %v2558_v39, %v2557_v61 }
 0x723   :  { %2928 = vst [vmem:[%s4774_s4 + $0x38] sm:$0xff] %v2913_v32  }

</bundles_post_ra>
